<compile_context>
chip_gen: v7x
topology: tpu7x:2x2x1
jax: 0.10.0
libtpu: 0.0.40
codegen_flags: <defaults>
</compile_context>

<pallas_src>
import functools

import jax
import jax.numpy as jnp
from jax import lax
from jax.experimental import pallas as pl
from jax.experimental.pallas import tpu as pltpu

SEQ = 64   # chess squares; SmolgenModule hard-codes the 64 x 32 flattening.
TC = 32    # token_compress output width (fixed by the module).


def _rup(x, m):
    return ((x + m - 1) // m) * m


# --------------------------------------------------------------- K1: fused projections
def _proj_kernel(x_ref, w_ref, o_ref):
    # x_ref: (rt, H) bf16; w_ref: (H, P_pad) bf16; o_ref: (rt, P_pad) bf16 (lane-dense).
    o_ref[...] = jnp.dot(x_ref[...], w_ref[...],
                         preferred_element_type=jnp.float32).astype(o_ref.dtype)


# --------------------------------------------------------------- K2: smolgen logits
def _smolgen_kernel(cf_ref, wpc_ref, bpc_ref, g_ref, b_ref,
                    whp_ref, bhp_ref, walp_ref, balp_ref, o_ref, hv_ref):
    # cf_ref : (Bt, 2048) bf16  flattened token_compress output
    # wpc_ref: (2048, C) bf16 ; bpc/g/b: (1, C) f32
    # whp_ref: (C, NH*C) bf16 ; bhp_ref: (1, NH*C) f32
    # walp_ref: (C, 4096) bf16 ; balp_ref: (1, 4096) f32
    # o_ref  : (NH, Bt, 4096) f32 ; hv_ref scratch: (NH*Bt, C) bf16
    num_heads = o_ref.shape[0]
    bt = cf_ref.shape[0]
    c = wpc_ref.shape[1]
    h = jnp.dot(cf_ref[...], wpc_ref[...],
                preferred_element_type=jnp.float32) + bpc_ref[...]
    h = jnp.maximum(h, 0.0)                                     # ReLU
    mean = jnp.mean(h, axis=-1, keepdims=True)                  # LayerNorm stats in f32
    var = jnp.mean(jnp.square(h - mean), axis=-1, keepdims=True)
    pv = ((h - mean) * lax.rsqrt(var + 1e-5) * g_ref[...] + b_ref[...]
          ).astype(jnp.bfloat16)
    # ONE batched head-projection matmul for all heads.
    hv_all = jnp.dot(pv, whp_ref[...],
                     preferred_element_type=jnp.float32) + bhp_ref[...]   # (Bt, NH*C)
    for hd in range(num_heads):                                 # 128-aligned lane slices
        hv_ref[hd * bt:(hd + 1) * bt, :] = (
            hv_all[:, hd * c:(hd + 1) * c].astype(jnp.bfloat16))
    # ONE batched logits matmul for all heads (lane-dense 4096-wide result).
    logits = jnp.dot(hv_ref[...], walp_ref[...],
                     preferred_element_type=jnp.float32) + balp_ref[...]  # (NH*Bt, 4096)
    for hd in range(num_heads):
        o_ref[hd] = logits[hd * bt:(hd + 1) * bt, :]


# --------------------------------------------------------------- K3: attention core
def _attn_kernel(proj_ref, pb_ref, sm_ref, wo_ref, bo_ref, o_ref, ctx_ref, *,
                 num_heads, head_dim, seg):
    # proj_ref: (Bt, 64, P_pad) bf16, columns: [q | pad | k | pad | v | pad | comp | pad]
    # pb_ref  : (NH, 64, 64) f32 ; sm_ref: (NH, Bt, 64, 64) f32
    # wo_ref  : (NH*D, H) bf16 ; bo_ref: (1, H) f32 ; o_ref: (Bt, 64, H) f32
    # ctx_ref : (Bt*64, NH*D) bf16 scratch
    bt = proj_ref.shape[0]
    d = head_dim
    off_q, off_k, off_v = 0, seg, 2 * seg
    for b in range(bt):
        proj_b = proj_ref[b]                                    # (64, P_pad) bf16
        for h in range(num_heads):
            qh = proj_b[:, off_q + h * d: off_q + (h + 1) * d]  # (64, D); scale pre-folded
            kh = proj_b[:, off_k + h * d: off_k + (h + 1) * d]
            vh = proj_b[:, off_v + h * d: off_v + (h + 1) * d]
            s = lax.dot_general(qh, kh, (((1,), (1,)), ((), ())),
                                preferred_element_type=jnp.float32)       # (64, 64) f32
            s = s + pb_ref[h] + sm_ref[h, b]
            # TODO(synk): optional attention mask (masked_fill before softmax) is not
            #             implemented; the module is exercised with mask=None.
            m = jnp.max(s, axis=-1, keepdims=True)
            p = jnp.exp(s - m)
            inv = pl.reciprocal(jnp.sum(p, axis=-1, keepdims=True), approx=True)
            attn = (p * inv).astype(jnp.bfloat16)
            ctx = jnp.dot(attn, vh, preferred_element_type=jnp.float32)   # (64, D) f32
            ctx_ref[b * SEQ:(b + 1) * SEQ, h * d:(h + 1) * d] = ctx.astype(jnp.bfloat16)
    # ONE fused out-projection over all heads and the whole batch tile.
    out = jnp.dot(ctx_ref[...], wo_ref[...],
                  preferred_element_type=jnp.float32) + bo_ref[...]       # (Bt*64, H)
    for b in range(bt):
        o_ref[b] = out[b * SEQ:(b + 1) * SEQ, :].astype(o_ref.dtype)


# --------------------------------------------------------------- one-time param packing
def pack_chess_mha_params(p, *, num_heads, head_dim):
    """Hoisted weight preprocessing (transposes, concats, scale fold, bf16 casts).

    PyTorch Linear weights are (out_features, in_features)."""
    hidden = p["wq"].shape[1]
    nhd = num_heads * head_dim
    c = p["wpc"].shape[0]
    seg = _rup(nhd, 128)
    p_pad = 3 * seg + _rup(TC, 128)
    scale = head_dim ** -0.5
    w_cat = jnp.zeros((hidden, p_pad), jnp.float32)
    w_cat = w_cat.at[:, 0:nhd].set(p["wq"].T * scale)           # fold softmax scale into Wq
    w_cat = w_cat.at[:, seg:seg + nhd].set(p["wk"].T)
    w_cat = w_cat.at[:, 2 * seg:2 * seg + nhd].set(p["wv"].T)
    w_cat = w_cat.at[:, 3 * seg:3 * seg + TC].set(p["wtc"].T)
    return dict(
        w_cat=w_cat.astype(jnp.bfloat16),                            # (H, P_pad)
        wpc_t=p["wpc"].T.astype(jnp.bfloat16),                       # (2048, C)
        bpc=p["bpc"].reshape(1, c).astype(jnp.float32),
        ln_g=p["ln_g"].reshape(1, c).astype(jnp.float32),
        ln_b=p["ln_b"].reshape(1, c).astype(jnp.float32),
        whp_cat=jnp.concatenate([p["whp"][h].T for h in range(num_heads)],
                                axis=1).astype(jnp.bfloat16),        # (C, NH*C)
        bhp_cat=p["bhp"].reshape(1, num_heads * c).astype(jnp.float32),
        walp_t=p["walp"].T.astype(jnp.bfloat16),                     # (C, 4096)
        balp=p["balp"].reshape(1, SEQ * SEQ).astype(jnp.float32),
        pos_bias=p["pos_bias"].astype(jnp.float32),                  # (NH, 64, 64)
        wo_t=p["wo"].T.astype(jnp.bfloat16),                         # (NH*D, H)
        bo=p["bo"].reshape(1, hidden).astype(jnp.float32),
    )


# --------------------------------------------------------------- forward wrapper
@functools.partial(jax.jit, static_argnames=("num_heads", "head_dim"))
def chess_mha_forward(x, packed, *, num_heads, head_dim):
    """x: (B, 64, hidden) f32; packed: output of pack_chess_mha_params."""
    B, S, H = x.shape
    assert S == SEQ
    nhd = num_heads * head_dim
    seg = _rup(nhd, 128)
    p_pad = packed["w_cat"].shape[1]
    c = packed["wpc_t"].shape[1]
    off_c = 3 * seg

    # ---- K1: row-tiled fused QKV + token_compress projection --------------------
    rows = B * S
    rt = rows
    for cand in (1024, 512, 256, 128, 64):
        if rows % cand == 0 and rows // cand >= 2:
            rt = cand
            break
    x2d = x.reshape(rows, H).astype(jnp.bfloat16)
    proj = pl.pallas_call(
        _proj_kernel,
        out_shape=jax.ShapeDtypeStruct((rows, p_pad), jnp.bfloat16),
        grid=(rows // rt,),
        in_specs=[pl.BlockSpec((rt, H), lambda i: (i, 0)),
                  pl.BlockSpec((H, p_pad), lambda i: (0, 0))],
        out_specs=pl.BlockSpec((rt, p_pad), lambda i: (i, 0)),
        compiler_params=pltpu.CompilerParams(dimension_semantics=("parallel",)),
    )(x2d, packed["w_cat"])

    # Cheap XLA-level slices/reshapes between kernels (no in-kernel relayouts).
    cf = proj[:, off_c:off_c + TC].reshape(B, S * TC)             # (B, 2048) bf16
    proj3 = proj.reshape(B, S, p_pad)

    # ---- K2: smolgen supplemental logits (batch-tiled, fully batched matmuls) ----
    bt2 = B
    for cand in (128, 64, 32, 16, 8):
        if B % cand == 0:
            bt2 = cand
            break
    smol_flat = pl.pallas_call(
        _smolgen_kernel,
        out_shape=jax.ShapeDtypeStruct((num_heads, B, S * S), jnp.float32),
        grid=(B // bt2,),
        in_specs=[
            pl.BlockSpec((bt2, S * TC), lambda i: (i, 0)),
            pl.BlockSpec((S * TC, c), lambda i: (0, 0)),
            pl.BlockSpec((1, c), lambda i: (0, 0)),
            pl.BlockSpec((1, c), lambda i: (0, 0)),
            pl.BlockSpec((1, c), lambda i: (0, 0)),
            pl.BlockSpec((c, num_heads * c), lambda i: (0, 0)),
            pl.BlockSpec((1, num_heads * c), lambda i: (0, 0)),
            pl.BlockSpec((c, S * S), lambda i: (0, 0)),
            pl.BlockSpec((1, S * S), lambda i: (0, 0)),
        ],
        out_specs=pl.BlockSpec((num_heads, bt2, S * S), lambda i: (0, i, 0)),
        scratch_shapes=[pltpu.VMEM((num_heads * bt2, c), jnp.bfloat16)],
        compiler_params=pltpu.CompilerParams(dimension_semantics=("parallel",)),
    )(cf, packed["wpc_t"], packed["bpc"], packed["ln_g"], packed["ln_b"],
      packed["whp_cat"], packed["bhp_cat"], packed["walp_t"], packed["balp"])
    smol = smol_flat.reshape(num_heads, B, S, S)

    # ---- K3: attention core, batch-tiled (>=2 grid steps when possible) ----------
    bt3 = 1
    for cand in (8, 4, 2):
        if B % cand == 0 and B // cand >= 2:
            bt3 = cand
            break
    out = pl.pallas_call(
        functools.partial(_attn_kernel, num_heads=num_heads, head_dim=head_dim, seg=seg),
        out_shape=jax.ShapeDtypeStruct((B, S, H), jnp.float32),
        grid=(B // bt3,),
        in_specs=[
            pl.BlockSpec((bt3, S, p_pad), lambda b: (b, 0, 0)),
            pl.BlockSpec((num_heads, S, S), lambda b: (0, 0, 0)),
            pl.BlockSpec((num_heads, bt3, S, S), lambda b: (0, b, 0, 0)),
            pl.BlockSpec((nhd, H), lambda b: (0, 0)),
            pl.BlockSpec((1, H), lambda b: (0, 0)),
        ],
        out_specs=pl.BlockSpec((bt3, S, H), lambda b: (b, 0, 0)),
        scratch_shapes=[pltpu.VMEM((bt3 * SEQ, nhd), jnp.bfloat16)],
        compiler_params=pltpu.CompilerParams(dimension_semantics=("parallel",)),
    )(proj3, packed["pos_bias"], smol, packed["wo_t"], packed["bo"])
    return out


# --------------------------------------------------------------- init / reference / check
def _xavier_normal(key, out_f, in_f):
    std = (2.0 / (in_f + out_f)) ** 0.5
    return std * jax.random.normal(key, (out_f, in_f), jnp.float32)


def _reference_forward(x, p, num_heads, head_dim):
    # Pure-JAX f32 mirror of the PyTorch forward (HIGHEST-precision dots).
    hp = lax.Precision.HIGHEST
    B, S, H = x.shape
    NH, D = num_heads, head_dim
    q = jnp.einsum("bsh,oh->bso", x, p["wq"], precision=hp).reshape(B, S, NH, D).transpose(0, 2, 1, 3)
    k = jnp.einsum("bsh,oh->bso", x, p["wk"], precision=hp).reshape(B, S, NH, D).transpose(0, 2, 1, 3)
    v = jnp.einsum("bsh,oh->bso", x, p["wv"], precision=hp).reshape(B, S, NH, D).transpose(0, 2, 1, 3)
    scores = jnp.einsum("bhqd,bhkd->bhqk", q, k, precision=hp) * (D ** -0.5)
    scores = scores + p["pos_bias"][None]
    comp = jnp.einsum("bsh,oh->bso", x, p["wtc"], precision=hp)        # (B, 64, 32)
    flat = comp.reshape(B, S * TC)
    h = jnp.einsum("bf,cf->bc", flat, p["wpc"], precision=hp) + p["bpc"]
    h = jnp.maximum(h, 0.0)
    mean = h.mean(-1, keepdims=True)
    var = ((h - mean) ** 2).mean(-1, keepdims=True)
    pv = (h - mean) / jnp.sqrt(var + 1e-5) * p["ln_g"] + p["ln_b"]
    logits = []
    for hd in range(NH):
        hv = jnp.einsum("bc,oc->bo", pv, p["whp"][hd], precision=hp) + p["bhp"][hd]
        lg = jnp.einsum("bc,oc->bo", hv, p["walp"], precision=hp) + p["balp"]
        logits.append(lg.reshape(B, S, S))
    scores = scores + jnp.stack(logits, axis=1)
    attn = jax.nn.softmax(scores, axis=-1)
    out = jnp.einsum("bhqk,bhkd->bhqd", attn, v, precision=hp)
    out = out.transpose(0, 2, 1, 3).reshape(B, S, NH * D)
    return jnp.einsum("bso,ho->bsh", out, p["wo"], precision=hp) + p["bo"]


if __name__ == "__main__":
    batch, hidden, num_heads, head_dim, compress = 2, 32, 2, 32, 256
    nhd = num_heads * head_dim

    key = jax.random.PRNGKey(0)
    ks = jax.random.split(key, 16)

    x = jax.random.normal(ks[0], (batch, SEQ, hidden), jnp.float32)

    # Linear weights: xavier-normal (as init_xavier would).  Biases / positional_bias /
    # LayerNorm affine get small random values (the module inits them to 0 / 1) so every
    # additive term of the forward pass is exercised by the check.
    params = dict(
        wq=_xavier_normal(ks[1], nhd, hidden),
        wk=_xavier_normal(ks[2], nhd, hidden),
        wv=_xavier_normal(ks[3], nhd, hidden),
        wo=_xavier_normal(ks[4], hidden, nhd),
        bo=0.02 * jax.random.normal(ks[5], (hidden,), jnp.float32),
        pos_bias=0.02 * jax.random.normal(ks[6], (num_heads, SEQ, SEQ), jnp.float32),
        wtc=_xavier_normal(ks[7], TC, hidden),
        wpc=_xavier_normal(ks[8], compress, SEQ * TC),
        bpc=0.02 * jax.random.normal(ks[9], (compress,), jnp.float32),
        ln_g=1.0 + 0.02 * jax.random.normal(ks[10], (compress,), jnp.float32),
        ln_b=0.02 * jax.random.normal(ks[11], (compress,), jnp.float32),
        whp=jnp.stack([_xavier_normal(k, compress, compress)
                       for k in jax.random.split(ks[12], num_heads)]),
        bhp=0.02 * jax.random.normal(ks[13], (num_heads, compress), jnp.float32),
        walp=_xavier_normal(ks[14], SEQ * SEQ, compress),
        balp=0.02 * jax.random.normal(ks[15], (SEQ * SEQ,), jnp.float32),
    )

    packed = pack_chess_mha_params(params, num_heads=num_heads, head_dim=head_dim)

    out = chess_mha_forward(x, packed, num_heads=num_heads, head_dim=head_dim)
    jax.block_until_ready(out)

    ref = _reference_forward(x, params, num_heads, head_dim)
    assert out.shape == (batch, SEQ, hidden)
    # bf16 MXU operands (f32 accumulation + f32 softmax/LayerNorm statistics) vs an
    # f32 HIGHEST-precision reference => slightly looser tolerance than pure-f32.
    max_err = float(jnp.max(jnp.abs(out - ref)))
    assert jnp.allclose(out, ref, atol=2e-2, rtol=2e-2), max_err

    print("KERNEL_OK")
</pallas_src>

<mosaic_0001>
module attributes {stable_mosaic.version = 11 : i64} {
  func.func @_proj_kernel(%arg0: i32, %arg1: memref<64x32xbf16, #tpu.memory_space<vmem>>, %arg2: memref<32x512xbf16, #tpu.memory_space<vmem>>, %arg3: memref<64x512xbf16, #tpu.memory_space<vmem>>) attributes {dimension_semantics = [#tpu.dimension_semantics<parallel>], iteration_bounds = array<i64: 2>, scalar_prefetch = 0 : i64, scratch_operands = 0 : i64, tpu.core_type = #tpu.core_type<tc>, window_params = [{transform_indices = @transform_0, window_bounds = array<i64: 64, 32>}, {pipeline_mode = #tpu.pipeline_mode<synchronous>, transform_indices = @transform_1, window_bounds = array<i64: 32, 512>}, {transform_indices = @transform_2, window_bounds = array<i64: 64, 512>}]} {
    %c0 = arith.constant 0 : index
    %c0_0 = arith.constant 0 : index
    %0 = vector.load %arg1[%c0, %c0_0] : memref<64x32xbf16, #tpu.memory_space<vmem>>, vector<64x32xbf16>
    %c0_1 = arith.constant 0 : index
    %c0_2 = arith.constant 0 : index
    %1 = vector.load %arg2[%c0_1, %c0_2] : memref<32x512xbf16, #tpu.memory_space<vmem>>, vector<32x512xbf16>
    %cst = arith.constant dense<0.000000e+00> : vector<64x512xf32>
    %2 = tpu.matmul %0, %1, %cst {dimension_numbers = #tpu.dot_dimension_numbers<[1], [0], [0], [1], [0, 0, 1, 1], [], []>} : vector<64x32xbf16>, vector<32x512xbf16>, vector<64x512xf32> -> vector<64x512xf32>
    %3 = arith.truncf %2 : vector<64x512xf32> to vector<64x512xbf16>
    %c0_3 = arith.constant 0 : index
    %c0_4 = arith.constant 0 : index
    %4 = vector.load %arg3[%c0_3, %c0_4] : memref<64x512xbf16, #tpu.memory_space<vmem>>, vector<64x512xbf16>
    tpu.vector_store %arg3[%c0_3, %c0_4], %3 {strides = array<i32>} : memref<64x512xbf16, #tpu.memory_space<vmem>>, vector<64x512xbf16>,
    return
  }
  func.func @transform_0(%arg0: i32) -> (i32, i32) {
    %c0_i32 = arith.constant 0 : i32
    %c0_i32_0 = arith.constant 0 : i32
    return %arg0, %c0_i32 : i32, i32
  }
  func.func @transform_1(%arg0: i32) -> (i32, i32) {
    %c0_i32 = arith.constant 0 : i32
    %c0_i32_0 = arith.constant 0 : i32
    %c0_i32_1 = arith.constant 0 : i32
    return %c0_i32, %c0_i32_0 : i32, i32
  }
  func.func @transform_2(%arg0: i32) -> (i32, i32) {
    %c0_i32 = arith.constant 0 : i32
    %c0_i32_0 = arith.constant 0 : i32
    return %arg0, %c0_i32 : i32, i32
  }
}

module attributes {stable_mosaic.version = 11 : i64} {
  func.func @_smolgen_kernel(%arg0: i32, %arg1: memref<2x2048xbf16, #tpu.memory_space<vmem>>, %arg2: memref<2048x256xbf16, #tpu.memory_space<vmem>>, %arg3: memref<1x256xf32, #tpu.memory_space<vmem>>, %arg4: memref<1x256xf32, #tpu.memory_space<vmem>>, %arg5: memref<1x256xf32, #tpu.memory_space<vmem>>, %arg6: memref<256x512xbf16, #tpu.memory_space<vmem>>, %arg7: memref<1x512xf32, #tpu.memory_space<vmem>>, %arg8: memref<256x4096xbf16, #tpu.memory_space<vmem>>, %arg9: memref<1x4096xf32, #tpu.memory_space<vmem>>, %arg10: memref<2x2x4096xf32, #tpu.memory_space<vmem>>, %arg11: memref<4x256xbf16, #tpu.memory_space<vmem>>) attributes {dimension_semantics = [#tpu.dimension_semantics<parallel>], iteration_bounds = array<i64: 1>, scalar_prefetch = 0 : i64, scratch_operands = 1 : i64, tpu.core_type = #tpu.core_type<tc>, window_params = [{transform_indices = @transform_0, window_bounds = array<i64: 2, 2048>}, {pipeline_mode = #tpu.pipeline_mode<synchronous>, transform_indices = @transform_1, window_bounds = array<i64: 2048, 256>}, {pipeline_mode = #tpu.pipeline_mode<synchronous>, transform_indices = @transform_2, window_bounds = array<i64: 1, 256>}, {pipeline_mode = #tpu.pipeline_mode<synchronous>, transform_indices = @transform_3, window_bounds = array<i64: 1, 256>}, {pipeline_mode = #tpu.pipeline_mode<synchronous>, transform_indices = @transform_4, window_bounds = array<i64: 1, 256>}, {pipeline_mode = #tpu.pipeline_mode<synchronous>, transform_indices = @transform_5, window_bounds = array<i64: 256, 512>}, {pipeline_mode = #tpu.pipeline_mode<synchronous>, transform_indices = @transform_6, window_bounds = array<i64: 1, 512>}, {pipeline_mode = #tpu.pipeline_mode<synchronous>, transform_indices = @transform_7, window_bounds = array<i64: 256, 4096>}, {pipeline_mode = #tpu.pipeline_mode<synchronous>, transform_indices = @transform_8, window_bounds = array<i64: 1, 4096>}, {transform_indices = @transform_9, window_bounds = array<i64: 2, 2, 4096>}]} {
    %c0 = arith.constant 0 : index
    %c0_0 = arith.constant 0 : index
    %0 = vector.load %arg1[%c0, %c0_0] : memref<2x2048xbf16, #tpu.memory_space<vmem>>, vector<2x2048xbf16>
    %c0_1 = arith.constant 0 : index
    %c0_2 = arith.constant 0 : index
    %1 = vector.load %arg2[%c0_1, %c0_2] : memref<2048x256xbf16, #tpu.memory_space<vmem>>, vector<2048x256xbf16>
    %cst = arith.constant dense<0.000000e+00> : vector<2x256xf32>
    %2 = tpu.matmul %0, %1, %cst {dimension_numbers = #tpu.dot_dimension_numbers<[1], [0], [0], [1], [0, 0, 1, 1], [], []>} : vector<2x2048xbf16>, vector<2048x256xbf16>, vector<2x256xf32> -> vector<2x256xf32>
    %c0_3 = arith.constant 0 : index
    %c0_4 = arith.constant 0 : index
    %3 = vector.load %arg3[%c0_3, %c0_4] : memref<1x256xf32, #tpu.memory_space<vmem>>, vector<1x256xf32>
    %4 = vector.broadcast %3 : vector<1x256xf32> to vector<2x256xf32>
    %5 = arith.addf %2, %4 : vector<2x256xf32>
    %cst_5 = arith.constant 0.000000e+00 : f32
    %6 = vector.broadcast %cst_5 : f32 to vector<2x256xf32>
    %7 = arith.maximumf %5, %6 : vector<2x256xf32>
    %cst_6 = arith.constant dense<0.000000e+00> : vector<2xf32>
    %8 = vector.multi_reduction <add>, %7, %cst_6 [1] : vector<2x256xf32> to vector<2xf32>
    %9 = vector.shape_cast %8 : vector<2xf32> to vector<2x1xf32>
    %cst_7 = arith.constant 2.560000e+02 : f32
    %10 = vector.broadcast %cst_7 : f32 to vector<2x1xf32>
    %11 = arith.divf %9, %10 : vector<2x1xf32>
    %12 = vector.broadcast %11 : vector<2x1xf32> to vector<2x256xf32>
    %13 = arith.subf %7, %12 : vector<2x256xf32>
    %14 = arith.mulf %13, %13 : vector<2x256xf32>
    %cst_8 = arith.constant dense<0.000000e+00> : vector<2xf32>
    %15 = vector.multi_reduction <add>, %14, %cst_8 [1] : vector<2x256xf32> to vector<2xf32>
    %16 = vector.shape_cast %15 : vector<2xf32> to vector<2x1xf32>
    %cst_9 = arith.constant 2.560000e+02 : f32
    %17 = vector.broadcast %cst_9 : f32 to vector<2x1xf32>
    %18 = arith.divf %16, %17 : vector<2x1xf32>
    %19 = vector.broadcast %11 : vector<2x1xf32> to vector<2x256xf32>
    %20 = arith.subf %7, %19 : vector<2x256xf32>
    %cst_10 = arith.constant 9.99999974E-6 : f32
    %21 = vector.broadcast %cst_10 : f32 to vector<2x1xf32>
    %22 = arith.addf %18, %21 : vector<2x1xf32>
    %23 = math.rsqrt %22 : vector<2x1xf32>
    %24 = vector.broadcast %23 : vector<2x1xf32> to vector<2x256xf32>
    %25 = arith.mulf %20, %24 : vector<2x256xf32>
    %c0_11 = arith.constant 0 : index
    %c0_12 = arith.constant 0 : index
    %26 = vector.load %arg4[%c0_11, %c0_12] : memref<1x256xf32, #tpu.memory_space<vmem>>, vector<1x256xf32>
    %27 = vector.broadcast %26 : vector<1x256xf32> to vector<2x256xf32>
    %28 = arith.mulf %25, %27 : vector<2x256xf32>
    %c0_13 = arith.constant 0 : index
    %c0_14 = arith.constant 0 : index
    %29 = vector.load %arg5[%c0_13, %c0_14] : memref<1x256xf32, #tpu.memory_space<vmem>>, vector<1x256xf32>
    %30 = vector.broadcast %29 : vector<1x256xf32> to vector<2x256xf32>
    %31 = arith.addf %28, %30 : vector<2x256xf32>
    %32 = arith.truncf %31 : vector<2x256xf32> to vector<2x256xbf16>
    %c0_15 = arith.constant 0 : index
    %c0_16 = arith.constant 0 : index
    %33 = vector.load %arg6[%c0_15, %c0_16] : memref<256x512xbf16, #tpu.memory_space<vmem>>, vector<256x512xbf16>
    %cst_17 = arith.constant dense<0.000000e+00> : vector<2x512xf32>
    %34 = tpu.matmul %32, %33, %cst_17 {dimension_numbers = #tpu.dot_dimension_numbers<[1], [0], [0], [1], [0, 0, 1, 1], [], []>} : vector<2x256xbf16>, vector<256x512xbf16>, vector<2x512xf32> -> vector<2x512xf32>
    %c0_18 = arith.constant 0 : index
    %c0_19 = arith.constant 0 : index
    %35 = vector.load %arg7[%c0_18, %c0_19] : memref<1x512xf32, #tpu.memory_space<vmem>>, vector<1x512xf32>
    %36 = vector.broadcast %35 : vector<1x512xf32> to vector<2x512xf32>
    %37 = arith.addf %34, %36 : vector<2x512xf32>
    %38 = vector.extract_strided_slice %37 {offsets = [0, 0], sizes = [2, 256], strides = [1, 1]} : vector<2x512xf32> to vector<2x256xf32>
    %39 = arith.truncf %38 : vector<2x256xf32> to vector<2x256xbf16>
    %c0_20 = arith.constant 0 : index
    %c0_21 = arith.constant 0 : index
    %40 = vector.load %arg11[%c0_20, %c0_21] : memref<4x256xbf16, #tpu.memory_space<vmem>>, vector<2x256xbf16>
    tpu.vector_store %arg11[%c0_20, %c0_21], %39 {strides = array<i32>} : memref<4x256xbf16, #tpu.memory_space<vmem>>, vector<2x256xbf16>,
    %41 = vector.extract_strided_slice %37 {offsets = [0, 256], sizes = [2, 256], strides = [1, 1]} : vector<2x512xf32> to vector<2x256xf32>
    %42 = arith.truncf %41 : vector<2x256xf32> to vector<2x256xbf16>
    %c2 = arith.constant 2 : index
    %c0_22 = arith.constant 0 : index
    %43 = vector.load %arg11[%c2, %c0_22] : memref<4x256xbf16, #tpu.memory_space<vmem>>, vector<2x256xbf16>
    tpu.vector_store %arg11[%c2, %c0_22], %42 {strides = array<i32>} : memref<4x256xbf16, #tpu.memory_space<vmem>>, vector<2x256xbf16>,
    %c0_23 = arith.constant 0 : index
    %c0_24 = arith.constant 0 : index
    %44 = vector.load %arg11[%c0_23, %c0_24] : memref<4x256xbf16, #tpu.memory_space<vmem>>, vector<4x256xbf16>
    %c0_25 = arith.constant 0 : index
    %c0_26 = arith.constant 0 : index
    %45 = vector.load %arg8[%c0_25, %c0_26] : memref<256x4096xbf16, #tpu.memory_space<vmem>>, vector<256x4096xbf16>
    %cst_27 = arith.constant dense<0.000000e+00> : vector<4x4096xf32>
    %46 = tpu.matmul %44, %45, %cst_27 {dimension_numbers = #tpu.dot_dimension_numbers<[1], [0], [0], [1], [0, 0, 1, 1], [], []>} : vector<4x256xbf16>, vector<256x4096xbf16>, vector<4x4096xf32> -> vector<4x4096xf32>
    %c0_28 = arith.constant 0 : index
    %c0_29 = arith.constant 0 : index
    %47 = vector.load %arg9[%c0_28, %c0_29] : memref<1x4096xf32, #tpu.memory_space<vmem>>, vector<1x4096xf32>
    %48 = vector.broadcast %47 : vector<1x4096xf32> to vector<4x4096xf32>
    %49 = arith.addf %46, %48 : vector<4x4096xf32>
    %50 = vector.extract_strided_slice %49 {offsets = [0, 0], sizes = [2, 4096], strides = [1, 1]} : vector<4x4096xf32> to vector<2x4096xf32>
    %c0_30 = arith.constant 0 : index
    %c0_31 = arith.constant 0 : index
    %c0_32 = arith.constant 0 : index
    %51 = vector.load %arg10[%c0_30, %c0_31, %c0_32] : memref<2x2x4096xf32, #tpu.memory_space<vmem>>, vector<1x2x4096xf32>
    %52 = vector.shape_cast %51 : vector<1x2x4096xf32> to vector<2x4096xf32>
    %53 = vector.shape_cast %50 : vector<2x4096xf32> to vector<1x2x4096xf32>
    tpu.vector_store %arg10[%c0_30, %c0_31, %c0_32], %53 {strides = array<i32>} : memref<2x2x4096xf32, #tpu.memory_space<vmem>>, vector<1x2x4096xf32>,
    %54 = vector.extract_strided_slice %49 {offsets = [2, 0], sizes = [2, 4096], strides = [1, 1]} : vector<4x4096xf32> to vector<2x4096xf32>
    %c1 = arith.constant 1 : index
    %c0_33 = arith.constant 0 : index
    %c0_34 = arith.constant 0 : index
    %55 = vector.load %arg10[%c1, %c0_33, %c0_34] : memref<2x2x4096xf32, #tpu.memory_space<vmem>>, vector<1x2x4096xf32>
    %56 = vector.shape_cast %55 : vector<1x2x4096xf32> to vector<2x4096xf32>
    %57 = vector.shape_cast %54 : vector<2x4096xf32> to vector<1x2x4096xf32>
    tpu.vector_store %arg10[%c1, %c0_33, %c0_34], %57 {strides = array<i32>} : memref<2x2x4096xf32, #tpu.memory_space<vmem>>, vector<1x2x4096xf32>,
    return
  }
  func.func @transform_0(%arg0: i32) -> (i32, i32) {
    %c0_i32 = arith.constant 0 : i32
    %c0_i32_0 = arith.constant 0 : i32
    return %arg0, %c0_i32 : i32, i32
  }
  func.func @transform_1(%arg0: i32) -> (i32, i32) {
    %c0_i32 = arith.constant 0 : i32
    %c0_i32_0 = arith.constant 0 : i32
    %c0_i32_1 = arith.constant 0 : i32
    return %c0_i32, %c0_i32_0 : i32, i32
  }
  func.func @transform_2(%arg0: i32) -> (i32, i32) {
    %c0_i32 = arith.constant 0 : i32
    %c0_i32_0 = arith.constant 0 : i32
    %c0_i32_1 = arith.constant 0 : i32
    return %c0_i32, %c0_i32_0 : i32, i32
  }
  func.func @transform_3(%arg0: i32) -> (i32, i32) {
    %c0_i32 = arith.constant 0 : i32
    %c0_i32_0 = arith.constant 0 : i32
    %c0_i32_1 = arith.constant 0 : i32
    return %c0_i32, %c0_i32_0 : i32, i32
  }
  func.func @transform_4(%arg0: i32) -> (i32, i32) {
    %c0_i32 = arith.constant 0 : i32
    %c0_i32_0 = arith.constant 0 : i32
    %c0_i32_1 = arith.constant 0 : i32
    return %c0_i32, %c0_i32_0 : i32, i32
  }
  func.func @transform_5(%arg0: i32) -> (i32, i32) {
    %c0_i32 = arith.constant 0 : i32
    %c0_i32_0 = arith.constant 0 : i32
    %c0_i32_1 = arith.constant 0 : i32
    return %c0_i32, %c0_i32_0 : i32, i32
  }
  func.func @transform_6(%arg0: i32) -> (i32, i32) {
    %c0_i32 = arith.constant 0 : i32
    %c0_i32_0 = arith.constant 0 : i32
    %c0_i32_1 = arith.constant 0 : i32
    return %c0_i32, %c0_i32_0 : i32, i32
  }
  func.func @transform_7(%arg0: i32) -> (i32, i32) {
    %c0_i32 = arith.constant 0 : i32
    %c0_i32_0 = arith.constant 0 : i32
    %c0_i32_1 = arith.constant 0 : i32
    return %c0_i32, %c0_i32_0 : i32, i32
  }
  func.func @transform_8(%arg0: i32) -> (i32, i32) {
    %c0_i32 = arith.constant 0 : i32
    %c0_i32_0 = arith.constant 0 : i32
    %c0_i32_1 = arith.constant 0 : i32
    return %c0_i32, %c0_i32_0 : i32, i32
  }
  func.func @transform_9(%arg0: i32) -> (i32, i32, i32) {
    %c0_i32 = arith.constant 0 : i32
    %c0_i32_0 = arith.constant 0 : i32
    %c0_i32_1 = arith.constant 0 : i32
    return %c0_i32, %arg0, %c0_i32_0 : i32, i32, i32
  }
}

module attributes {stable_mosaic.version = 11 : i64} {
  func.func @_attn_kernel(%arg0: i32, %arg1: memref<1x64x512xbf16, #tpu.memory_space<vmem>>, %arg2: memref<2x64x64xf32, #tpu.memory_space<vmem>>, %arg3: memref<2x1x64x64xf32, #tpu.memory_space<vmem>>, %arg4: memref<64x32xbf16, #tpu.memory_space<vmem>>, %arg5: memref<1x32xf32, #tpu.memory_space<vmem>>, %arg6: memref<1x64x32xf32, #tpu.memory_space<vmem>>, %arg7: memref<64x64xbf16, #tpu.memory_space<vmem>>) attributes {dimension_semantics = [#tpu.dimension_semantics<parallel>], iteration_bounds = array<i64: 2>, scalar_prefetch = 0 : i64, scratch_operands = 1 : i64, tpu.core_type = #tpu.core_type<tc>, window_params = [{transform_indices = @transform_0, window_bounds = array<i64: 1, 64, 512>}, {pipeline_mode = #tpu.pipeline_mode<synchronous>, transform_indices = @transform_1, window_bounds = array<i64: 2, 64, 64>}, {transform_indices = @transform_2, window_bounds = array<i64: 2, 1, 64, 64>}, {pipeline_mode = #tpu.pipeline_mode<synchronous>, transform_indices = @transform_3, window_bounds = array<i64: 64, 32>}, {pipeline_mode = #tpu.pipeline_mode<synchronous>, transform_indices = @transform_4, window_bounds = array<i64: 1, 32>}, {transform_indices = @transform_5, window_bounds = array<i64: 1, 64, 32>}]} {
    %c0 = arith.constant 0 : index
    %c0_0 = arith.constant 0 : index
    %c0_1 = arith.constant 0 : index
    %0 = vector.load %arg1[%c0, %c0_0, %c0_1] : memref<1x64x512xbf16, #tpu.memory_space<vmem>>, vector<1x64x512xbf16>
    %1 = vector.shape_cast %0 : vector<1x64x512xbf16> to vector<64x512xbf16>
    %2 = vector.extract_strided_slice %1 {offsets = [0, 0], sizes = [64, 32], strides = [1, 1]} : vector<64x512xbf16> to vector<64x32xbf16>
    %3 = vector.extract_strided_slice %1 {offsets = [0, 128], sizes = [64, 32], strides = [1, 1]} : vector<64x512xbf16> to vector<64x32xbf16>
    %4 = vector.extract_strided_slice %1 {offsets = [0, 256], sizes = [64, 32], strides = [1, 1]} : vector<64x512xbf16> to vector<64x32xbf16>
    %cst = arith.constant dense<0.000000e+00> : vector<64x64xf32>
    %5 = tpu.matmul %2, %3, %cst {dimension_numbers = #tpu.dot_dimension_numbers<[1], [1], [0], [0], [0, 0, 1, 0], [], []>} : vector<64x32xbf16>, vector<64x32xbf16>, vector<64x64xf32> -> vector<64x64xf32>
    %c0_2 = arith.constant 0 : index
    %c0_3 = arith.constant 0 : index
    %c0_4 = arith.constant 0 : index
    %6 = vector.load %arg2[%c0_2, %c0_3, %c0_4] : memref<2x64x64xf32, #tpu.memory_space<vmem>>, vector<1x64x64xf32>
    %7 = vector.shape_cast %6 : vector<1x64x64xf32> to vector<64x64xf32>
    %8 = arith.addf %5, %7 : vector<64x64xf32>
    %c0_5 = arith.constant 0 : index
    %c0_6 = arith.constant 0 : index
    %c0_7 = arith.constant 0 : index
    %c0_8 = arith.constant 0 : index
    %9 = vector.load %arg3[%c0_5, %c0_6, %c0_7, %c0_8] : memref<2x1x64x64xf32, #tpu.memory_space<vmem>>, vector<1x1x64x64xf32>
    %10 = vector.shape_cast %9 : vector<1x1x64x64xf32> to vector<64x64xf32>
    %11 = arith.addf %8, %10 : vector<64x64xf32>
    %cst_9 = arith.constant dense<0xFF800000> : vector<64xf32>
    %12 = vector.multi_reduction <maximumf>, %11, %cst_9 [1] : vector<64x64xf32> to vector<64xf32>
    %13 = vector.shape_cast %12 : vector<64xf32> to vector<64x1xf32>
    %14 = vector.broadcast %13 : vector<64x1xf32> to vector<64x64xf32>
    %15 = arith.subf %11, %14 : vector<64x64xf32>
    %16 = math.exp %15 : vector<64x64xf32>
    %cst_10 = arith.constant dense<0.000000e+00> : vector<64xf32>
    %17 = vector.multi_reduction <add>, %16, %cst_10 [1] : vector<64x64xf32> to vector<64xf32>
    %18 = vector.shape_cast %17 : vector<64xf32> to vector<64x1xf32>
    %19 = tpu.reciprocal %18 {approx = true} : vector<64x1xf32> -> vector<64x1xf32>
    %20 = vector.broadcast %19 : vector<64x1xf32> to vector<64x64xf32>
    %21 = arith.mulf %16, %20 : vector<64x64xf32>
    %22 = arith.truncf %21 : vector<64x64xf32> to vector<64x64xbf16>
    %cst_11 = arith.constant dense<0.000000e+00> : vector<64x32xf32>
    %23 = tpu.matmul %22, %4, %cst_11 {dimension_numbers = #tpu.dot_dimension_numbers<[1], [0], [0], [1], [0, 0, 1, 1], [], []>} : vector<64x64xbf16>, vector<64x32xbf16>, vector<64x32xf32> -> vector<64x32xf32>
    %24 = arith.truncf %23 : vector<64x32xf32> to vector<64x32xbf16>
    %c0_12 = arith.constant 0 : index
    %c0_13 = arith.constant 0 : index
    %25 = vector.load %arg7[%c0_12, %c0_13] : memref<64x64xbf16, #tpu.memory_space<vmem>>, vector<64x32xbf16>
    tpu.vector_store %arg7[%c0_12, %c0_13], %24 {strides = array<i32>} : memref<64x64xbf16, #tpu.memory_space<vmem>>, vector<64x32xbf16>,
    %26 = vector.extract_strided_slice %1 {offsets = [0, 32], sizes = [64, 32], strides = [1, 1]} : vector<64x512xbf16> to vector<64x32xbf16>
    %27 = vector.extract_strided_slice %1 {offsets = [0, 160], sizes = [64, 32], strides = [1, 1]} : vector<64x512xbf16> to vector<64x32xbf16>
    %28 = vector.extract_strided_slice %1 {offsets = [0, 288], sizes = [64, 32], strides = [1, 1]} : vector<64x512xbf16> to vector<64x32xbf16>
    %cst_14 = arith.constant dense<0.000000e+00> : vector<64x64xf32>
    %29 = tpu.matmul %26, %27, %cst_14 {dimension_numbers = #tpu.dot_dimension_numbers<[1], [1], [0], [0], [0, 0, 1, 0], [], []>} : vector<64x32xbf16>, vector<64x32xbf16>, vector<64x64xf32> -> vector<64x64xf32>
    %c1 = arith.constant 1 : index
    %c0_15 = arith.constant 0 : index
    %c0_16 = arith.constant 0 : index
    %30 = vector.load %arg2[%c1, %c0_15, %c0_16] : memref<2x64x64xf32, #tpu.memory_space<vmem>>, vector<1x64x64xf32>
    %31 = vector.shape_cast %30 : vector<1x64x64xf32> to vector<64x64xf32>
    %32 = arith.addf %29, %31 : vector<64x64xf32>
    %c1_17 = arith.constant 1 : index
    %c0_18 = arith.constant 0 : index
    %c0_19 = arith.constant 0 : index
    %c0_20 = arith.constant 0 : index
    %33 = vector.load %arg3[%c1_17, %c0_18, %c0_19, %c0_20] : memref<2x1x64x64xf32, #tpu.memory_space<vmem>>, vector<1x1x64x64xf32>
    %34 = vector.shape_cast %33 : vector<1x1x64x64xf32> to vector<64x64xf32>
    %35 = arith.addf %32, %34 : vector<64x64xf32>
    %cst_21 = arith.constant dense<0xFF800000> : vector<64xf32>
    %36 = vector.multi_reduction <maximumf>, %35, %cst_21 [1] : vector<64x64xf32> to vector<64xf32>
    %37 = vector.shape_cast %36 : vector<64xf32> to vector<64x1xf32>
    %38 = vector.broadcast %37 : vector<64x1xf32> to vector<64x64xf32>
    %39 = arith.subf %35, %38 : vector<64x64xf32>
    %40 = math.exp %39 : vector<64x64xf32>
    %cst_22 = arith.constant dense<0.000000e+00> : vector<64xf32>
    %41 = vector.multi_reduction <add>, %40, %cst_22 [1] : vector<64x64xf32> to vector<64xf32>
    %42 = vector.shape_cast %41 : vector<64xf32> to vector<64x1xf32>
    %43 = tpu.reciprocal %42 {approx = true} : vector<64x1xf32> -> vector<64x1xf32>
    %44 = vector.broadcast %43 : vector<64x1xf32> to vector<64x64xf32>
    %45 = arith.mulf %40, %44 : vector<64x64xf32>
    %46 = arith.truncf %45 : vector<64x64xf32> to vector<64x64xbf16>
    %cst_23 = arith.constant dense<0.000000e+00> : vector<64x32xf32>
    %47 = tpu.matmul %46, %28, %cst_23 {dimension_numbers = #tpu.dot_dimension_numbers<[1], [0], [0], [1], [0, 0, 1, 1], [], []>} : vector<64x64xbf16>, vector<64x32xbf16>, vector<64x32xf32> -> vector<64x32xf32>
    %48 = arith.truncf %47 : vector<64x32xf32> to vector<64x32xbf16>
    %c0_24 = arith.constant 0 : index
    %c32 = arith.constant 32 : index
    %49 = vector.load %arg7[%c0_24, %c32] : memref<64x64xbf16, #tpu.memory_space<vmem>>, vector<64x32xbf16>
    tpu.vector_store %arg7[%c0_24, %c32], %48 {strides = array<i32>} : memref<64x64xbf16, #tpu.memory_space<vmem>>, vector<64x32xbf16>,
    %c0_25 = arith.constant 0 : index
    %c0_26 = arith.constant 0 : index
    %50 = vector.load %arg7[%c0_25, %c0_26] : memref<64x64xbf16, #tpu.memory_space<vmem>>, vector<64x64xbf16>
    %c0_27 = arith.constant 0 : index
    %c0_28 = arith.constant 0 : index
    %51 = vector.load %arg4[%c0_27, %c0_28] : memref<64x32xbf16, #tpu.memory_space<vmem>>, vector<64x32xbf16>
    %cst_29 = arith.constant dense<0.000000e+00> : vector<64x32xf32>
    %52 = tpu.matmul %50, %51, %cst_29 {dimension_numbers = #tpu.dot_dimension_numbers<[1], [0], [0], [1], [0, 0, 1, 1], [], []>} : vector<64x64xbf16>, vector<64x32xbf16>, vector<64x32xf32> -> vector<64x32xf32>
    %c0_30 = arith.constant 0 : index
    %c0_31 = arith.constant 0 : index
    %53 = vector.load %arg5[%c0_30, %c0_31] : memref<1x32xf32, #tpu.memory_space<vmem>>, vector<1x32xf32>
    %54 = vector.broadcast %53 : vector<1x32xf32> to vector<64x32xf32>
    %55 = arith.addf %52, %54 : vector<64x32xf32>
    %c0_32 = arith.constant 0 : index
    %c0_33 = arith.constant 0 : index
    %c0_34 = arith.constant 0 : index
    %56 = vector.load %arg6[%c0_32, %c0_33, %c0_34] : memref<1x64x32xf32, #tpu.memory_space<vmem>>, vector<1x64x32xf32>
    %57 = vector.shape_cast %56 : vector<1x64x32xf32> to vector<64x32xf32>
    %58 = vector.shape_cast %55 : vector<64x32xf32> to vector<1x64x32xf32>
    tpu.vector_store %arg6[%c0_32, %c0_33, %c0_34], %58 {strides = array<i32>} : memref<1x64x32xf32, #tpu.memory_space<vmem>>, vector<1x64x32xf32>,
    return
  }
  func.func @transform_0(%arg0: i32) -> (i32, i32, i32) {
    %c0_i32 = arith.constant 0 : i32
    %c0_i32_0 = arith.constant 0 : i32
    %c0_i32_1 = arith.constant 0 : i32
    return %arg0, %c0_i32, %c0_i32_0 : i32, i32, i32
  }
  func.func @transform_1(%arg0: i32) -> (i32, i32, i32) {
    %c0_i32 = arith.constant 0 : i32
    %c0_i32_0 = arith.constant 0 : i32
    %c0_i32_1 = arith.constant 0 : i32
    %c0_i32_2 = arith.constant 0 : i32
    return %c0_i32, %c0_i32_0, %c0_i32_1 : i32, i32, i32
  }
  func.func @transform_2(%arg0: i32) -> (i32, i32, i32, i32) {
    %c0_i32 = arith.constant 0 : i32
    %c0_i32_0 = arith.constant 0 : i32
    %c0_i32_1 = arith.constant 0 : i32
    %c0_i32_2 = arith.constant 0 : i32
    return %c0_i32, %arg0, %c0_i32_0, %c0_i32_1 : i32, i32, i32, i32
  }
  func.func @transform_3(%arg0: i32) -> (i32, i32) {
    %c0_i32 = arith.constant 0 : i32
    %c0_i32_0 = arith.constant 0 : i32
    %c0_i32_1 = arith.constant 0 : i32
    return %c0_i32, %c0_i32_0 : i32, i32
  }
  func.func @transform_4(%arg0: i32) -> (i32, i32) {
    %c0_i32 = arith.constant 0 : i32
    %c0_i32_0 = arith.constant 0 : i32
    %c0_i32_1 = arith.constant 0 : i32
    return %c0_i32, %c0_i32_0 : i32, i32
  }
  func.func @transform_5(%arg0: i32) -> (i32, i32, i32) {
    %c0_i32 = arith.constant 0 : i32
    %c0_i32_0 = arith.constant 0 : i32
    %c0_i32_1 = arith.constant 0 : i32
    return %arg0, %c0_i32, %c0_i32_0 : i32, i32, i32
  }
}

</mosaic_0001>

<bundles_post_ra>
// kernel: chess_mha_forward.3
= control target key start
LH: loop header
LB: loop body
LE: loop exit
PB: predicated region body
PF: predicated region fallthrough
CT: control target
= control target key end

     0   :  { %7 = vsyncpa [#allocation3], 0  ;;  %s746_s9 = smov 0   ;;  %s835_s0 = inlined_call_operand.vmem [shape: bf16[128,32], index: 0, kind: input, shape index: {}]   ;;  %s836_s1 = inlined_call_operand.hbm [shape: bf16[32,512], index: 1, kind: input, shape index: {}]   ;;  %s837_s2 = inlined_call_operand.vmem [shape: bf16[128,512], index: 2, kind: output, shape index: {}]  }
   0x1 LB: > { %s582_s10 = sadd.s32 4294967295, %s725_s9   ;;  %p584_p0 = scmp.ge.s32.totalorder %s725_s9, 1  ;;  %s725_s9 = sphi %s746_s9, %s13_s9  }
   0x2   : > { %p91_p1 = scmp.lt.s32.totalorder %s725_s9, 3  ;;  %s727_s11 = smov [#allocation2]  }
   0x3   : > { %s103_s12 = sshll.u32 %s727_s11, 4  ;;  %p760_p3 = scmp.eq.s32.totalorder %s582_s10, 0  ;;  %s104_s12 = int_to_ptr.vmem [resolvable:$true] %s103_s12 }
   0x4   : > { %p754_p2 = pnand %p584_p0, %p91_p1  ;;  %s687_s18 = scalar_lea.hbm %s836_s1, 1024 }
   0x5   : > { %s842_s14 = scalar_select %p760_p3, 1, 0 }
   0x6   : > { %s841_s13 = scalar_select %p754_p2, 1, 0 }
   0x7   : > { %p653_p4 = pneg %p754_p2  ;;  %p688_p6 = scmp.ne.s32.totalorder %s836_s1, %s687_s18 }
   0x8   : > { %p694_p10 = scmp.lt.u32.totalorder %s687_s18, %s836_s1 }
   0x9   : > { %p768_p5 = pnand %p760_p3, %p653_p4 }
   0xb   : > { %p689_p7 = pneg %p768_p5 }
   0xd   : > { %p690_p8 = pnand %p689_p7, %p688_p6 }
   0xf   : > { %p691_p9 = pneg %p690_p8 }
  0x11   : > { %p696_p11 = pnand %p694_p10, %p691_p9 }
  0x13   : > { %699 = shalt.err (!%p696_p11)
}
  0x14   : > { %s700_s23 = scalar_lea.vmem %s104_s12, 1024  ;;  %p708_p1 = scmp.lt.s32.totalorder %s104_s12, %s104_s12 }
  0x15   : > { %p701_p12 = scmp.ne.s32.totalorder %s104_s12, %s700_s23  ;;  %p709_p4 = scmp.lt.s32.totalorder %s700_s23, %s700_s23 }
  0x17   : > { %p703_p13 = pnand %p701_p12, %p689_p7  ;;  %p710_p3 = por %p709_p4, %p708_p1 }
  0x19   : > { %p704_p0 = pneg %p703_p13 }
  0x1b   : > { %p711_p2 = pnand %p710_p3, %p704_p0 }
  0x1d   : > { %714 = shalt.err (!%p711_p2)
}
  0x1e   : > { %s728_s24 = smov 256   ;;  %s729_s25 = smov 16  }
  0x1f   : > { %656 = dma.hbm_to_vmem [thread:$0]  (!%p768_p5), %s836_s1, 1024, %s104_s12, [#allocation3], %s728_s24, %s728_s24, %s729_s25  }
  0x20   : > { %p844_p6 = scmp.ne.s32.totalorder %s841_s13, 0 }
  0x21   : > { %p845_p8 = scmp.ne.s32.totalorder (!%p844_p6), %s842_s14, 0 }
  0x22   : > { %128 = sbr.rel (%p844_p6) target bundleno = 294 (0x126), region = 28 }
  0x29   : > { %720 = dma.done.wait (%p845_p8), [#allocation3], 1024  }
  0x2a   : > { %722 = vsyncadd (%p845_p8), [#allocation3], 4294966272  ;;  %s589_s28 = sshll.u32 %s582_s10, 3  ;;  %v730_v0 = vmov 0   ;;  %v671_v1 = vld [vmem:[#allocation2 + $0x4] ss:$16 sps:$4 sm:$0xff]  }
  0x2b   : > { %286 = vmatprep.mubr.bf16.mxu0 %v730_v0  ;;  %359 = vmatprep.mubr.bf16.mxu1 %v730_v0  ;;  %p152_p2 = scmp.lt.s32.totalorder %s589_s28, 15  ;;  %v673_v2 = vld [vmem:[#allocation2 + $0xc] ss:$16 sps:$4 sm:$0xff]   ;;  %v675_v3 = vld [vmem:[#allocation2] ss:$16 sps:$4 sm:$0xff]   ;;  %vm241_vm0 = vcmask 261120  }
  0x2c   : > { %254 = vmatprep.subr.bf16.mxu0 %v671_v1  ;;  %v676_v4 = vld [vmem:[#allocation2 + $0x8] ss:$16 sps:$4 sm:$0xff]   ;;  %327 = vmatprep.subr.bf16.mxu1 %v673_v2  ;;  %v677_v5 = vld [vmem:[#allocation2 + $0x24] ss:$16 sps:$4 sm:$0xff]   ;;  %v679_v6 = vld [vmem:[#allocation2 + $0x2c] ss:$16 sps:$4 sm:$0xff]  }
  0x2d   : > { %s847_s28 = smov (!%p152_p2, %s589_s28), 15  ;;  %255 = vmatpush1.bf16.msra.mxu0 %v675_v3  ;;  %328 = vmatpush1.bf16.msra.mxu1 %v676_v4  ;;  %v681_v7 = vld [vmem:[#allocation2 + $0x20] ss:$16 sps:$4 sm:$0xff]   ;;  %v682_v8 = vld [vmem:[#allocation2 + $0x28] ss:$16 sps:$4 sm:$0xff]  }
  0x2e   : > { %s590_s29 = sshll.u32 %s847_s28, 2  ;;  %256 = vmatprep.subr.bf16.mxu0 %v677_v5  ;;  %329 = vmatprep.subr.bf16.mxu1 %v679_v6  ;;  %s632_s5 = sshll.u32 %s847_s28, 4 }
  0x2f   : > { %s155_s4 = scalar_lea.vmem %s835_s0, %s590_s29  ;;  %s814_s8 = scalar_lea.vmem %s837_s2, %s632_s5 }
  0x30   : > { %v683_v9 = vld [vmem:[%s155_s4] sm:$0xff]   ;;  %v684_v10 = vld [vmem:[%s155_s4 + $0x8] sm:$0xff]   ;;  %v685_v11 = vld [vmem:[%s155_s4 + $0x10] sm:$0xff]  }
  0x31   : > { %257 = vmatpush1.bf16.msra.mxu0 %v681_v7  ;;  %330 = vmatpush1.bf16.msra.mxu1 %v682_v8  ;;  %v686_v12 = vld [vmem:[%s155_s4 + $0x18] sm:$0xff]  }
  0x34   : > { %606 = vmatmul.mubr.msk.bf16.vlgmr.msra.gmra.mrb[0].mxu0 %vm241_vm0, %v683_v9  ;;  %610 = vmatmul.mubr.msk.bf16.vlgmr.msra.gmra.mrb[0].mxu1 %vm241_vm0, %v683_v9 }
  0x35   : > { %296 = vmatprep.mubr.bf16.mxu0 %v730_v0  ;;  %369 = vmatprep.mubr.bf16.mxu1 %v730_v0 }
  0x3c   : > { %607 = vmatmul.mubr.msk.bf16.gmra.mrb[4].mxu0 %vm241_vm0, %v684_v10  ;;  %611 = vmatmul.mubr.msk.bf16.gmra.mrb[4].mxu1 %vm241_vm0, %v684_v10 }
  0x3d   : > { %306 = vmatprep.mubr.bf16.mxu0 %v730_v0  ;;  %379 = vmatprep.mubr.bf16.mxu1 %v730_v0 }
  0x44   : > { %608 = vmatmul.mubr.msk.bf16.gmra.mrb[8].mxu0 %vm241_vm0, %v685_v11  ;;  %612 = vmatmul.mubr.msk.bf16.gmra.mrb[8].mxu1 %vm241_vm0, %v685_v11 }
  0x45   : > { %316 = vmatprep.mubr.bf16.mxu0 %v730_v0  ;;  %389 = vmatprep.mubr.bf16.mxu1 %v730_v0 }
  0x4c   : > { %609 = vmatmul.mubr.msk.bf16.gmra.mrb[12].mxu0 %vm241_vm0, %v686_v12  ;;  %613 = vmatmul.mubr.msk.bf16.gmra.mrb[12].mxu1 %vm241_vm0, %v686_v12 }
 0x107   : > { %v288_v13 = vpop.f32.mrb[0].mxu0  ;;  %v361_v14 = vpop.f32.mrb[0].mxu1 }
 0x108   : > { %v290_v15 = vpop.f32.mrb[1].mxu0  ;;  %v363_v16 = vpop.f32.mrb[1].mxu1 }
 0x109   : > { %v633_v17 = vpack.c.bf16 %v290_v15, %v288_v13  ;;  %v634_v18 = vpack.c.bf16 %v363_v16, %v361_v14  ;;  %v292_v19 = vpop.f32.mrb[2].mxu0  ;;  %v365_v20 = vpop.f32.mrb[2].mxu1 }
 0x10a   : > { %v294_v21 = vpop.f32.mrb[3].mxu0  ;;  %v367_v22 = vpop.f32.mrb[3].mxu1 }
 0x10b   : > { %496 = vst [vmem:[%s814_s8] sm:$0xff] %v633_v17  ;;  %497 = vst [vmem:[%s814_s8 + $0x8] sm:$0xff] %v634_v18  ;;  %v635_v23 = vpack.c.bf16 %v294_v21, %v292_v19  ;;  %v636_v24 = vpack.c.bf16 %v367_v22, %v365_v20 }
 0x10d   : > { %498 = vst [vmem:[%s814_s8 + $0x10] sm:$0xff] %v635_v23  ;;  %499 = vst [vmem:[%s814_s8 + $0x18] sm:$0xff] %v636_v24 }
 0x10f   : > { %v298_v25 = vpop.f32.mrb[4].mxu0  ;;  %v371_v26 = vpop.f32.mrb[4].mxu1 }
 0x110   : > { %v300_v27 = vpop.f32.mrb[5].mxu0  ;;  %v373_v28 = vpop.f32.mrb[5].mxu1 }
 0x111   : > { %v637_v29 = vpack.c.bf16 %v300_v27, %v298_v25  ;;  %v638_v30 = vpack.c.bf16 %v373_v28, %v371_v26  ;;  %v302_v31 = vpop.f32.mrb[6].mxu0  ;;  %v375_v32 = vpop.f32.mrb[6].mxu1 }
 0x112   : > { %v304_v33 = vpop.f32.mrb[7].mxu0  ;;  %v377_v34 = vpop.f32.mrb[7].mxu1 }
 0x113   : > { %500 = vst [vmem:[%s814_s8 + $0x20] sm:$0xff] %v637_v29  ;;  %501 = vst [vmem:[%s814_s8 + $0x28] sm:$0xff] %v638_v30  ;;  %v639_v35 = vpack.c.bf16 %v304_v33, %v302_v31  ;;  %v640_v36 = vpack.c.bf16 %v377_v34, %v375_v32 }
 0x115   : > { %502 = vst [vmem:[%s814_s8 + $0x30] sm:$0xff] %v639_v35  ;;  %503 = vst [vmem:[%s814_s8 + $0x38] sm:$0xff] %v640_v36 }
 0x117   : > { %v308_v37 = vpop.f32.mrb[8].mxu0  ;;  %v381_v38 = vpop.f32.mrb[8].mxu1 }
 0x118   : > { %v310_v39 = vpop.f32.mrb[9].mxu0  ;;  %v383_v40 = vpop.f32.mrb[9].mxu1 }
 0x119   : > { %v641_v41 = vpack.c.bf16 %v310_v39, %v308_v37  ;;  %v642_v42 = vpack.c.bf16 %v383_v40, %v381_v38  ;;  %v312_v43 = vpop.f32.mrb[10].mxu0  ;;  %v385_v44 = vpop.f32.mrb[10].mxu1 }
 0x11a   : > { %v314_v45 = vpop.f32.mrb[11].mxu0  ;;  %v387_v46 = vpop.f32.mrb[11].mxu1 }
 0x11b   : > { %504 = vst [vmem:[%s814_s8 + $0x40] sm:$0xff] %v641_v41  ;;  %505 = vst [vmem:[%s814_s8 + $0x48] sm:$0xff] %v642_v42  ;;  %v643_v47 = vpack.c.bf16 %v314_v45, %v312_v43  ;;  %v644_v48 = vpack.c.bf16 %v387_v46, %v385_v44 }
 0x11d   : > { %506 = vst [vmem:[%s814_s8 + $0x50] sm:$0xff] %v643_v47  ;;  %507 = vst [vmem:[%s814_s8 + $0x58] sm:$0xff] %v644_v48 }
 0x11f   : > { %v318_v49 = vpop.f32.mrb[12].mxu0  ;;  %v391_v50 = vpop.f32.mrb[12].mxu1 }
 0x120   : > { %v320_v51 = vpop.f32.mrb[13].mxu0  ;;  %v393_v52 = vpop.f32.mrb[13].mxu1 }
 0x121   : > { %v645_v53 = vpack.c.bf16 %v320_v51, %v318_v49  ;;  %v646_v54 = vpack.c.bf16 %v393_v52, %v391_v50  ;;  %v322_v55 = vpop.f32.mrb[14].mxu0  ;;  %v395_v56 = vpop.f32.mrb[14].mxu1 }
 0x122   : > { %v324_v57 = vpop.f32.mrb[15].mxu0  ;;  %v397_v58 = vpop.f32.mrb[15].mxu1 }
 0x123   : > { %508 = vst [vmem:[%s814_s8 + $0x60] sm:$0xff] %v645_v53  ;;  %509 = vst [vmem:[%s814_s8 + $0x68] sm:$0xff] %v646_v54  ;;  %v647_v59 = vpack.c.bf16 %v324_v57, %v322_v55  ;;  %v648_v60 = vpack.c.bf16 %v397_v58, %v395_v56 }
 0x125   : > { %510 = vst [vmem:[%s814_s8 + $0x70] sm:$0xff] %v647_v59  ;;  %511 = vst [vmem:[%s814_s8 + $0x78] sm:$0xff] %v648_v60 }
 0x126 PF: > { %s13_s9 = sadd.s32 1, %s725_s9  }
 0x127   : > { %p10_p3 = scmp.ge.s32.totalorder %s13_s9, 4  }
 0x129   :  { %12 = sbr.rel (!%p10_p3) target bundleno = 1 (0x1), region = 63 }
 0x130   :  { %536 = vsyncpa [#allocation3], 1 }
 0x131   :  { %538 = vsyncpa [#allocation3 + $0x1], 1 }

// kernel: chess_mha_forward.5
= control target key start
LH: loop header
LB: loop body
LE: loop exit
PB: predicated region body
PF: predicated region fallthrough
CT: control target
= control target key end

     0   :  { %s1616_s18 = smov 0   ;;  %s1618_s19 = smov 0   ;;  %s1982_s0 = inlined_call_operand.vmem [shape: bf16[2,64,512], index: 0, kind: input, shape index: {}]   ;;  %s1983_s1 = inlined_call_operand.vmem [shape: f32[2,64,64], index: 1, kind: input, shape index: {}]   ;;  %s1984_s2 = inlined_call_operand.vmem [shape: f32[2,2,64,64], index: 2, kind: input, shape index: {}]   ;;  %s1985_s3 = inlined_call_operand.vmem [shape: bf16[64,32], index: 3, kind: input, shape index: {}]   ;;  %s1986_s4 = inlined_call_operand.vmem [shape: f32[1,32], index: 4, kind: input, shape index: {}]   ;;  %s1987_s5 = inlined_call_operand.vmem [shape: f32[2,64,32], index: 5, kind: output, shape index: {}]  }
   0x1   :  { %s1620_s20 = smov 0  }
   0x2 LB: > { %s1243_s21 = sadd.s32 4294967295, %s1582_s20   ;;  %s1633_s22 = sadd.s32 1, %s1582_s20   ;;  %s1582_s20 = sphi %s1620_s20, %s1990_s20   ;;  %s1578_s19 = sphi %s1618_s19, %s1989_s19   ;;  %s1574_s18 = sphi %s1616_s18, %s1988_s18  }
   0x3   : > { %s66_s23 = ssub.s32 %s1582_s20, %s1633_s22  ;;  %s69_s24 = sadd.s32 1, %s1578_s19 }
   0x4   : > { %p67_p0 = scmp.eq.s32.totalorder %s66_s23, 0  ;;  %p76_p1 = scmp.ne.s32.totalorder %s1578_s19, %s1574_s18 }
   0x5   : > { %p77_p2 = scmp.eq.s32.totalorder %s1582_s20, 0  ;;  %p1246_p4 = scmp.ge.s32.totalorder %s1582_s20, 2 }
   0x6   : > { %s1642_s25 = scalar_select %p67_p0, %s1578_s19, %s69_s24  }
   0x7   : > { %p78_p3 = por %p77_p2, %p76_p1  ;;  %179 = sbr.rel (%p1246_p4) target bundleno = 26 (0x1a), region = 28 }
   0xe   : > { %190 = sbr.rel (!%p78_p3) target bundleno = 26 (0x1a), region = 36  ;;  %s192_s26 = sand.u32 (%p78_p3), 1, %s1578_s19  }
   0xf   : > { %s1311_s27 = sshll.u32 (%p78_p3), %s1582_s20, 6  ;;  %s1247_s28 = sshll.u32 (%p78_p3), %s192_s26, 7 }
  0x10   : > { %s1650_s6 = scalar_lea.vmem (%p78_p3), %s1984_s2, %s1311_s27  ;;  %s194_s7 = scalar_lea.vmem (%p78_p3), [#allocation3], %s1247_s28 }
  0x11   : > { %v255_v0 = vld [vmem:[%s1650_s6] sm:$0xff] (%p78_p3)  ;;  %v257_v1 = vld [vmem:[%s1650_s6 + $0x8] sm:$0xff] (%p78_p3)  ;;  %v259_v2 = vld [vmem:[%s1650_s6 + $0x10] sm:$0xff] (%p78_p3) }
  0x12   : > { %256 = vst [vmem:[%s194_s7] sm:$0xff] (%p78_p3), %v255_v0  ;;  %258 = vst [vmem:[%s194_s7 + $0x8] sm:$0xff] (%p78_p3), %v257_v1  ;;  %v261_v3 = vld [vmem:[%s1650_s6 + $0x18] sm:$0xff] (%p78_p3)  ;;  %v263_v4 = vld [vmem:[%s1650_s6 + $0x20] sm:$0xff] (%p78_p3) }
  0x13   : > { %260 = vst [vmem:[%s194_s7 + $0x10] sm:$0xff] (%p78_p3), %v259_v2  ;;  %v265_v5 = vld [vmem:[%s1650_s6 + $0x28] sm:$0xff] (%p78_p3)  ;;  %262 = vst [vmem:[%s194_s7 + $0x18] sm:$0xff] (%p78_p3), %v261_v3  ;;  %v267_v6 = vld [vmem:[%s1650_s6 + $0x30] sm:$0xff] (%p78_p3) }
  0x14   : > { %264 = vst [vmem:[%s194_s7 + $0x20] sm:$0xff] (%p78_p3), %v263_v4  ;;  %266 = vst [vmem:[%s194_s7 + $0x28] sm:$0xff] (%p78_p3), %v265_v5  ;;  %v269_v7 = vld [vmem:[%s1650_s6 + $0x38] sm:$0xff] (%p78_p3)  ;;  %v271_v8 = vld [vmem:[%s1650_s6 + $0x80] sm:$0xff] (%p78_p3) }
  0x15   : > { %268 = vst [vmem:[%s194_s7 + $0x30] sm:$0xff] %v267_v6  ;;  %270 = vst [vmem:[%s194_s7 + $0x38] sm:$0xff] %v269_v7  ;;  %v273_v9 = vld [vmem:[%s1650_s6 + $0x88] sm:$0xff]  ;;  %v275_v10 = vld [vmem:[%s1650_s6 + $0x90] sm:$0xff] }
  0x16   : > { %272 = vst [vmem:[%s194_s7 + $0x40] sm:$0xff] %v271_v8  ;;  %v277_v11 = vld [vmem:[%s1650_s6 + $0x98] sm:$0xff]  ;;  %274 = vst [vmem:[%s194_s7 + $0x48] sm:$0xff] %v273_v9  ;;  %v279_v12 = vld [vmem:[%s1650_s6 + $0xa0] sm:$0xff] }
  0x17   : > { %276 = vst [vmem:[%s194_s7 + $0x50] sm:$0xff] %v275_v10  ;;  %278 = vst [vmem:[%s194_s7 + $0x58] sm:$0xff] %v277_v11  ;;  %v281_v13 = vld [vmem:[%s1650_s6 + $0xa8] sm:$0xff]  ;;  %v283_v14 = vld [vmem:[%s1650_s6 + $0xb0] sm:$0xff] }
  0x18   : > { %280 = vst [vmem:[%s194_s7 + $0x60] sm:$0xff] %v279_v12  ;;  %282 = vst [vmem:[%s194_s7 + $0x68] sm:$0xff] %v281_v13  ;;  %v285_v15 = vld [vmem:[%s1650_s6 + $0xb8] sm:$0xff] }
  0x19   : > { %284 = vst [vmem:[%s194_s7 + $0x70] sm:$0xff] %v283_v14  ;;  %286 = vst [vmem:[%s194_s7 + $0x78] sm:$0xff] %v285_v15 }
  0x1a PF: > { %p1250_p5 = scmp.ge.s32.totalorder %s1582_s20, 1  ;;  %p291_p6 = scmp.lt.s32.totalorder %s1582_s20, 3 }
  0x1c   : > { %p292_p7 = pnand %p1250_p5, %p291_p6 }
  0x1d   : > { %p330_p8 = scmp.lt.s32.totalorder (!%p292_p7), %s1243_s21, 1  ;;  %vm397_vm0 = vcmask (!%p292_p7), 261120   ;;  %s298_s12 = sand.u32 (!%p292_p7), 1, %s1574_s18   ;;  %v359_v28 = vld [vmem:[%s1983_s1 + $0x10] sm:$0xff] (!%p292_p7)  ;;  %v357_v29 = vld [vmem:[%s1983_s1] sm:$0xff] (!%p292_p7)  ;;  %v360_v31 = vld [vmem:[%s1983_s1 + $0x18] sm:$0xff] (!%p292_p7) }
  0x1e   : > { %295 = sbr.rel (%p292_p7) target bundleno = 1852 (0x73c), region = 74  ;;  %s1251_s13 = sshll.u32 (!%p292_p7), %s298_s12, 7  ;;  %v358_v35 = vld [vmem:[%s1983_s1 + $0x8] sm:$0xff] (!%p292_p7)  ;;  %vm503_vm1 = vcmask (!%p292_p7), 523264   ;;  %v363_v49 = vld [vmem:[%s1983_s1 + $0x30] sm:$0xff] (!%p292_p7)  ;;  %v361_v51 = vld [vmem:[%s1983_s1 + $0x20] sm:$0xff] (!%p292_p7) }
  0x1f   : > { %s1740_s24 = scalar_lea.vmem (!%p292_p7), [#allocation3], %s1251_s13  ;;  %v364_v53 = vld [vmem:[%s1983_s1 + $0x38] sm:$0xff] (!%p292_p7)  ;;  %v362_v57 = vld [vmem:[%s1983_s1 + $0x28] sm:$0xff] (!%p292_p7)  ;;  %s1584_s10 = smov (!%p292_p7), 96   ;;  %vm1037_vm2 = vcmask (!%p292_p7), 523520  }
  0x20   : > { %v489_v32 = vld [vmem:[%s1740_s24 + $0x10] sm:$0xff] (!%p292_p7)  ;;  %v487_v36 = vld [vmem:[%s1740_s24] sm:$0xff] (!%p292_p7)  ;;  %v490_v39 = vld [vmem:[%s1740_s24 + $0x18] sm:$0xff] (!%p292_p7)  ;;  %s1585_s14 = smov (!%p292_p7), 32  }
  0x21   : > { %v488_v43 = vld [vmem:[%s1740_s24 + $0x8] sm:$0xff] (!%p292_p7)  ;;  %v491_v58 = vld [vmem:[%s1740_s24 + $0x20] sm:$0xff] (!%p292_p7)  ;;  %v493_v59 = vld [vmem:[%s1740_s24 + $0x30] sm:$0xff] (!%p292_p7) }
  0x22   : > { %v492_v1 = vld [vmem:[%s1740_s24 + $0x28] sm:$0xff] (!%p292_p7)  ;;  %v494_v2 = vld [vmem:[%s1740_s24 + $0x38] sm:$0xff] (!%p292_p7) }
  0x25   : > { %s1992_s21 = smov (!%p330_p8, %s1243_s21), 1 }
  0x26   : > { %s1312_s8 = sshll.u32 %s1992_s21, 7  ;;  %s1313_s15 = sshll.u32 %s1992_s21, 6 }
  0x27   : > { %s1680_s11 = scalar_lea.vmem %s1982_s0, %s1312_s8  ;;  %s339_s18 = scalar_lea.vmem %s1987_s5, %s1313_s15 }
  0x28   : > { %v1683_v16 = vld [vmem:[%s1680_s11 + $0x4] ss:$16 sps:$4 sm:$0xff]   ;;  %v1695_v19 = vld [vmem:[%s1680_s11] ss:$16 sps:$4 sm:$0xff]  }
  0x29   : > { %v1686_v17 = vld [vmem:[%s1680_s11 + $0x24] ss:$16 sps:$4 sm:$0xff]   ;;  %1442 = vmatprep.subr.msk.bf16.mxu0 %vm397_vm0, %v1683_v16  ;;  %v411_v18 = vsel %vm397_vm0, %v1683_v16, 0  ;;  %1362 = vmatprep.mubr.msk.bf16.mxu0 %vm397_vm0, %v1695_v19  ;;  %v1716_v25 = vld [vmem:[%s1680_s11 + $0x20] ss:$16 sps:$4 sm:$0xff]  }
  0x2a   : > { %1355 = vmatpush3.bf16.xpose.msra.mxu0 %v411_v18  ;;  %v414_v20 = vsel %vm397_vm0, %v1686_v17, 0  ;;  %v1702_v21 = vld [vmem:[%s1680_s11 + $0x44] ss:$16 sps:$4 sm:$0xff]   ;;  %v1719_v26 = vld [vmem:[%s1680_s11 + $0x40] ss:$16 sps:$4 sm:$0xff]  }
  0x2b   : > { %1443 = vmatprep.subr.msk.bf16.mxu0 %vm397_vm0, %v1686_v17  ;;  %v417_v22 = vsel %vm397_vm0, %v1702_v21, 0  ;;  %v1709_v23 = vld [vmem:[%s1680_s11 + $0x64] ss:$16 sps:$4 sm:$0xff]   ;;  %v1726_v27 = vld [vmem:[%s1680_s11 + $0x60] ss:$16 sps:$4 sm:$0xff]  }
  0x2c   : > { %v420_v24 = vsel %vm397_vm0, %v1709_v23, 0 }
  0x32   : > { %1357 = vmatpush3.bf16.xpose.msra.mxu0 %v414_v20 }
  0x33   : > { %1444 = vmatprep.subr.msk.bf16.mxu0 %vm397_vm0, %v1702_v21 }
  0x3a   : > { %1359 = vmatpush3.bf16.xpose.msra.mxu0 %v417_v22 }
  0x3b   : > { %1445 = vmatprep.subr.msk.bf16.mxu0 %vm397_vm0, %v1709_v23 }
  0x42   : > { %1361 = vmatpush3.bf16.xpose.msra.mxu0 %v420_v24 }
  0x49   : > { %1363 = vmatmul.mubr.msk.bf16.vlgmr.msra.gmra.mrb[0].mxu0 %vm397_vm0, %v1716_v25 }
  0x4a   : > { %1366 = vmatprep.mubr.msk.bf16.mxu0 %vm397_vm0, %v1719_v26 }
  0x51   : > { %1367 = vmatmul.mubr.msk.bf16.gmra.mrb[4].mxu0 %vm397_vm0, %v1726_v27 }
 0x11c   : > { %v1364_v30 = vpop.f32.mrb[0].mxu0 }
 0x11d   : > { %v465_v33 = vadd.f32 %v1364_v30, %v359_v28  ;;  %v456_v34 = vpop.f32.mrb[1].mxu0 }
 0x11e   : > { %v457_v37 = vadd.f32 %v456_v34, %v357_v29  ;;  %v1365_v38 = vpop.f32.mrb[2].mxu0 }
 0x11f   : > { %v468_v40 = vadd.f32 %v1365_v38, %v360_v31  ;;  %v459_v41 = vpop.f32.mrb[3].mxu0  ;;  %v497_v42 = vadd.f32 %v489_v32, %v465_v33 }
 0x120   : > { %v460_v44 = vadd.f32 %v459_v41, %v358_v35  ;;  %v495_v45 = vadd.f32 %v487_v36, %v457_v37 }
 0x121   : > { %v510_v46 = vsel %vm503_vm1, %v497_v42, -inf  ;;  %v498_v47 = vadd.f32 %v490_v39, %v468_v40 }
 0x122   : > { %511 = vmax.xlane.f32.xlu1 %v510_v46  ;;  %v504_v48 = vsel %vm503_vm1, %v495_v45, -inf  ;;  %v496_v50 = vadd.f32 %v488_v43, %v460_v44 }
 0x123   : > { %505 = vmax.xlane.f32.xlu0 %v504_v48  ;;  %v513_v56 = vsel %vm503_vm1, %v498_v47, -inf }
 0x124   : > { %v1368_v52 = vpop.f32.mrb[4].mxu0  ;;  %v507_v62 = vsel %vm503_vm1, %v496_v50, -inf }
 0x125   : > { %v481_v54 = vadd.f32 %v1368_v52, %v363_v49  ;;  %v472_v55 = vpop.f32.mrb[5].mxu0  ;;  %v1799_v49 = vld [vmem:[%s1680_s11 + $0x8] ss:$16 sps:$4 sm:$0xff]  }
 0x126   : > { %v473_v60 = vadd.f32 %v472_v55, %v361_v51  ;;  %v1369_v61 = vpop.f32.mrb[6].mxu0  ;;  %514 = vmax.xlane.f32.xlu1 %v513_v56  ;;  %1370 = vmatprep.subr.bf16.mxu1 %v1799_v49  ;;  %v1806_v51 = vld [vmem:[%s1680_s11 + $0x28] ss:$16 sps:$4 sm:$0xff]  }
 0x127   : > { %v484_v63 = vadd.f32 %v1369_v61, %v364_v53  ;;  %v475_v0 = vpop.f32.mrb[7].mxu0  ;;  %508 = vmax.xlane.f32.xlu0 %v507_v62  ;;  %v501_v5 = vadd.f32 %v493_v59, %v481_v54  ;;  %1371 = vmatpush3.bf16.msra.mxu1 %v1799_v49  ;;  %v1811_v52 = vld [vmem:[%s1680_s11 + $0x48] ss:$16 sps:$4 sm:$0xff]  }
 0x128   : > { %v476_v3 = vadd.f32 %v475_v0, %v362_v57  ;;  %v499_v4 = vadd.f32 %v491_v58, %v473_v60  ;;  %1372 = vmatprep.subr.bf16.mxu1 %v1806_v51  ;;  %v1818_v53 = vld [vmem:[%s1680_s11 + $0x68] ss:$16 sps:$4 sm:$0xff]  }
 0x129   : > { %v1772_v8 = vadd.f32 %v494_v2, %v484_v63  ;;  %v522_v10 = vsel %vm503_vm1, %v501_v5, -inf }
 0x12a   : > { %v516_v6 = vsel %vm503_vm1, %v499_v4, -inf  ;;  %v1770_v7 = vadd.f32 %v492_v1, %v476_v3 }
 0x12b   : > { %517 = vmax.xlane.f32.xlu0 %v516_v6  ;;  %v525_v11 = vsel %vm503_vm1, %v1772_v8, -inf  ;;  %1373 = vmatpush3.bf16.msra.mxu1 %v1806_v51 }
 0x12c   : > { %v519_v9 = vsel %vm503_vm1, %v1770_v7, -inf  ;;  %1374 = vmatprep.subr.bf16.mxu1 %v1811_v52 }
 0x12d   : > { %520 = vmax.xlane.f32.xlu1 %v519_v9 }
 0x12f   : > { %523 = vmax.xlane.f32.xlu0 %v522_v10  ;;  %1375 = vmatpush3.bf16.msra.mxu1 %v1811_v52 }
 0x130   : > { %1376 = vmatprep.subr.bf16.mxu1 %v1818_v53 }
 0x131   : > { %526 = vmax.xlane.f32.xlu1 %v525_v11 }
 0x133   : > { %1377 = vmatpush3.bf16.msra.mxu1 %v1818_v53 }
 0x1af   : > { %v512_v12 = vpop.xlane.xlu1 %511 }
 0x1b0   : > { %v530_v13 = vsub.f32 %v497_v42, %v512_v12  ;;  %v506_v14 = vpop.xlane.xlu0 %505 }
 0x1b1   : > { %v528_v15 = vsub.f32 %v495_v45, %v506_v14 }
 0x1b2   : > { %v540_v18 = vmul.f32 1.442695, %v530_v13 }
 0x1b3   : > { %v536_v20 = vmul.f32 1.442695, %v528_v15  ;;  %v515_v22 = vpop.xlane.xlu1 %514 }
 0x1b4   : > { %1496 = vpow2.f32 %v540_v18  ;;  %v531_v24 = vsub.f32 %v498_v47, %v515_v22  ;;  %v509_v28 = vpop.xlane.xlu0 %508 }
 0x1b5   : > { %v529_v29 = vsub.f32 %v496_v50, %v509_v28  ;;  %1498 = vpow2.f32 %v536_v20 }
 0x1b6   : > { %v542_v30 = vmul.f32 1.442695, %v531_v24 }
 0x1b7   : > { %v538_v31 = vmul.f32 1.442695, %v529_v29 }
 0x1b8   : > { %1500 = vpow2.f32 %v542_v30  ;;  %v518_v32 = vpop.xlane.xlu0 %517 }
 0x1b9   : > { %1502 = vpow2.f32 %v538_v31  ;;  %v532_v33 = vsub.f32 %v499_v4, %v518_v32 }
 0x1ba   : > { %v521_v54 = vpop.xlane.xlu1 %520 }
 0x1bb   : > { %v544_v37 = vmul.f32 1.442695, %v532_v33 }
 0x1bc   : > { %v524_v34 = vpop.xlane.xlu0 %523 }
 0x1bd   : > { %v534_v35 = vsub.f32 %v501_v5, %v524_v34 }
 0x1be   : > { %v1779_v36 = vpop.eup %1496  ;;  %v527_v55 = vpop.xlane.xlu1 %526 }
 0x1bf   : > { %v548_v38 = vmul.f32 1.442695, %v534_v35  ;;  %v558_v39 = vsel %vm503_vm1, %v1779_v36, 0.0  ;;  %v1783_v40 = vpop.eup %1498  ;;  %v535_v56 = vsub.f32 %v1772_v8, %v527_v55 }
 0x1c0   : > { %559 = vadd.xlane.f32.xlu0 %v558_v39  ;;  %v552_v43 = vsel %vm503_vm1, %v1783_v40, 0.0 }
 0x1c1   : > { %1504 = vpow2.f32 %v548_v38  ;;  %v550_v57 = vmul.f32 1.442695, %v535_v56  ;;  %v1278_v56 = vld [vmem:[%s1983_s1 + $0x50] sm:$0xff] }
 0x1c2   : > { %v1785_v41 = vpop.eup %1500  ;;  %1506 = vpow2.f32 %v544_v37 }
 0x1c3   : > { %v561_v42 = vsel %vm503_vm1, %v1785_v41, 0.0  ;;  %v1503_v44 = vpop.eup %1502  ;;  %1508 = vpow2.f32 %v550_v57 }
 0x1c4   : > { %562 = vadd.xlane.f32.xlu1 %v561_v42  ;;  %553 = vadd.xlane.f32.xlu0 %v552_v43  ;;  %v555_v45 = vsel %vm503_vm1, %v1503_v44, 0.0 }
 0x1c8   : > { %556 = vadd.xlane.f32.xlu1 %v555_v45 }
 0x1cb   : > { %v1792_v46 = vpop.eup %1504 }
 0x1cc   : > { %v570_v47 = vsel %vm503_vm1, %v1792_v46, 0.0  ;;  %v1796_v48 = vpop.eup %1506 }
 0x1cd   : > { %571 = vadd.xlane.f32.xlu0 %v570_v47  ;;  %v564_v50 = vsel %vm503_vm1, %v1796_v48, 0.0  ;;  %v1509_v58 = vpop.eup %1508 }
 0x1ce   : > { %v573_v59 = vsel %vm503_vm1, %v1509_v58, 0.0 }
 0x1d1   : > { %565 = vadd.xlane.f32.xlu0 %v564_v50 }
 0x1d9   : > { %724 = vrot.lane.b32.xlu1 %v1686_v17, %s1584_s10  ;;  %v533_v17 = vsub.f32 %v1770_v7, %v521_v54 }
 0x1dd   : > { %726 = vrot.lane.b32.xlu1 %v1702_v21, %s1584_s10  ;;  %v546_v21 = vmul.f32 1.442695, %v533_v17  ;;  %v1276_v17 = vld [vmem:[%s1983_s1 + $0x40] sm:$0xff] }
 0x1df   : > { %1510 = vpow2.f32 %v546_v21 }
 0x1e7   : > { %722 = vrot.lane.b32.xlu0 %v1683_v16, %s1584_s10 }
 0x1e9   : > { %v1511_v60 = vpop.eup %1510 }
 0x1ea   : > { %v567_v16 = vsel %vm503_vm1, %v1511_v60, 0.0 }
 0x1eb   : > { %714 = vrot.lane.b32.xlu0 %v1695_v19, %s1584_s10 }
 0x1ef   : > { %718 = vrot.lane.b32.xlu0 %v1719_v26, %s1584_s10 }
 0x201   : > { %574 = vadd.xlane.f32.xlu1 %v573_v59  ;;  %v1288_v59 = vld [vmem:[%s1740_s24 + $0x40] sm:$0xff] }
 0x205   : > { %568 = vadd.xlane.f32.xlu1 %v567_v16 }
 0x216   : > { %728 = vrot.lane.b32.xlu1 %v1709_v23, %s1584_s10 }
 0x21a   : > { %716 = vrot.lane.b32.xlu1 %v1716_v25, %s1584_s10 }
 0x21e   : > { %720 = vrot.lane.b32.xlu1 %v1726_v27, %s1584_s10 }
 0x24d   : > { %v560_v19 = vpop.xlane.xlu0 %559 }
 0x251   : > { %v563_v26 = vpop.xlane.xlu1 %562  ;;  %v554_v61 = vpop.xlane.xlu0 %553 }
 0x252   : > { %1512 = vrcp.f32 %v563_v26  ;;  %v1279_v26 = vld [vmem:[%s1983_s1 + $0x58] sm:$0xff] }
 0x253   : > { %1514 = vrcp.f32 %v554_v61 }
 0x254   : > { %1516 = vrcp.f32 %v560_v19 }
 0x255   : > { %v557_v62 = vpop.xlane.xlu1 %556 }
 0x256   : > { %1518 = vrcp.f32 %v557_v62  ;;  %v1289_v62 = vld [vmem:[%s1740_s24 + $0x48] sm:$0xff] }
 0x259   : > { %v725_v10 = vpop.permute.xlu1 %724 }
 0x25a   : > { %v572_v63 = vpop.xlane.xlu0 %571  ;;  %v746_v11 = vsel %vm397_vm0, %v725_v10, 0 }
 0x25c   : > { %v1513_v0 = vpop.eup %1512 }
 0x25d   : > { %v1515_v1 = vpop.eup %1514  ;;  %v587_v4 = vmul.f32 %v1513_v0, %v1785_v41  ;;  %v727_v12 = vpop.permute.xlu1 %726 }
 0x25e   : > { %v566_v2 = vpop.xlane.xlu0 %565  ;;  %v1517_v3 = vpop.eup %1516  ;;  %v584_v25 = vmul.f32 %v1515_v1, %v1783_v40  ;;  %v749_v13 = vsel %vm397_vm0, %v727_v12, 0 }
 0x25f   : > { %v586_v6 = vmul.f32 %v1517_v3, %v1779_v36 }
 0x260   : > { %v1519_v23 = vpop.eup %1518 }
 0x261   : > { %v585_v5 = vmul.f32 %v1519_v23, %v1503_v44  ;;  %v593_v9 = vpack.c.bf16 %v587_v4, %v586_v6 }
 0x262   : > { %v723_v27 = vpop.permute.xlu0 %722 }
 0x263   : > { %v592_v7 = vpack.c.bf16 %v585_v5, %v584_v25  ;;  %1446 = vmatprep.subr.msk.bf16.mxu1 %vm397_vm0, %v723_v27  ;;  %v743_v8 = vsel %vm397_vm0, %v723_v27, 0  ;;  %v1280_v25 = vld [vmem:[%s1983_s1 + $0x60] sm:$0xff]  ;;  %v1291_v5 = vld [vmem:[%s1740_s24 + $0x58] sm:$0xff] }
 0x265   : > { %1378 = vmatprep.mubr.msk.bf16.mxu1 %vm503_vm1, %v592_v7  ;;  %v1283_v7 = vld [vmem:[%s1983_s1 + $0x78] sm:$0xff] }
 0x266   : > { %1379 = vmatmul.mubr.msk.bf16.vlgmr.msra.gmra.mrb[0].mxu1 %vm503_vm1, %v593_v9  ;;  %v715_v36 = vpop.permute.xlu0 %714 }
 0x267   : > { %1387 = vmatpush3.bf16.xpose.msra.mxu1 %v743_v8  ;;  %v1282_v8 = vld [vmem:[%s1983_s1 + $0x70] sm:$0xff] }
 0x268   : > { %1447 = vmatprep.subr.msk.bf16.mxu1 %vm397_vm0, %v725_v10  ;;  %v1281_v10 = vld [vmem:[%s1983_s1 + $0x68] sm:$0xff] }
 0x26a   : > { %v719_v38 = vpop.permute.xlu0 %718 }
 0x26f   : > { %1389 = vmatpush3.bf16.xpose.msra.mxu1 %v746_v11  ;;  %v1292_v11 = vld [vmem:[%s1740_s24 + $0x60] sm:$0xff] }
 0x270   : > { %1448 = vmatprep.subr.msk.bf16.mxu1 %vm397_vm0, %v727_v12 }
 0x277   : > { %1391 = vmatpush3.bf16.xpose.msra.mxu1 %v749_v13 }
 0x28e   : > { %v575_v14 = vpop.xlane.xlu1 %574 }
 0x28f   : > { %1520 = vrcp.f32 %v575_v14 }
 0x290   : > { %1522 = vrcp.f32 %v566_v2 }
 0x291   : > { %1524 = vrcp.f32 %v572_v63  ;;  %v1290_v63 = vld [vmem:[%s1740_s24 + $0x50] sm:$0xff] }
 0x292   : > { %v569_v15 = vpop.xlane.xlu1 %568 }
 0x293   : > { %1526 = vrcp.f32 %v569_v15 }
 0x296   : > { %v729_v18 = vpop.permute.xlu1 %728 }
 0x297   : > { %v752_v20 = vsel %vm397_vm0, %v729_v18, 0  ;;  %1449 = vmatprep.subr.msk.bf16.mxu1 %vm397_vm0, %v729_v18 }
 0x298   : > { %1393 = vmatpush3.bf16.xpose.msra.mxu1 %v752_v20 }
 0x299   : > { %v1521_v22 = vpop.eup %1520 }
 0x29a   : > { %v1523_v24 = vpop.eup %1522  ;;  %v591_v30 = vmul.f32 %v1521_v22, %v1509_v58  ;;  %v717_v37 = vpop.permute.xlu1 %716  ;;  %v1277_v58 = vld [vmem:[%s1983_s1 + $0x48] sm:$0xff] }
 0x29b   : > { %v1525_v28 = vpop.eup %1524  ;;  %v588_v31 = vmul.f32 %v1523_v24, %v1796_v48  ;;  %v1293_v22 = vld [vmem:[%s1740_s24 + $0x68] sm:$0xff]  ;;  %v1295_v24 = vld [vmem:[%s1740_s24 + $0x78] sm:$0xff] }
 0x29c   : > { %v590_v33 = vmul.f32 %v1525_v28, %v1792_v46 }
 0x29d   : > { %v1527_v29 = vpop.eup %1526 }
 0x29e   : > { %v589_v32 = vmul.f32 %v1527_v29, %v1511_v60  ;;  %v595_v35 = vpack.c.bf16 %v591_v30, %v590_v33  ;;  %v721_v39 = vpop.permute.xlu1 %720 }
 0x2a0   : > { %v594_v34 = vpack.c.bf16 %v589_v32, %v588_v31  ;;  %v1294_v31 = vld [vmem:[%s1740_s24 + $0x70] sm:$0xff] }
 0x2a2   : > { %1382 = vmatprep.mubr.msk.bf16.mxu1 %vm503_vm1, %v594_v34 }
 0x2a3   : > { %1383 = vmatmul.mubr.msk.bf16.gmra.mrb[4].mxu1 %vm503_vm1, %v595_v35 }
 0x2a4   : > { %1394 = vmatprep.mubr.msk.bf16.mxu1 %vm397_vm0, %v715_v36 }
 0x2ab   : > { %1395 = vmatmul.mubr.msk.bf16.vlgmr.msra.gmra.mrb[8].mxu1 %vm397_vm0, %v717_v37 }
 0x2ac   : > { %1398 = vmatprep.mubr.msk.bf16.mxu1 %vm397_vm0, %v719_v38 }
 0x2b3   : > { %1399 = vmatmul.mubr.msk.bf16.gmra.mrb[12].mxu1 %vm397_vm0, %v721_v39 }
 0x339   : > { %v1380_v40 = vpop.f32.mrb[0].mxu1 }
 0x33a   : > { %v666_v41 = vpop.f32.mrb[1].mxu1 }
 0x33b   : > { %v1381_v42 = vpop.f32.mrb[2].mxu1 }
 0x33c   : > { %v698_v43 = vpack.c.bf16 %v1381_v42, %v1380_v40  ;;  %v669_v44 = vpop.f32.mrb[3].mxu1 }
 0x33d   : > { %v697_v45 = vpack.c.bf16 %v669_v44, %v666_v41 }
 0x33e   : > { %702 = vst.msk [vmem:[#allocation2 + $0x8] sm:$0xff] %vm397_vm0, %v698_v43 }
 0x33f   : > { %701 = vst.msk [vmem:[#allocation2] sm:$0xff] %vm397_vm0, %v697_v45 }
 0x376   : > { %v1384_v46 = vpop.f32.mrb[4].mxu1 }
 0x377   : > { %v682_v47 = vpop.f32.mrb[5].mxu1 }
 0x378   : > { %v1385_v48 = vpop.f32.mrb[6].mxu1 }
 0x379   : > { %v700_v50 = vpack.c.bf16 %v1385_v48, %v1384_v46  ;;  %v685_v54 = vpop.f32.mrb[7].mxu1 }
 0x37a   : > { %v699_v55 = vpack.c.bf16 %v685_v54, %v682_v47 }
 0x37b   : > { %704 = vst.msk [vmem:[#allocation2 + $0x18] sm:$0xff] %vm397_vm0, %v700_v50 }
 0x37c   : > { %703 = vst.msk [vmem:[#allocation2 + $0x10] sm:$0xff] %vm397_vm0, %v699_v55 }
 0x37e   : > { %v1396_v57 = vpop.f32.mrb[8].mxu1 }
 0x37f   : > { %v788_v21 = vpop.f32.mrb[9].mxu1  ;;  %v797_v60 = vadd.f32 %v1396_v57, %v1278_v56 }
 0x380   : > { %v789_v16 = vadd.f32 %v1276_v17, %v788_v21  ;;  %v1397_v19 = vpop.f32.mrb[10].mxu1 }
 0x381   : > { %v791_v61 = vpop.f32.mrb[11].mxu1  ;;  %v800_v2 = vadd.f32 %v1397_v19, %v1279_v26  ;;  %v830_v4 = vadd.f32 %v1290_v63, %v797_v60 }
 0x382   : > { %v792_v0 = vadd.f32 %v1277_v58, %v791_v61  ;;  %v828_v1 = vadd.f32 %v1288_v59, %v789_v16 }
 0x383   : > { %v842_v14 = vsel %vm503_vm1, %v830_v4, -inf  ;;  %v831_v15 = vadd.f32 %v1291_v5, %v800_v2 }
 0x384   : > { %v836_v3 = vsel %vm503_vm1, %v828_v1, -inf  ;;  %v829_v23 = vadd.f32 %v1289_v62, %v792_v0 }
 0x385   : > { %837 = vmax.xlane.f32.xlu0 %v836_v3  ;;  %v845_v32 = vsel %vm503_vm1, %v831_v15, -inf }
 0x386   : > { %v1400_v27 = vpop.f32.mrb[12].mxu1  ;;  %v839_v6 = vsel %vm503_vm1, %v829_v23, -inf }
 0x387   : > { %840 = vmax.xlane.f32.xlu1 %v839_v6  ;;  %v804_v9 = vpop.f32.mrb[13].mxu1  ;;  %v813_v28 = vadd.f32 %v1400_v27, %v1282_v8 }
 0x388   : > { %v805_v12 = vadd.f32 %v1280_v25, %v804_v9  ;;  %v1401_v13 = vpop.f32.mrb[14].mxu1 }
 0x389   : > { %v816_v18 = vadd.f32 %v1401_v13, %v1283_v7  ;;  %843 = vmax.xlane.f32.xlu0 %v842_v14  ;;  %v807_v20 = vpop.f32.mrb[15].mxu1  ;;  %v834_v37 = vadd.f32 %v1294_v31, %v813_v28 }
 0x38a   : > { %v808_v29 = vadd.f32 %v1281_v10, %v807_v20  ;;  %v832_v30 = vadd.f32 %v1292_v11, %v805_v12 }
 0x38b   : > { %v835_v34 = vadd.f32 %v1295_v24, %v816_v18  ;;  %v854_v39 = vsel %vm503_vm1, %v834_v37, -inf }
 0x38c   : > { %v833_v33 = vadd.f32 %v1293_v22, %v808_v29  ;;  %v848_v36 = vsel %vm503_vm1, %v832_v30, -inf }
 0x38d   : > { %846 = vmax.xlane.f32.xlu0 %v845_v32  ;;  %v857_v38 = vsel %vm503_vm1, %v835_v34, -inf }
 0x38e   : > { %v851_v35 = vsel %vm503_vm1, %v833_v33, -inf }
 0x38f   : > { %852 = vmax.xlane.f32.xlu1 %v851_v35 }
 0x391   : > { %849 = vmax.xlane.f32.xlu0 %v848_v36 }
 0x393   : > { %858 = vmax.xlane.f32.xlu1 %v857_v38 }
 0x395   : > { %855 = vmax.xlane.f32.xlu0 %v854_v39 }
 0x412   : > { %v838_v40 = vpop.xlane.xlu0 %837 }
 0x413   : > { %v860_v41 = vsub.f32 %v828_v1, %v838_v40 }
 0x414   : > { %v841_v42 = vpop.xlane.xlu1 %840 }
 0x415   : > { %v868_v45 = vmul.f32 1.442695, %v860_v41  ;;  %v861_v46 = vsub.f32 %v829_v23, %v841_v42 }
 0x416   : > { %v844_v43 = vpop.xlane.xlu0 %843 }
 0x417   : > { %v862_v44 = vsub.f32 %v830_v4, %v844_v43  ;;  %v870_v54 = vmul.f32 1.442695, %v861_v46 }
 0x419   : > { %v872_v47 = vmul.f32 1.442695, %v862_v44 }
 0x41a   : > { %v847_v48 = vpop.xlane.xlu0 %846 }
 0x41b   : > { %1528 = vpow2.f32 %v872_v47  ;;  %v863_v50 = vsub.f32 %v831_v15, %v847_v48  ;;  %v1492_v48 = vld [vmem:[%s1985_s3] sm:$0xff]  }
 0x41c   : > { %1530 = vpow2.f32 %v868_v45  ;;  %v853_v4 = vpop.xlane.xlu1 %852  ;;  %1434 = vmatprep.subr.bf16.mxu1 %v1492_v48 }
 0x41d   : > { %v874_v55 = vmul.f32 1.442695, %v863_v50  ;;  %v865_v27 = vsub.f32 %v833_v33, %v853_v4  ;;  %1438 = vmatpush3.bf16.msra.mxu1 %v1492_v48  ;;  %v1493_v50 = vld [vmem:[%s1985_s3 + $0x8] sm:$0xff]  }
 0x41e   : > { %v850_v56 = vpop.xlane.xlu0 %849  ;;  %1435 = vmatprep.subr.bf16.mxu1 %v1493_v50 }
 0x41f   : > { %1532 = vpow2.f32 %v874_v55  ;;  %v864_v17 = vsub.f32 %v832_v30, %v850_v56  ;;  %v878_v7 = vmul.f32 1.442695, %v865_v27  ;;  %v1495_v56 = vld [vmem:[%s1985_s3 + $0x18] sm:$0xff]  }
 0x420   : > { %1534 = vpow2.f32 %v870_v54  ;;  %v859_v25 = vpop.xlane.xlu1 %858  ;;  %v1494_v54 = vld [vmem:[%s1985_s3 + $0x10] sm:$0xff]  }
 0x421   : > { %v876_v59 = vmul.f32 1.442695, %v864_v17  ;;  %v867_v5 = vsub.f32 %v835_v34, %v859_v25  ;;  %1439 = vmatpush3.bf16.msra.mxu1 %v1493_v50 }
 0x422   : > { %v856_v57 = vpop.xlane.xlu0 %855  ;;  %1436 = vmatprep.subr.bf16.mxu1 %v1494_v54 }
 0x423   : > { %v866_v21 = vsub.f32 %v834_v37, %v856_v57  ;;  %v882_v6 = vmul.f32 1.442695, %v867_v5  ;;  %v1300_v5 = vld [vmem:[%s1986_s4] ss:$0 sm:$0xff] }
 0x425   : > { %v1905_v58 = vpop.eup %1528  ;;  %v880_v60 = vmul.f32 1.442695, %v866_v21  ;;  %1440 = vmatpush3.bf16.msra.mxu1 %v1494_v54 }
 0x426   : > { %v890_v16 = vsel %vm503_vm1, %v1905_v58, 0.0  ;;  %v1531_v19 = vpop.eup %1530  ;;  %1437 = vmatprep.subr.bf16.mxu1 %v1495_v56 }
 0x427   : > { %1536 = vpow2.f32 %v880_v60  ;;  %891 = vadd.xlane.f32.xlu0 %v890_v16  ;;  %v884_v61 = vsel %vm503_vm1, %v1531_v19, 0.0 }
 0x428   : > { %1538 = vpow2.f32 %v876_v59 }
 0x429   : > { %v1909_v26 = vpop.eup %1532  ;;  %1540 = vpow2.f32 %v882_v6  ;;  %1441 = vmatpush3.bf16.msra.mxu1 %v1495_v56 }
 0x42a   : > { %v893_v62 = vsel %vm503_vm1, %v1909_v26, 0.0  ;;  %v1535_v63 = vpop.eup %1534  ;;  %1542 = vpow2.f32 %v878_v7 }
 0x42b   : > { %885 = vadd.xlane.f32.xlu0 %v884_v61  ;;  %894 = vadd.xlane.f32.xlu1 %v893_v62  ;;  %v887_v0 = vsel %vm503_vm1, %v1535_v63, 0.0 }
 0x42f   : > { %888 = vadd.xlane.f32.xlu1 %v887_v0 }
 0x431   : > { %v1915_v1 = vpop.eup %1536 }
 0x432   : > { %v902_v2 = vsel %vm503_vm1, %v1915_v1, 0.0  ;;  %v1919_v3 = vpop.eup %1538 }
 0x433   : > { %903 = vadd.xlane.f32.xlu0 %v902_v2  ;;  %v896_v23 = vsel %vm503_vm1, %v1919_v3, 0.0  ;;  %v1541_v8 = vpop.eup %1540 }
 0x434   : > { %v905_v9 = vsel %vm503_vm1, %v1541_v8, 0.0  ;;  %v1543_v10 = vpop.eup %1542 }
 0x437   : > { %897 = vadd.xlane.f32.xlu0 %v896_v23 }
 0x440   : > { %930 = vrot.lane.b32.xlu1 %v1806_v51, %s1584_s10  ;;  %v899_v51 = vsel %vm503_vm1, %v1543_v10, 0.0 }
 0x444   : > { %932 = vrot.lane.b32.xlu1 %v1811_v52, %s1584_s10 }
 0x44d   : > { %928 = vrot.lane.b32.xlu0 %v1799_v49, %s1584_s10 }
 0x468   : > { %906 = vadd.xlane.f32.xlu1 %v905_v9 }
 0x46c   : > { %900 = vadd.xlane.f32.xlu1 %v899_v51 }
 0x47d   : > { %934 = vrot.lane.b32.xlu1 %v1818_v53, %s1584_s10 }
 0x4b4   : > { %v892_v52 = vpop.xlane.xlu0 %891 }
 0x4b8   : > { %v895_v49 = vpop.xlane.xlu1 %894  ;;  %v886_v11 = vpop.xlane.xlu0 %885 }
 0x4b9   : > { %1544 = vrcp.f32 %v886_v11 }
 0x4bc   : > { %v889_v12 = vpop.xlane.xlu1 %888 }
 0x4bd   : > { %1546 = vrcp.f32 %v889_v12 }
 0x4be   : > { %1548 = vrcp.f32 %v895_v49 }
 0x4bf   : > { %1550 = vrcp.f32 %v892_v52 }
 0x4c0   : > { %v904_v13 = vpop.xlane.xlu0 %903  ;;  %v931_v20 = vpop.permute.xlu1 %930 }
 0x4c3   : > { %v1545_v15 = vpop.eup %1544 }
 0x4c4   : > { %v898_v14 = vpop.xlane.xlu0 %897  ;;  %v916_v24 = vmul.f32 %v1545_v15, %v1531_v19  ;;  %v933_v53 = vpop.permute.xlu1 %932 }
 0x4c7   : > { %v1547_v18 = vpop.eup %1546 }
 0x4c8   : > { %v929_v22 = vpop.permute.xlu0 %928  ;;  %v917_v28 = vmul.f32 %v1547_v18, %v1535_v63  ;;  %v1549_v31 = vpop.eup %1548 }
 0x4c9   : > { %1402 = vmatprep.subr.bf16.mxu0 %v929_v22  ;;  %v1551_v33 = vpop.eup %1550  ;;  %v919_v34 = vmul.f32 %v1549_v31, %v1909_v26 }
 0x4ca   : > { %1403 = vmatpush3.bf16.msra.mxu0 %v929_v22  ;;  %v924_v29 = vpack.c.bf16 %v917_v28, %v916_v24  ;;  %v918_v36 = vmul.f32 %v1551_v33, %v1905_v58 }
 0x4cb   : > { %1404 = vmatprep.subr.bf16.mxu0 %v931_v20 }
 0x4cc   : > { %1410 = vmatprep.mubr.msk.bf16.mxu0 %vm503_vm1, %v924_v29  ;;  %v925_v37 = vpack.c.bf16 %v919_v34, %v918_v36 }
 0x4ce   : > { %1405 = vmatpush3.bf16.msra.mxu0 %v931_v20 }
 0x4cf   : > { %1406 = vmatprep.subr.bf16.mxu0 %v933_v53 }
 0x4d2   : > { %1407 = vmatpush3.bf16.msra.mxu0 %v933_v53 }
 0x4f5   : > { %v907_v30 = vpop.xlane.xlu1 %906 }
 0x4f6   : > { %1552 = vrcp.f32 %v907_v30 }
 0x4f7   : > { %1554 = vrcp.f32 %v898_v14 }
 0x4f8   : > { %1556 = vrcp.f32 %v904_v13 }
 0x4f9   : > { %v901_v32 = vpop.xlane.xlu1 %900 }
 0x4fa   : > { %1558 = vrcp.f32 %v901_v32 }
 0x4fd   : > { %v935_v35 = vpop.permute.xlu1 %934 }
 0x4fe   : > { %1408 = vmatprep.subr.bf16.mxu0 %v935_v35 }
 0x4ff   : > { %1409 = vmatpush3.bf16.msra.mxu0 %v935_v35 }
 0x500   : > { %v1553_v38 = vpop.eup %1552  ;;  %1418 = vmatprep.subr.bf16.mxu0 %v1492_v48 }
 0x501   : > { %v1555_v39 = vpop.eup %1554  ;;  %v923_v42 = vmul.f32 %v1553_v38, %v1541_v8 }
 0x502   : > { %1411 = vmatmul.mubr.msk.bf16.vlgmr.msra.gmra.mrb[8].mxu0 %vm503_vm1, %v925_v37  ;;  %v1557_v40 = vpop.eup %1556  ;;  %v920_v43 = vmul.f32 %v1555_v39, %v1919_v3 }
 0x503   : > { %v922_v45 = vmul.f32 %v1557_v40, %v1915_v1  ;;  %1419 = vmatpush3.bf16.msra.mxu0 %v1492_v48 }
 0x504   : > { %v1559_v41 = vpop.eup %1558  ;;  %1420 = vmatprep.subr.bf16.mxu0 %v1493_v50 }
 0x505   : > { %v921_v44 = vmul.f32 %v1559_v41, %v1543_v10  ;;  %v927_v47 = vpack.c.bf16 %v923_v42, %v922_v45 }
 0x507   : > { %v926_v46 = vpack.c.bf16 %v921_v44, %v920_v43  ;;  %1421 = vmatpush3.bf16.msra.mxu0 %v1493_v50 }
 0x508   : > { %1422 = vmatprep.subr.bf16.mxu0 %v1494_v54 }
 0x509   : > { %1414 = vmatprep.mubr.msk.bf16.mxu0 %vm503_vm1, %v926_v46 }
 0x50a   : > { %1415 = vmatmul.mubr.msk.bf16.gmra.mrb[12].mxu0 %vm503_vm1, %v927_v47 }
 0x50b   : > { %1423 = vmatpush3.bf16.msra.mxu0 %v1494_v54 }
 0x50c   : > { %1424 = vmatprep.subr.bf16.mxu0 %v1495_v56 }
 0x50f   : > { %1425 = vmatpush3.bf16.msra.mxu0 %v1495_v56 }
 0x5d5   : > { %v1412_v55 = vpop.f32.mrb[8].mxu0 }
 0x5d6   : > { %v986_v17 = vpop.f32.mrb[9].mxu0 }
 0x5d7   : > { %v1413_v57 = vpop.f32.mrb[10].mxu0 }
 0x5d8   : > { %v1018_v21 = vpack.c.bf16 %v1413_v57, %v1412_v55  ;;  %v989_v58 = vpop.f32.mrb[11].mxu0 }
 0x5d9   : > { %v1017_v59 = vpack.c.bf16 %v989_v58, %v986_v17 }
 0x5db   : > { %1025 = vrot.lane.b32.xlu0 %v1017_v59, %s1585_s14 }
 0x5dd   : > { %v1416_v60 = vpop.f32.mrb[12].mxu0 }
 0x5de   : > { %v1002_v16 = vpop.f32.mrb[13].mxu0 }
 0x5df   : > { %1027 = vrot.lane.b32.xlu0 %v1018_v21, %s1585_s14  ;;  %v1417_v19 = vpop.f32.mrb[14].mxu0 }
 0x5e0   : > { %v1020_v26 = vpack.c.bf16 %v1417_v19, %v1416_v60  ;;  %v1005_v61 = vpop.f32.mrb[15].mxu0 }
 0x5e1   : > { %v1019_v62 = vpack.c.bf16 %v1005_v61, %v1002_v16 }
 0x5e3   : > { %1029 = vrot.lane.b32.xlu1 %v1019_v62, %s1585_s14 }
 0x5e7   : > { %1031 = vrot.lane.b32.xlu1 %v1020_v26, %s1585_s14 }
 0x64d   : > { %v1026_v63 = vpop.permute.xlu0 %1025 }
 0x64e   : > { %1038 = vst.msk [vmem:[#allocation2] sm:$0xff] %vm1037_vm2, %v1026_v63 }
 0x651   : > { %v1028_v0 = vpop.permute.xlu0 %1027 }
 0x652   : > { %1039 = vst.msk [vmem:[#allocation2 + $0x8] sm:$0xff] %vm1037_vm2, %v1028_v0 }
 0x655   : > { %v1030_v1 = vpop.permute.xlu1 %1029  ;;  %v1042_v2 = vld [vmem:[#allocation2] sm:$0xff] }
 0x656   : > { %1040 = vst.msk [vmem:[#allocation2 + $0x10] sm:$0xff] %vm1037_vm2, %v1030_v1  ;;  %1426 = vmatprep.mubr.msk.bf16.mxu0 %vm503_vm1, %v1042_v2 }
 0x659   : > { %v1032_v3 = vpop.permute.xlu1 %1031  ;;  %v1043_v23 = vld [vmem:[#allocation2 + $0x8] sm:$0xff] }
 0x65a   : > { %1041 = vst.msk [vmem:[#allocation2 + $0x18] sm:$0xff] %vm1037_vm2, %v1032_v3  ;;  %1427 = vmatmul.mubr.msk.bf16.vlgmr.msra.gmra.mrb[16].mxu0 %vm503_vm1, %v1043_v23 }
 0x65d   : > { %v1044_v4 = vld [vmem:[#allocation2 + $0x10] sm:$0xff] }
 0x65e   : > { %1430 = vmatprep.mubr.msk.bf16.mxu1 %vm503_vm1, %v1044_v4 }
 0x661   : > { %v1045_v25 = vld [vmem:[#allocation2 + $0x18] sm:$0xff] }
 0x662   : > { %1431 = vmatmul.mubr.msk.bf16.vlgmr.msra.gmra.mrb[16].mxu1 %vm503_vm1, %v1045_v25 }
 0x72d   : > { %v1428_v27 = vpop.f32.mrb[16].mxu0 }
 0x72e   : > { %v1140_v6 = vadd.f32 %v1428_v27, %v1300_v5  ;;  %v1131_v7 = vpop.f32.mrb[17].mxu0 }
 0x72f   : > { %v1132_v8 = vadd.f32 %v1300_v5, %v1131_v7  ;;  %v1429_v9 = vpop.f32.mrb[18].mxu0 }
 0x730   : > { %1164 = vst.msk [vmem:[%s339_s18 + $0x10] sm:$0xff] %vm397_vm0, %v1140_v6  ;;  %v1143_v10 = vadd.f32 %v1429_v9, %v1300_v5  ;;  %v1134_v51 = vpop.f32.mrb[19].mxu0 }
 0x731   : > { %1162 = vst.msk [vmem:[%s339_s18] sm:$0xff] %vm397_vm0, %v1132_v8  ;;  %v1135_v52 = vadd.f32 %v1300_v5, %v1134_v51 }
 0x732   : > { %1165 = vst.msk [vmem:[%s339_s18 + $0x18] sm:$0xff] %vm397_vm0, %v1143_v10 }
 0x733   : > { %1163 = vst.msk [vmem:[%s339_s18 + $0x8] sm:$0xff] %vm397_vm0, %v1135_v52 }
 0x735   : > { %v1432_v49 = vpop.f32.mrb[16].mxu1 }
 0x736   : > { %v1156_v11 = vadd.f32 %v1432_v49, %v1300_v5  ;;  %v1147_v12 = vpop.f32.mrb[17].mxu1 }
 0x737   : > { %v1148_v13 = vadd.f32 %v1300_v5, %v1147_v12  ;;  %v1433_v14 = vpop.f32.mrb[18].mxu1 }
 0x738   : > { %1168 = vst.msk [vmem:[%s339_s18 + $0x30] sm:$0xff] %vm397_vm0, %v1156_v11  ;;  %v1159_v15 = vadd.f32 %v1433_v14, %v1300_v5  ;;  %v1150_v18 = vpop.f32.mrb[19].mxu1 }
 0x739   : > { %1166 = vst.msk [vmem:[%s339_s18 + $0x20] sm:$0xff] %vm397_vm0, %v1148_v13  ;;  %v1151_v20 = vadd.f32 %v1300_v5, %v1150_v18 }
 0x73a   : > { %1169 = vst.msk [vmem:[%s339_s18 + $0x38] sm:$0xff] %vm397_vm0, %v1159_v15 }
 0x73b   : > { %1167 = vst.msk [vmem:[%s339_s18 + $0x28] sm:$0xff] %vm397_vm0, %v1151_v20 }
 0x73c PF: > { %p12_p9 = scmp.ge.s32.totalorder %s1633_s22, 4   ;;  %s1988_s18 = smov %s1578_s19 }
 0x73d   : > { %s1989_s19 = smov %s1642_s25  ;;  %s1990_s20 = smov %s1633_s22 }
 0x73e   :  { %14 = sbr.rel (!%p12_p9) target bundleno = 2 (0x2), region = 118 }

// kernel: chess_mha_forward.4
= control target key start
LH: loop header
LB: loop body
LE: loop exit
PB: predicated region body
PF: predicated region fallthrough
CT: control target
= control target key end

     0   :  { %14 = vsyncpa [#allocation4], 0  ;;  %s8936_s0 = inlined_call_operand.vmem [shape: bf16[2,2048], index: 0, kind: input, shape index: {}]   ;;  %s8937_s1 = inlined_call_operand.hbm [shape: bf16[2048,256], index: 1, kind: input, shape index: {}]   ;;  %s8938_s2 = inlined_call_operand.hbm [shape: f32[1,256], index: 2, kind: input, shape index: {}]   ;;  %s8939_s3 = inlined_call_operand.hbm [shape: f32[1,256], index: 3, kind: input, shape index: {}]   ;;  %s8940_s4 = inlined_call_operand.hbm [shape: f32[1,256], index: 4, kind: input, shape index: {}]   ;;  %s8941_s5 = inlined_call_operand.hbm [shape: bf16[256,512], index: 5, kind: input, shape index: {}]   ;;  %s8942_s6 = inlined_call_operand.hbm [shape: f32[1,512], index: 6, kind: input, shape index: {}]   ;;  %s8943_s7 = inlined_call_operand.hbm [shape: bf16[256,4096], index: 7, kind: input, shape index: {}]   ;;  %s8944_s8 = inlined_call_operand.hbm [shape: f32[1,4096], index: 8, kind: input, shape index: {}]   ;;  %s8945_s9 = inlined_call_operand.vmem [shape: f32[2,2,4096], index: 9, kind: output, shape index: {}]  }
   0x1   :  { %15 = vsyncpa [#allocation6], 0 }
   0x2   :  { %16 = vsyncpa [#allocation9], 0 }
   0x3   :  { %17 = vsyncpa [#allocation12], 0 }
   0x4   :  { %18 = vsyncpa [#allocation15], 0  ;;  %s8385_s30 = smov [#allocation5]   ;;  %s8386_s11 = smov [#allocation8]  }
   0x5   :  { %s39_s10 = sshll.u32 %s8385_s30, 4  ;;  %s59_s12 = sshll.u32 %s8386_s11, 4  ;;  %s40_s10 = int_to_ptr.vmem [resolvable:$true] %s39_s10  ;;  %s60_s12 = int_to_ptr.vmem [resolvable:$true] %s59_s12 }
   0x6   :  { %s8199_s15 = scalar_lea.hbm %s8938_s2, 32 }
   0x7   :  { %p8200_p0 = scmp.ne.s32.totalorder %s8938_s2, %s8199_s15  ;;  %p8203_p1 = scmp.lt.u32.totalorder %s8199_s15, %s8938_s2 }
   0x9   :  { %p8205_p2 = pnand %p8203_p1, %p8200_p0 }
   0xb   :  { %8208 = shalt.err (!%p8205_p2)
}
   0xc   :  { %s8209_s20 = scalar_lea.vmem %s40_s10, 32  ;;  %p8214_p4 = scmp.lt.s32.totalorder %s40_s10, %s40_s10 }
   0xd   :  { %p8210_p3 = scmp.ne.s32.totalorder %s40_s10, %s8209_s20  ;;  %p8215_p5 = scmp.lt.s32.totalorder %s8209_s20, %s8209_s20 }
   0xf   :  { %p8216_p6 = por %p8215_p5, %p8214_p4 }
  0x11   :  { %p8217_p7 = pnand %p8216_p6, %p8210_p3 }
  0x13   :  { %8220 = shalt.err (!%p8217_p7)
}
  0x14   :  { %42 = dma.hbm_to_vmem [thread:$0]  %s8938_s2, 32, %s40_s10, [#allocation6]  }
  0x15   :  { %s8221_s25 = scalar_lea.hbm %s8940_s4, 32 }
  0x16   :  { %p8222_p8 = scmp.ne.s32.totalorder %s8940_s4, %s8221_s25  ;;  %p8225_p9 = scmp.lt.u32.totalorder %s8221_s25, %s8940_s4 }
  0x18   :  { %p8227_p10 = pnand %p8225_p9, %p8222_p8 }
  0x1a   :  { %8230 = shalt.err (!%p8227_p10)
}
  0x1b   :  { %s8231_s30 = scalar_lea.vmem %s60_s12, 32  ;;  %p8236_p12 = scmp.lt.s32.totalorder %s60_s12, %s60_s12 }
  0x1c   :  { %p8232_p11 = scmp.ne.s32.totalorder %s60_s12, %s8231_s30  ;;  %p8237_p13 = scmp.lt.s32.totalorder %s8231_s30, %s8231_s30 }
  0x1e   :  { %p8238_p0 = por %p8237_p13, %p8236_p12 }
  0x20   :  { %p8239_p1 = pnand %p8238_p0, %p8232_p11 }
  0x22   :  { %8242 = shalt.err (!%p8239_p1)
}
  0x23   :  { %62 = dma.hbm_to_vmem [thread:$0]  %s8940_s4, 32, %s60_s12, [#allocation9]  }
  0x24   :  { %s8387_s11 = smov [#allocation11]   ;;  %s8388_s14 = smov [#allocation3]  }
  0x25   :  { %s81_s13 = sshll.u32 %s8387_s11, 4  ;;  %s26_s15 = sshll.u32 %s8388_s14, 4  ;;  %s82_s13 = int_to_ptr.vmem [resolvable:$true] %s81_s13  ;;  %s8474_s15 = int_to_ptr.vmem [resolvable:$true] %s26_s15 }
  0x26   :  { %s8243_s18 = scalar_lea.hbm %s8942_s6, 64 }
  0x27   :  { %p8244_p2 = scmp.ne.s32.totalorder %s8942_s6, %s8243_s18  ;;  %p8247_p3 = scmp.lt.u32.totalorder %s8243_s18, %s8942_s6 }
  0x29   :  { %p8249_p4 = pnand %p8247_p3, %p8244_p2 }
  0x2b   :  { %8252 = shalt.err (!%p8249_p4)
}
  0x2c   :  { %s8253_s4 = scalar_lea.vmem %s82_s13, 64  ;;  %p8258_p6 = scmp.lt.s32.totalorder %s82_s13, %s82_s13 }
  0x2d   :  { %p8254_p5 = scmp.ne.s32.totalorder %s82_s13, %s8253_s4  ;;  %p8259_p7 = scmp.lt.s32.totalorder %s8253_s4, %s8253_s4 }
  0x2f   :  { %p8260_p8 = por %p8259_p7, %p8258_p6 }
  0x31   :  { %p8261_p9 = pnand %p8260_p8, %p8254_p5 }
  0x33   :  { %8264 = shalt.err (!%p8261_p9)
}
  0x34   :  { %84 = dma.hbm_to_vmem [thread:$0]  %s8942_s6, 64, %s82_s13, [#allocation12]  }
  0x35   :  { %s8265_s26 = scalar_lea.hbm %s8937_s1, 32768 }
  0x36   :  { %p8266_p10 = scmp.ne.s32.totalorder %s8937_s1, %s8265_s26  ;;  %p8269_p11 = scmp.lt.u32.totalorder %s8265_s26, %s8937_s1 }
  0x38   :  { %p8271_p12 = pnand %p8269_p11, %p8266_p10 }
  0x3a   :  { %8274 = shalt.err (!%p8271_p12)
}
  0x3b   :  { %s8275_s2 = scalar_lea.vmem %s8474_s15, 32768  ;;  %p8280_p0 = scmp.lt.s32.totalorder %s8474_s15, %s8474_s15 }
  0x3c   :  { %p8276_p13 = scmp.ne.s32.totalorder %s8474_s15, %s8275_s2  ;;  %p8281_p1 = scmp.lt.s32.totalorder %s8275_s2, %s8275_s2 }
  0x3e   :  { %p8282_p2 = por %p8281_p1, %p8280_p0 }
  0x40   :  { %p8283_p3 = pnand %p8282_p2, %p8276_p13 }
  0x42   :  { %8286 = shalt.err (!%p8283_p3)
}
  0x43   :  { %s8389_s6 = smov 128   ;;  %s8390_s10 = smov 8  }
  0x44   :  { %32 = dma.hbm_to_vmem [thread:$0]  %s8937_s1, 32768, %s8474_s15, [#allocation4], %s8389_s6, %s8389_s6, %s8390_s10  }
  0x45   :  { %s8391_s14 = smov [#allocation7]   ;;  %s8392_s17 = smov [#allocation10]  }
  0x46   :  { %s49_s16 = sshll.u32 %s8391_s14, 4  ;;  %s68_s18 = sshll.u32 %s8392_s17, 4  ;;  %s50_s16 = int_to_ptr.vmem [resolvable:$true] %s49_s16  ;;  %s8507_s18 = int_to_ptr.vmem [resolvable:$true] %s68_s18 }
  0x47   :  { %s8287_s21 = scalar_lea.hbm %s8939_s3, 32 }
  0x48   :  { %p8288_p4 = scmp.ne.s32.totalorder %s8939_s3, %s8287_s21  ;;  %p8291_p5 = scmp.lt.u32.totalorder %s8287_s21, %s8939_s3 }
  0x4a   :  { %p8293_p6 = pnand %p8291_p5, %p8288_p4 }
  0x4c   :  { %8296 = shalt.err (!%p8293_p6)
}
  0x4d   :  { %s8297_s1 = scalar_lea.vmem %s50_s16, 32  ;;  %p8302_p8 = scmp.lt.s32.totalorder %s50_s16, %s50_s16 }
  0x4e   :  { %p8298_p7 = scmp.ne.s32.totalorder %s50_s16, %s8297_s1  ;;  %p8303_p9 = scmp.lt.s32.totalorder %s8297_s1, %s8297_s1 }
  0x50   :  { %p8304_p10 = por %p8303_p9, %p8302_p8 }
  0x52   :  { %p8305_p11 = pnand %p8304_p10, %p8298_p7 }
  0x54   :  { %8308 = shalt.err (!%p8305_p11)
}
  0x55   :  { %52 = dma.hbm_to_vmem [thread:$0]  %s8939_s3, 32, %s50_s16, [#allocation6]  }
  0x56   :  { %s8309_s27 = scalar_lea.hbm %s8941_s5, 8192 }
  0x57   :  { %p8310_p12 = scmp.ne.s32.totalorder %s8941_s5, %s8309_s27  ;;  %p8313_p13 = scmp.lt.u32.totalorder %s8309_s27, %s8941_s5 }
  0x59   :  { %p8315_p0 = pnand %p8313_p13, %p8310_p12 }
  0x5b   :  { %8318 = shalt.err (!%p8315_p0)
}
  0x5c   :  { %s8319_s10 = scalar_lea.vmem %s8507_s18, 8192  ;;  %p8324_p2 = scmp.lt.s32.totalorder %s8507_s18, %s8507_s18 }
  0x5d   :  { %p8320_p1 = scmp.ne.s32.totalorder %s8507_s18, %s8319_s10  ;;  %p8325_p3 = scmp.lt.s32.totalorder %s8319_s10, %s8319_s10 }
  0x5f   :  { %p8326_p4 = por %p8325_p3, %p8324_p2 }
  0x61   :  { %p8327_p5 = pnand %p8326_p4, %p8320_p1 }
  0x63   :  { %8330 = shalt.err (!%p8327_p5)
}
  0x64   :  { %s8393_s3 = smov 256   ;;  %s8394_s11 = smov 16  }
  0x65   :  { %74 = dma.hbm_to_vmem [thread:$0]  %s8941_s5, 8192, %s8507_s18, [#allocation9], %s8393_s3, %s8393_s3, %s8394_s11  }
  0x66   :  { %s8395_s16 = smov [#allocation13]   ;;  %s8396_s19 = smov [#allocation14]  }
  0x67   :  { %s90_s17 = sshll.u32 %s8395_s16, 4  ;;  %s103_s20 = sshll.u32 %s8396_s19, 4  ;;  %s91_s17 = int_to_ptr.vmem [resolvable:$true] %s90_s17  ;;  %s104_s20 = int_to_ptr.vmem [resolvable:$true] %s103_s20 }
  0x68   :  { %s8331_s4 = scalar_lea.hbm %s8943_s7, 65536 }
  0x69   :  { %p8332_p6 = scmp.ne.s32.totalorder %s8943_s7, %s8331_s4  ;;  %p8335_p7 = scmp.lt.u32.totalorder %s8331_s4, %s8943_s7 }
  0x6b   :  { %p8337_p8 = pnand %p8335_p7, %p8332_p6 }
  0x6d   :  { %8340 = shalt.err (!%p8337_p8)
}
  0x6e   :  { %s8341_s5 = scalar_lea.vmem %s91_s17, 65536  ;;  %p8346_p10 = scmp.lt.s32.totalorder %s91_s17, %s91_s17 }
  0x6f   :  { %p8342_p9 = scmp.ne.s32.totalorder %s91_s17, %s8341_s5  ;;  %p8347_p11 = scmp.lt.s32.totalorder %s8341_s5, %s8341_s5 }
  0x71   :  { %p8348_p12 = por %p8347_p11, %p8346_p10 }
  0x73   :  { %p8349_p13 = pnand %p8348_p12, %p8342_p9 }
  0x75   :  { %8352 = shalt.err (!%p8349_p13)
}
  0x76   :  { %s8397_s18 = smov 2048   ;;  %s8353_s28 = scalar_lea.hbm %s8944_s8, 512 }
  0x77   :  { %96 = dma.hbm_to_vmem [thread:$0]  %s8943_s7, 65536, %s91_s17, [#allocation12], %s8397_s18, %s8397_s18, %s8389_s6  }
  0x78   :  { %p8354_p0 = scmp.ne.s32.totalorder %s8944_s8, %s8353_s28  ;;  %p8357_p1 = scmp.lt.u32.totalorder %s8353_s28, %s8944_s8 }
  0x7a   :  { %p8359_p2 = pnand %p8357_p1, %p8354_p0 }
  0x7c   :  { %8362 = shalt.err (!%p8359_p2)
}
  0x7d   :  { %s8363_s3 = scalar_lea.vmem %s104_s20, 512  ;;  %p8368_p4 = scmp.lt.s32.totalorder %s104_s20, %s104_s20 }
  0x7e   :  { %p8364_p3 = scmp.ne.s32.totalorder %s104_s20, %s8363_s3  ;;  %p8369_p5 = scmp.lt.s32.totalorder %s8363_s3, %s8363_s3 }
  0x80   :  { %p8370_p6 = por %p8369_p5, %p8368_p4 }
  0x82   :  { %p8371_p7 = pnand %p8370_p6, %p8364_p3 }
  0x84   :  { %8374 = shalt.err (!%p8371_p7)
}
  0x85   :  { %106 = dma.hbm_to_vmem [thread:$0]  %s8944_s8, 512, %s104_s20, [#allocation15]  }
  0x86   :  { %8375 = dma.done.wait [#allocation4], 32768  }
  0x87   :  { %8376 = vsyncadd [#allocation4], 4294934528 }
  0x88   :  { %8377 = dma.done.wait [#allocation6], 64  }
  0x89   :  { %8378 = vsyncadd [#allocation6], 4294967232 }
  0x8a   :  { %8379 = dma.done.wait [#allocation9], 8224  }
  0x8b   :  { %8380 = vsyncadd [#allocation9], 4294959072 }
  0x8c   :  { %8381 = dma.done.wait [#allocation12], 65600  }
  0x8d   :  { %8382 = vsyncadd [#allocation12], 4294901696 }
  0x8e   :  { %8383 = dma.done.wait [#allocation15], 512  }
  0x8f   :  { %8384 = vsyncadd [#allocation15], 4294966784  ;;  %v7711_v0 = vld [vmem:[#allocation3 + $0x4] ss:$8 sps:$4 sm:$0xff]   ;;  %v7713_v1 = vld [vmem:[#allocation3] ss:$8 sps:$4 sm:$0xff]   ;;  %v391_v7 = vlaneseq }
  0x90   :  { %1797 = vmatprep.subr.bf16.mxu0 %v7711_v0  ;;  %v7714_v2 = vld [vmem:[#allocation3 + $0x14] ss:$8 sps:$4 sm:$0xff]   ;;  %v7716_v3 = vld [vmem:[#allocation3 + $0x10] ss:$8 sps:$4 sm:$0xff]   ;;  %v7717_v4 = vld [vmem:[#allocation3 + $0x24] ss:$8 sps:$4 sm:$0xff]  }
  0x91   :  { %1798 = vmatpush1.bf16.msra.mxu0 %v7713_v1  ;;  %v7719_v5 = vld [vmem:[#allocation3 + $0x20] ss:$8 sps:$4 sm:$0xff]   ;;  %v7720_v6 = vld [vmem:[#allocation3 + $0x34] ss:$8 sps:$4 sm:$0xff]   ;;  %v8398_v8 = vmov 1966171168  }
  0x92   :  { %1799 = vmatprep.subr.bf16.mxu0 %v7714_v2  ;;  %v405_v9 = vunpack.c.l.s4 %v8398_v8  ;;  %v7722_v10 = vld [vmem:[#allocation3 + $0x30] ss:$8 sps:$4 sm:$0xff]   ;;  %v7723_v11 = vld [vmem:[#allocation3 + $0x44] ss:$8 sps:$4 sm:$0xff]   ;;  %v8563_v12 = vshrl.u32 %v391_v7, 7  ;;  %v8571_v19 = vld [vmem:[%s8936_s0] sm:$0xff] }
  0x93   :  { %v7725_v14 = vld [vmem:[#allocation3 + $0x40] ss:$8 sps:$4 sm:$0xff]   ;;  %v7726_v15 = vld [vmem:[#allocation3 + $0x54] ss:$8 sps:$4 sm:$0xff]   ;;  %v7728_v17 = vld [vmem:[#allocation3 + $0x50] ss:$8 sps:$4 sm:$0xff]   ;;  %v403_v7 = vcombine.high %v8571_v19, %v8571_v19 }
  0x94   :  { %v406_v13 = vunpack.c.0.s8 %v405_v9  ;;  %v7729_v18 = vld [vmem:[#allocation3 + $0x64] ss:$8 sps:$4 sm:$0xff]   ;;  %v7731_v21 = vld [vmem:[#allocation3 + $0x60] ss:$8 sps:$4 sm:$0xff]   ;;  %v7732_v22 = vld [vmem:[#allocation3 + $0x74] ss:$8 sps:$4 sm:$0xff]  }
  0x95   :  { %1800 = vmatpush1.bf16.msra.mxu0 %v7716_v3  ;;  %v7734_v25 = vld [vmem:[#allocation3 + $0x70] ss:$8 sps:$4 sm:$0xff]   ;;  %v7735_v26 = vld [vmem:[#allocation3 + $0x84] ss:$8 sps:$4 sm:$0xff]   ;;  %v7737_v27 = vld [vmem:[#allocation3 + $0x80] ss:$8 sps:$4 sm:$0xff]  }
  0x96   :  { %1801 = vmatprep.subr.bf16.mxu0 %v7717_v4  ;;  %v8566_v16 = vsub.s32 %v406_v13, %v8563_v12  ;;  %v7738_v28 = vld [vmem:[#allocation3 + $0x94] ss:$8 sps:$4 sm:$0xff]   ;;  %v7740_v29 = vld [vmem:[#allocation3 + $0x90] ss:$8 sps:$4 sm:$0xff]   ;;  %v7741_v30 = vld [vmem:[#allocation3 + $0xa4] ss:$8 sps:$4 sm:$0xff]  }
  0x97   :  { %v7743_v31 = vld [vmem:[#allocation3 + $0xa0] ss:$8 sps:$4 sm:$0xff]   ;;  %v7744_v32 = vld [vmem:[#allocation3 + $0xb4] ss:$8 sps:$4 sm:$0xff]   ;;  %v7746_v33 = vld [vmem:[#allocation3 + $0xb0] ss:$8 sps:$4 sm:$0xff]  }
  0x98   :  { %v410_v20 = vrot.slane %v8571_v19, %v8566_v16  ;;  %v7747_v34 = vld [vmem:[#allocation3 + $0xc4] ss:$8 sps:$4 sm:$0xff]   ;;  %v7749_v35 = vld [vmem:[#allocation3 + $0xc0] ss:$8 sps:$4 sm:$0xff]   ;;  %v7750_v36 = vld [vmem:[#allocation3 + $0xd4] ss:$8 sps:$4 sm:$0xff]   ;;  %v8583_v13 = vrot.slane %v403_v7, %v8566_v16 }
  0x99   :  { %1802 = vmatpush1.bf16.msra.mxu0 %v7719_v5  ;;  %v7752_v37 = vld [vmem:[#allocation3 + $0xd0] ss:$8 sps:$4 sm:$0xff]   ;;  %v7753_v38 = vld [vmem:[#allocation3 + $0xe4] ss:$8 sps:$4 sm:$0xff]   ;;  %v7755_v39 = vld [vmem:[#allocation3 + $0xe0] ss:$8 sps:$4 sm:$0xff]  }
  0x9a   :  { %1803 = vmatprep.subr.bf16.mxu0 %v7720_v6  ;;  %v418_v23 = vcombine.high %v410_v20, %v410_v20  ;;  %v7756_v40 = vld [vmem:[#allocation3 + $0xf4] ss:$8 sps:$4 sm:$0xff]   ;;  %v7758_v41 = vld [vmem:[#allocation3 + $0xf0] ss:$8 sps:$4 sm:$0xff]   ;;  %v7762_v42 = vld [vmem:[#allocation3 + $0x104] ss:$8 sps:$4 sm:$0xff]   ;;  %v8577_v43 = vrot.slane %v410_v20, %v8566_v16 }
  0x9b   :  { %v7760_v45 = vld [vmem:[#allocation3 + $0x100] ss:$8 sps:$4 sm:$0xff]   ;;  %v7765_v46 = vld [vmem:[#allocation3 + $0x114] ss:$8 sps:$4 sm:$0xff]   ;;  %v7763_v47 = vld [vmem:[#allocation3 + $0x110] ss:$8 sps:$4 sm:$0xff]  }
  0x9c   :  { %v440_v24 = vrot.slane %v418_v23, %v8566_v16  ;;  %v7768_v48 = vld [vmem:[#allocation3 + $0x124] ss:$8 sps:$4 sm:$0xff]   ;;  %v7766_v49 = vld [vmem:[#allocation3 + $0x120] ss:$8 sps:$4 sm:$0xff]   ;;  %v7771_v50 = vld [vmem:[#allocation3 + $0x134] ss:$8 sps:$4 sm:$0xff]  }
  0x9d   :  { %1804 = vmatpush1.bf16.msra.mxu0 %v7722_v10  ;;  %v7769_v51 = vld [vmem:[#allocation3 + $0x130] ss:$8 sps:$4 sm:$0xff]   ;;  %v7774_v52 = vld [vmem:[#allocation3 + $0x144] ss:$8 sps:$4 sm:$0xff]   ;;  %v7772_v53 = vld [vmem:[#allocation3 + $0x140] ss:$8 sps:$4 sm:$0xff]  }
  0x9e   :  { %1805 = vmatprep.subr.bf16.mxu0 %v7723_v11  ;;  %1829 = vmatprep.mubr.bf16.mxu0 %v440_v24  ;;  %v450_v44 = vcombine.high %v440_v24, %v440_v24  ;;  %v7777_v54 = vld [vmem:[#allocation3 + $0x154] ss:$8 sps:$4 sm:$0xff]   ;;  %v7775_v55 = vld [vmem:[#allocation3 + $0x150] ss:$8 sps:$4 sm:$0xff]   ;;  %v7780_v56 = vld [vmem:[#allocation3 + $0x164] ss:$8 sps:$4 sm:$0xff]  }
  0x9f   :  { %v7778_v57 = vld [vmem:[#allocation3 + $0x160] ss:$8 sps:$4 sm:$0xff]   ;;  %v7783_v58 = vld [vmem:[#allocation3 + $0x174] ss:$8 sps:$4 sm:$0xff]   ;;  %v7781_v59 = vld [vmem:[#allocation3 + $0x170] ss:$8 sps:$4 sm:$0xff]  }
  0xa0   :  { %v7786_v60 = vld [vmem:[#allocation3 + $0x184] ss:$8 sps:$4 sm:$0xff]   ;;  %v7784_v61 = vld [vmem:[#allocation3 + $0x180] ss:$8 sps:$4 sm:$0xff]   ;;  %v7789_v62 = vld [vmem:[#allocation3 + $0x194] ss:$8 sps:$4 sm:$0xff]  }
  0xa1   :  { %1806 = vmatpush1.bf16.msra.mxu0 %v7725_v14  ;;  %v7787_v63 = vld [vmem:[#allocation3 + $0x190] ss:$8 sps:$4 sm:$0xff]   ;;  %v7792_v0 = vld [vmem:[#allocation3 + $0x1a4] ss:$8 sps:$4 sm:$0xff]   ;;  %v7790_v1 = vld [vmem:[#allocation3 + $0x1a0] ss:$8 sps:$4 sm:$0xff]  }
  0xa2   :  { %1807 = vmatprep.subr.bf16.mxu0 %v7726_v15  ;;  %v7795_v2 = vld [vmem:[#allocation3 + $0x1b4] ss:$8 sps:$4 sm:$0xff]   ;;  %v7793_v3 = vld [vmem:[#allocation3 + $0x1b0] ss:$8 sps:$4 sm:$0xff]   ;;  %v7798_v4 = vld [vmem:[#allocation3 + $0x1c4] ss:$8 sps:$4 sm:$0xff]  }
  0xa3   :  { %v7796_v5 = vld [vmem:[#allocation3 + $0x1c0] ss:$8 sps:$4 sm:$0xff]   ;;  %v7801_v6 = vld [vmem:[#allocation3 + $0x1d4] ss:$8 sps:$4 sm:$0xff]   ;;  %v7799_v8 = vld [vmem:[#allocation3 + $0x1d0] ss:$8 sps:$4 sm:$0xff]  }
  0xa4   :  { %v7804_v9 = vld [vmem:[#allocation3 + $0x1e4] ss:$8 sps:$4 sm:$0xff]   ;;  %v7802_v10 = vld [vmem:[#allocation3 + $0x1e0] ss:$8 sps:$4 sm:$0xff]   ;;  %v7807_v11 = vld [vmem:[#allocation3 + $0x1f4] ss:$8 sps:$4 sm:$0xff]  }
  0xa5   :  { %1808 = vmatpush1.bf16.msra.mxu0 %v7728_v17  ;;  %v7805_v14 = vld [vmem:[#allocation3 + $0x1f0] ss:$8 sps:$4 sm:$0xff]   ;;  %v7810_v15 = vld [vmem:[#allocation3 + $0x204] ss:$8 sps:$4 sm:$0xff]   ;;  %v419_v17 = vcombine.high %v8583_v13, %v8583_v13  ;;  %v7808_v19 = vld [vmem:[#allocation3 + $0x200] ss:$8 sps:$4 sm:$0xff]  }
  0xa6   :  { %1809 = vmatprep.subr.bf16.mxu0 %v7729_v18  ;;  %v448_v18 = vcombine.high %v8577_v43, %v8577_v43  ;;  %v7813_v20 = vld [vmem:[#allocation3 + $0x214] ss:$8 sps:$4 sm:$0xff]   ;;  %v7816_v23 = vld [vmem:[#allocation3 + $0x224] ss:$8 sps:$4 sm:$0xff]   ;;  %v7814_v24 = vld [vmem:[#allocation3 + $0x220] ss:$8 sps:$4 sm:$0xff]  }
  0xa7   :  { %v7885_v7 = vld [vmem:[#allocation3 + $0x394] ss:$8 sps:$4 sm:$0xff]   ;;  %vm2127_vm0 = vcmask 1041408  }
  0xa9   :  { %1810 = vmatpush1.bf16.msra.mxu0 %v7731_v21  ;;  %v8590_v21 = vrot.slane %v419_v17, %v8566_v16  ;;  %v7897_v17 = vld [vmem:[#allocation3 + $0x3d4] ss:$8 sps:$4 sm:$0xff]  }
  0xaa   :  { %1811 = vmatprep.subr.bf16.mxu0 %v7732_v22  ;;  %v7811_v22 = vld [vmem:[#allocation3 + $0x210] ss:$8 sps:$4 sm:$0xff]  }
  0xad   :  { %1812 = vmatpush1.bf16.msra.mxu0 %v7734_v25  ;;  %v7819_v25 = vld [vmem:[#allocation3 + $0x234] ss:$8 sps:$4 sm:$0xff]  }
  0xae   :  { %1813 = vmatprep.subr.bf16.mxu0 %v7735_v26  ;;  %v7817_v26 = vld [vmem:[#allocation3 + $0x230] ss:$8 sps:$4 sm:$0xff]  }
  0xb1   :  { %1814 = vmatpush1.bf16.msra.mxu0 %v7737_v27  ;;  %v7822_v27 = vld [vmem:[#allocation3 + $0x244] ss:$8 sps:$4 sm:$0xff]  }
  0xb2   :  { %1815 = vmatprep.subr.bf16.mxu0 %v7738_v28  ;;  %v7820_v28 = vld [vmem:[#allocation3 + $0x240] ss:$8 sps:$4 sm:$0xff]  }
  0xb5   :  { %1816 = vmatpush1.bf16.msra.mxu0 %v7740_v29  ;;  %v7825_v29 = vld [vmem:[#allocation3 + $0x254] ss:$8 sps:$4 sm:$0xff]  }
  0xb6   :  { %1817 = vmatprep.subr.bf16.mxu0 %v7741_v30  ;;  %v7823_v30 = vld [vmem:[#allocation3 + $0x250] ss:$8 sps:$4 sm:$0xff]  }
  0xb9   :  { %1818 = vmatpush1.bf16.msra.mxu0 %v7743_v31  ;;  %v7828_v31 = vld [vmem:[#allocation3 + $0x264] ss:$8 sps:$4 sm:$0xff]  }
  0xba   :  { %1819 = vmatprep.subr.bf16.mxu0 %v7744_v32  ;;  %v7826_v32 = vld [vmem:[#allocation3 + $0x260] ss:$8 sps:$4 sm:$0xff]  }
  0xbd   :  { %1820 = vmatpush1.bf16.msra.mxu0 %v7746_v33  ;;  %v7831_v33 = vld [vmem:[#allocation3 + $0x274] ss:$8 sps:$4 sm:$0xff]  }
  0xbe   :  { %1821 = vmatprep.subr.bf16.mxu0 %v7747_v34  ;;  %v7829_v34 = vld [vmem:[#allocation3 + $0x270] ss:$8 sps:$4 sm:$0xff]  }
  0xc1   :  { %1822 = vmatpush1.bf16.msra.mxu0 %v7749_v35  ;;  %v7834_v35 = vld [vmem:[#allocation3 + $0x284] ss:$8 sps:$4 sm:$0xff]  }
  0xc2   :  { %1823 = vmatprep.subr.bf16.mxu0 %v7750_v36  ;;  %v7832_v36 = vld [vmem:[#allocation3 + $0x280] ss:$8 sps:$4 sm:$0xff]  }
  0xc5   :  { %1824 = vmatpush1.bf16.msra.mxu0 %v7752_v37  ;;  %v7837_v37 = vld [vmem:[#allocation3 + $0x294] ss:$8 sps:$4 sm:$0xff]  }
  0xc6   :  { %1825 = vmatprep.subr.bf16.mxu0 %v7753_v38  ;;  %v7835_v38 = vld [vmem:[#allocation3 + $0x290] ss:$8 sps:$4 sm:$0xff]  }
  0xc9   :  { %1826 = vmatpush1.bf16.msra.mxu0 %v7755_v39  ;;  %v7840_v39 = vld [vmem:[#allocation3 + $0x2a4] ss:$8 sps:$4 sm:$0xff]  }
  0xca   :  { %1827 = vmatprep.subr.bf16.mxu0 %v7756_v40  ;;  %v7838_v40 = vld [vmem:[#allocation3 + $0x2a0] ss:$8 sps:$4 sm:$0xff]  }
  0xcd   :  { %1828 = vmatpush1.bf16.msra.mxu0 %v7758_v41  ;;  %v7843_v41 = vld [vmem:[#allocation3 + $0x2b4] ss:$8 sps:$4 sm:$0xff]  }
  0xce   :  { %1838 = vmatprep.subr.bf16.mxu0 %v7762_v42  ;;  %v7841_v42 = vld [vmem:[#allocation3 + $0x2b0] ss:$8 sps:$4 sm:$0xff]  }
  0xd0   :  { %1830 = vmatmul.mubr.bf16.vlgmr.msra.gmra.mrb[0].mxu0 %v8577_v43  ;;  %v7846_v43 = vld [vmem:[#allocation3 + $0x2c4] ss:$8 sps:$4 sm:$0xff]  }
  0xd1   :  { %1839 = vmatpush1.bf16.msra.mxu0 %v7760_v45  ;;  %1870 = vmatprep.mubr.bf16.mxu0 %v450_v44  ;;  %v7844_v44 = vld [vmem:[#allocation3 + $0x2c0] ss:$8 sps:$4 sm:$0xff]   ;;  %v7849_v45 = vld [vmem:[#allocation3 + $0x2d4] ss:$8 sps:$4 sm:$0xff]  }
  0xd2   :  { %1840 = vmatprep.subr.bf16.mxu0 %v7765_v46  ;;  %v7847_v46 = vld [vmem:[#allocation3 + $0x2d0] ss:$8 sps:$4 sm:$0xff]  }
  0xd5   :  { %1841 = vmatpush1.bf16.msra.mxu0 %v7763_v47  ;;  %v7852_v47 = vld [vmem:[#allocation3 + $0x2e4] ss:$8 sps:$4 sm:$0xff]  }
  0xd6   :  { %1842 = vmatprep.subr.bf16.mxu0 %v7768_v48  ;;  %v7850_v48 = vld [vmem:[#allocation3 + $0x2e0] ss:$8 sps:$4 sm:$0xff]  }
  0xd9   :  { %1843 = vmatpush1.bf16.msra.mxu0 %v7766_v49  ;;  %v7855_v49 = vld [vmem:[#allocation3 + $0x2f4] ss:$8 sps:$4 sm:$0xff]  }
  0xda   :  { %1844 = vmatprep.subr.bf16.mxu0 %v7771_v50  ;;  %v7853_v50 = vld [vmem:[#allocation3 + $0x2f0] ss:$8 sps:$4 sm:$0xff]  }
  0xdd   :  { %1845 = vmatpush1.bf16.msra.mxu0 %v7769_v51  ;;  %v7858_v51 = vld [vmem:[#allocation3 + $0x304] ss:$8 sps:$4 sm:$0xff]  }
  0xde   :  { %1846 = vmatprep.subr.bf16.mxu0 %v7774_v52  ;;  %v8595_v52 = vrot.slane %v8583_v13, %v8566_v16  ;;  %v7889_v13 = vld [vmem:[#allocation3 + $0x3b0] ss:$8 sps:$4 sm:$0xff]  }
  0xe1   :  { %1847 = vmatpush1.bf16.msra.mxu0 %v7772_v53  ;;  %v7856_v53 = vld [vmem:[#allocation3 + $0x300] ss:$8 sps:$4 sm:$0xff]  }
  0xe2   :  { %1848 = vmatprep.subr.bf16.mxu0 %v7777_v54  ;;  %v451_v54 = vcombine.high %v8590_v21, %v8590_v21 }
  0xe5   :  { %1849 = vmatpush1.bf16.msra.mxu0 %v7775_v55  ;;  %v7861_v55 = vld [vmem:[#allocation3 + $0x314] ss:$8 sps:$4 sm:$0xff]  }
  0xe6   :  { %1850 = vmatprep.subr.bf16.mxu0 %v7780_v56  ;;  %v7859_v56 = vld [vmem:[#allocation3 + $0x310] ss:$8 sps:$4 sm:$0xff]  }
  0xe9   :  { %1851 = vmatpush1.bf16.msra.mxu0 %v7778_v57  ;;  %v7864_v57 = vld [vmem:[#allocation3 + $0x324] ss:$8 sps:$4 sm:$0xff]  }
  0xea   :  { %1852 = vmatprep.subr.bf16.mxu0 %v7783_v58  ;;  %v7862_v58 = vld [vmem:[#allocation3 + $0x320] ss:$8 sps:$4 sm:$0xff]  }
  0xed   :  { %1853 = vmatpush1.bf16.msra.mxu0 %v7781_v59  ;;  %v7867_v59 = vld [vmem:[#allocation3 + $0x334] ss:$8 sps:$4 sm:$0xff]  }
  0xee   :  { %1854 = vmatprep.subr.bf16.mxu0 %v7786_v60  ;;  %v7865_v60 = vld [vmem:[#allocation3 + $0x330] ss:$8 sps:$4 sm:$0xff]  }
  0xf1   :  { %1855 = vmatpush1.bf16.msra.mxu0 %v7784_v61  ;;  %v7870_v61 = vld [vmem:[#allocation3 + $0x344] ss:$8 sps:$4 sm:$0xff]  }
  0xf2   :  { %1856 = vmatprep.subr.bf16.mxu0 %v7789_v62  ;;  %v7868_v62 = vld [vmem:[#allocation3 + $0x340] ss:$8 sps:$4 sm:$0xff]  }
  0xf5   :  { %1857 = vmatpush1.bf16.msra.mxu0 %v7787_v63  ;;  %v7873_v63 = vld [vmem:[#allocation3 + $0x354] ss:$8 sps:$4 sm:$0xff]  }
  0xf6   :  { %1858 = vmatprep.subr.bf16.mxu0 %v7792_v0  ;;  %v7871_v0 = vld [vmem:[#allocation3 + $0x350] ss:$8 sps:$4 sm:$0xff]  }
  0xf9   :  { %1859 = vmatpush1.bf16.msra.mxu0 %v7790_v1  ;;  %v7876_v1 = vld [vmem:[#allocation3 + $0x364] ss:$8 sps:$4 sm:$0xff]  }
  0xfa   :  { %1860 = vmatprep.subr.bf16.mxu0 %v7795_v2  ;;  %v7874_v2 = vld [vmem:[#allocation3 + $0x360] ss:$8 sps:$4 sm:$0xff]  }
  0xfd   :  { %1861 = vmatpush1.bf16.msra.mxu0 %v7793_v3  ;;  %v7879_v3 = vld [vmem:[#allocation3 + $0x374] ss:$8 sps:$4 sm:$0xff]  }
  0xfe   :  { %1862 = vmatprep.subr.bf16.mxu0 %v7798_v4  ;;  %v7877_v4 = vld [vmem:[#allocation3 + $0x370] ss:$8 sps:$4 sm:$0xff]  }
 0x101   :  { %1863 = vmatpush1.bf16.msra.mxu0 %v7796_v5  ;;  %v7882_v5 = vld [vmem:[#allocation3 + $0x384] ss:$8 sps:$4 sm:$0xff]  }
 0x102   :  { %1864 = vmatprep.subr.bf16.mxu0 %v7801_v6  ;;  %v7880_v6 = vld [vmem:[#allocation3 + $0x380] ss:$8 sps:$4 sm:$0xff]  }
 0x105   :  { %1865 = vmatpush1.bf16.msra.mxu0 %v7799_v8  ;;  %v7883_v8 = vld [vmem:[#allocation3 + $0x390] ss:$8 sps:$4 sm:$0xff]  }
 0x106   :  { %1866 = vmatprep.subr.bf16.mxu0 %v7804_v9  ;;  %v7888_v9 = vld [vmem:[#allocation3 + $0x3a4] ss:$8 sps:$4 sm:$0xff]  }
 0x109   :  { %1867 = vmatpush1.bf16.msra.mxu0 %v7802_v10  ;;  %v7886_v10 = vld [vmem:[#allocation3 + $0x3a0] ss:$8 sps:$4 sm:$0xff]  }
 0x10a   :  { %1868 = vmatprep.subr.bf16.mxu0 %v7807_v11  ;;  %v7891_v11 = vld [vmem:[#allocation3 + $0x3b4] ss:$8 sps:$4 sm:$0xff]  }
 0x10d   :  { %1869 = vmatpush1.bf16.msra.mxu0 %v7805_v14  ;;  %v7894_v14 = vld [vmem:[#allocation3 + $0x3c4] ss:$8 sps:$4 sm:$0xff]  }
 0x10e   :  { %1879 = vmatprep.subr.bf16.mxu0 %v7810_v15  ;;  %v7892_v15 = vld [vmem:[#allocation3 + $0x3c0] ss:$8 sps:$4 sm:$0xff]  }
 0x110   :  { %1871 = vmatmul.mubr.bf16.vlgmr.msra.gmra.mrb[0].mxu0 %v448_v18  ;;  %v7895_v18 = vld [vmem:[#allocation3 + $0x3d0] ss:$8 sps:$4 sm:$0xff]  }
 0x111   :  { %1880 = vmatpush1.bf16.msra.mxu0 %v7808_v19  ;;  %1911 = vmatprep.mubr.bf16.mxu0 %v8590_v21  ;;  %v7900_v19 = vld [vmem:[#allocation3 + $0x3e4] ss:$8 sps:$4 sm:$0xff]   ;;  %v7898_v21 = vld [vmem:[#allocation3 + $0x3e0] ss:$8 sps:$4 sm:$0xff]  }
 0x112   :  { %1881 = vmatprep.subr.bf16.mxu0 %v7813_v20  ;;  %v8603_v20 = vld [vmem:[%s8936_s0 + $0x8] sm:$0xff] }
 0x115   :  { %1882 = vmatpush1.bf16.msra.mxu0 %v7811_v22  ;;  %v8607_v22 = vrot.slane %v8603_v20, %v8566_v16 }
 0x116   :  { %1883 = vmatprep.subr.bf16.mxu0 %v7816_v23  ;;  %v7903_v23 = vld [vmem:[#allocation3 + $0x3f4] ss:$8 sps:$4 sm:$0xff]  }
 0x119   :  { %1884 = vmatpush1.bf16.msra.mxu0 %v7814_v24  ;;  %v7901_v24 = vld [vmem:[#allocation3 + $0x3f0] ss:$8 sps:$4 sm:$0xff]  }
 0x11a   :  { %1885 = vmatprep.subr.bf16.mxu0 %v7819_v25  ;;  %v467_v25 = vcombine.high %v8607_v22, %v8607_v22 }
 0x11d   :  { %1886 = vmatpush1.bf16.msra.mxu0 %v7817_v26  ;;  %v7906_v26 = vld [vmem:[#allocation3 + $0x404] ss:$8 sps:$4 sm:$0xff]  }
 0x11e   :  { %1887 = vmatprep.subr.bf16.mxu0 %v7822_v27  ;;  %v449_v27 = vcombine.high %v8595_v52, %v8595_v52 }
 0x121   :  { %1888 = vmatpush1.bf16.msra.mxu0 %v7820_v28  ;;  %v7904_v28 = vld [vmem:[#allocation3 + $0x400] ss:$8 sps:$4 sm:$0xff]  }
 0x122   :  { %1889 = vmatprep.subr.bf16.mxu0 %v7825_v29  ;;  %v8614_v29 = vrot.slane %v467_v25, %v8566_v16  ;;  %v7990_v25 = vld [vmem:[#allocation3 + $0x5c4] ss:$8 sps:$4 sm:$0xff]  }
 0x125   :  { %1890 = vmatpush1.bf16.msra.mxu0 %v7823_v30  ;;  %v7909_v30 = vld [vmem:[#allocation3 + $0x414] ss:$8 sps:$4 sm:$0xff]  }
 0x126   :  { %1891 = vmatprep.subr.bf16.mxu0 %v7828_v31  ;;  %v7907_v31 = vld [vmem:[#allocation3 + $0x410] ss:$8 sps:$4 sm:$0xff]  }
 0x129   :  { %1892 = vmatpush1.bf16.msra.mxu0 %v7826_v32  ;;  %v7912_v32 = vld [vmem:[#allocation3 + $0x424] ss:$8 sps:$4 sm:$0xff]  }
 0x12a   :  { %1893 = vmatprep.subr.bf16.mxu0 %v7831_v33  ;;  %v7910_v33 = vld [vmem:[#allocation3 + $0x420] ss:$8 sps:$4 sm:$0xff]  }
 0x12d   :  { %1894 = vmatpush1.bf16.msra.mxu0 %v7829_v34  ;;  %v7915_v34 = vld [vmem:[#allocation3 + $0x434] ss:$8 sps:$4 sm:$0xff]  }
 0x12e   :  { %1895 = vmatprep.subr.bf16.mxu0 %v7834_v35  ;;  %v7913_v35 = vld [vmem:[#allocation3 + $0x430] ss:$8 sps:$4 sm:$0xff]  }
 0x131   :  { %1896 = vmatpush1.bf16.msra.mxu0 %v7832_v36  ;;  %v7918_v36 = vld [vmem:[#allocation3 + $0x444] ss:$8 sps:$4 sm:$0xff]  }
 0x132   :  { %1897 = vmatprep.subr.bf16.mxu0 %v7837_v37  ;;  %v7916_v37 = vld [vmem:[#allocation3 + $0x440] ss:$8 sps:$4 sm:$0xff]  }
 0x135   :  { %1898 = vmatpush1.bf16.msra.mxu0 %v7835_v38  ;;  %v7921_v38 = vld [vmem:[#allocation3 + $0x454] ss:$8 sps:$4 sm:$0xff]  }
 0x136   :  { %1899 = vmatprep.subr.bf16.mxu0 %v7840_v39  ;;  %v7919_v39 = vld [vmem:[#allocation3 + $0x450] ss:$8 sps:$4 sm:$0xff]  }
 0x139   :  { %1900 = vmatpush1.bf16.msra.mxu0 %v7838_v40  ;;  %v7924_v40 = vld [vmem:[#allocation3 + $0x464] ss:$8 sps:$4 sm:$0xff]  }
 0x13a   :  { %1901 = vmatprep.subr.bf16.mxu0 %v7843_v41  ;;  %v7922_v41 = vld [vmem:[#allocation3 + $0x460] ss:$8 sps:$4 sm:$0xff]  }
 0x13d   :  { %1902 = vmatpush1.bf16.msra.mxu0 %v7841_v42  ;;  %v7927_v42 = vld [vmem:[#allocation3 + $0x474] ss:$8 sps:$4 sm:$0xff]  }
 0x13e   :  { %1903 = vmatprep.subr.bf16.mxu0 %v7846_v43  ;;  %v7925_v43 = vld [vmem:[#allocation3 + $0x470] ss:$8 sps:$4 sm:$0xff]  }
 0x141   :  { %1904 = vmatpush1.bf16.msra.mxu0 %v7844_v44  ;;  %v7930_v44 = vld [vmem:[#allocation3 + $0x484] ss:$8 sps:$4 sm:$0xff]  }
 0x142   :  { %1905 = vmatprep.subr.bf16.mxu0 %v7849_v45  ;;  %v7928_v45 = vld [vmem:[#allocation3 + $0x480] ss:$8 sps:$4 sm:$0xff]  }
 0x145   :  { %1906 = vmatpush1.bf16.msra.mxu0 %v7847_v46  ;;  %v7933_v46 = vld [vmem:[#allocation3 + $0x494] ss:$8 sps:$4 sm:$0xff]  }
 0x146   :  { %1907 = vmatprep.subr.bf16.mxu0 %v7852_v47  ;;  %v7931_v47 = vld [vmem:[#allocation3 + $0x490] ss:$8 sps:$4 sm:$0xff]  }
 0x149   :  { %1908 = vmatpush1.bf16.msra.mxu0 %v7850_v48  ;;  %v7936_v48 = vld [vmem:[#allocation3 + $0x4a4] ss:$8 sps:$4 sm:$0xff]  }
 0x14a   :  { %1909 = vmatprep.subr.bf16.mxu0 %v7855_v49  ;;  %v7934_v49 = vld [vmem:[#allocation3 + $0x4a0] ss:$8 sps:$4 sm:$0xff]  }
 0x14d   :  { %1910 = vmatpush1.bf16.msra.mxu0 %v7853_v50  ;;  %v7939_v50 = vld [vmem:[#allocation3 + $0x4b4] ss:$8 sps:$4 sm:$0xff]  }
 0x14e   :  { %1920 = vmatprep.subr.bf16.mxu0 %v7858_v51  ;;  %v7937_v51 = vld [vmem:[#allocation3 + $0x4b0] ss:$8 sps:$4 sm:$0xff]  }
 0x150   :  { %1912 = vmatmul.mubr.bf16.vlgmr.msra.gmra.mrb[0].mxu0 %v8595_v52  ;;  %v7942_v52 = vld [vmem:[#allocation3 + $0x4c4] ss:$8 sps:$4 sm:$0xff]  }
 0x151   :  { %1921 = vmatpush1.bf16.msra.mxu0 %v7856_v53  ;;  %1952 = vmatprep.mubr.bf16.mxu0 %v451_v54  ;;  %v7940_v53 = vld [vmem:[#allocation3 + $0x4c0] ss:$8 sps:$4 sm:$0xff]   ;;  %v7945_v54 = vld [vmem:[#allocation3 + $0x4d4] ss:$8 sps:$4 sm:$0xff]  }
 0x152   :  { %1922 = vmatprep.subr.bf16.mxu0 %v7861_v55  ;;  %v7943_v55 = vld [vmem:[#allocation3 + $0x4d0] ss:$8 sps:$4 sm:$0xff]  }
 0x155   :  { %1923 = vmatpush1.bf16.msra.mxu0 %v7859_v56  ;;  %v7948_v56 = vld [vmem:[#allocation3 + $0x4e4] ss:$8 sps:$4 sm:$0xff]  }
 0x156   :  { %1924 = vmatprep.subr.bf16.mxu0 %v7864_v57  ;;  %v7946_v57 = vld [vmem:[#allocation3 + $0x4e0] ss:$8 sps:$4 sm:$0xff]  }
 0x159   :  { %1925 = vmatpush1.bf16.msra.mxu0 %v7862_v58  ;;  %v7951_v58 = vld [vmem:[#allocation3 + $0x4f4] ss:$8 sps:$4 sm:$0xff]  }
 0x15a   :  { %1926 = vmatprep.subr.bf16.mxu0 %v7867_v59  ;;  %v7949_v59 = vld [vmem:[#allocation3 + $0x4f0] ss:$8 sps:$4 sm:$0xff]  }
 0x15d   :  { %1927 = vmatpush1.bf16.msra.mxu0 %v7865_v60  ;;  %v7954_v60 = vld [vmem:[#allocation3 + $0x504] ss:$8 sps:$4 sm:$0xff]  }
 0x15e   :  { %1928 = vmatprep.subr.bf16.mxu0 %v7870_v61  ;;  %v8619_v61 = vrot.slane %v8607_v22, %v8566_v16  ;;  %v7982_v22 = vld [vmem:[#allocation3 + $0x5a0] ss:$8 sps:$4 sm:$0xff]  }
 0x161   :  { %1929 = vmatpush1.bf16.msra.mxu0 %v7868_v62  ;;  %v7952_v62 = vld [vmem:[#allocation3 + $0x500] ss:$8 sps:$4 sm:$0xff]  }
 0x162   :  { %1930 = vmatprep.subr.bf16.mxu0 %v7873_v63  ;;  %v499_v63 = vcombine.high %v8614_v29, %v8614_v29 }
 0x165   :  { %1931 = vmatpush1.bf16.msra.mxu0 %v7871_v0  ;;  %v7957_v0 = vld [vmem:[#allocation3 + $0x514] ss:$8 sps:$4 sm:$0xff]  }
 0x166   :  { %1932 = vmatprep.subr.bf16.mxu0 %v7876_v1  ;;  %v7955_v1 = vld [vmem:[#allocation3 + $0x510] ss:$8 sps:$4 sm:$0xff]  }
 0x169   :  { %1933 = vmatpush1.bf16.msra.mxu0 %v7874_v2  ;;  %v7960_v2 = vld [vmem:[#allocation3 + $0x524] ss:$8 sps:$4 sm:$0xff]  }
 0x16a   :  { %1934 = vmatprep.subr.bf16.mxu0 %v7879_v3  ;;  %v7958_v3 = vld [vmem:[#allocation3 + $0x520] ss:$8 sps:$4 sm:$0xff]  }
 0x16d   :  { %1935 = vmatpush1.bf16.msra.mxu0 %v7877_v4  ;;  %v7963_v4 = vld [vmem:[#allocation3 + $0x534] ss:$8 sps:$4 sm:$0xff]  }
 0x16e   :  { %1936 = vmatprep.subr.bf16.mxu0 %v7882_v5  ;;  %v7961_v5 = vld [vmem:[#allocation3 + $0x530] ss:$8 sps:$4 sm:$0xff]  }
 0x171   :  { %1937 = vmatpush1.bf16.msra.mxu0 %v7880_v6  ;;  %v7966_v6 = vld [vmem:[#allocation3 + $0x544] ss:$8 sps:$4 sm:$0xff]  }
 0x172   :  { %1938 = vmatprep.subr.bf16.mxu0 %v7885_v7  ;;  %v7964_v7 = vld [vmem:[#allocation3 + $0x540] ss:$8 sps:$4 sm:$0xff]  }
 0x175   :  { %1939 = vmatpush1.bf16.msra.mxu0 %v7883_v8  ;;  %v7969_v8 = vld [vmem:[#allocation3 + $0x554] ss:$8 sps:$4 sm:$0xff]  }
 0x176   :  { %1940 = vmatprep.subr.bf16.mxu0 %v7888_v9  ;;  %v7967_v9 = vld [vmem:[#allocation3 + $0x550] ss:$8 sps:$4 sm:$0xff]  }
 0x179   :  { %1941 = vmatpush1.bf16.msra.mxu0 %v7886_v10  ;;  %v7972_v10 = vld [vmem:[#allocation3 + $0x564] ss:$8 sps:$4 sm:$0xff]  }
 0x17a   :  { %1942 = vmatprep.subr.bf16.mxu0 %v7891_v11  ;;  %v7970_v11 = vld [vmem:[#allocation3 + $0x560] ss:$8 sps:$4 sm:$0xff]  }
 0x17d   :  { %1943 = vmatpush1.bf16.msra.mxu0 %v7889_v13  ;;  %v7975_v13 = vld [vmem:[#allocation3 + $0x574] ss:$8 sps:$4 sm:$0xff]  }
 0x17e   :  { %1944 = vmatprep.subr.bf16.mxu0 %v7894_v14  ;;  %v7973_v14 = vld [vmem:[#allocation3 + $0x570] ss:$8 sps:$4 sm:$0xff]  }
 0x181   :  { %1945 = vmatpush1.bf16.msra.mxu0 %v7892_v15  ;;  %v7978_v15 = vld [vmem:[#allocation3 + $0x584] ss:$8 sps:$4 sm:$0xff]  }
 0x182   :  { %1946 = vmatprep.subr.bf16.mxu0 %v7897_v17  ;;  %v7976_v17 = vld [vmem:[#allocation3 + $0x580] ss:$8 sps:$4 sm:$0xff]  }
 0x185   :  { %1947 = vmatpush1.bf16.msra.mxu0 %v7895_v18  ;;  %v7981_v18 = vld [vmem:[#allocation3 + $0x594] ss:$8 sps:$4 sm:$0xff]  }
 0x186   :  { %1948 = vmatprep.subr.bf16.mxu0 %v7900_v19  ;;  %v7979_v19 = vld [vmem:[#allocation3 + $0x590] ss:$8 sps:$4 sm:$0xff]  }
 0x189   :  { %1949 = vmatpush1.bf16.msra.mxu0 %v7898_v21  ;;  %v7984_v21 = vld [vmem:[#allocation3 + $0x5a4] ss:$8 sps:$4 sm:$0xff]  }
 0x18a   :  { %1950 = vmatprep.subr.bf16.mxu0 %v7903_v23  ;;  %v7987_v23 = vld [vmem:[#allocation3 + $0x5b4] ss:$8 sps:$4 sm:$0xff]  }
 0x18d   :  { %1951 = vmatpush1.bf16.msra.mxu0 %v7901_v24  ;;  %v7985_v24 = vld [vmem:[#allocation3 + $0x5b0] ss:$8 sps:$4 sm:$0xff]  }
 0x18e   :  { %1961 = vmatprep.subr.bf16.mxu0 %v7906_v26  ;;  %v7988_v26 = vld [vmem:[#allocation3 + $0x5c0] ss:$8 sps:$4 sm:$0xff]  }
 0x190   :  { %1953 = vmatmul.mubr.bf16.vlgmr.msra.gmra.mrb[0].mxu0 %v449_v27  ;;  %v7993_v27 = vld [vmem:[#allocation3 + $0x5d4] ss:$8 sps:$4 sm:$0xff]  }
 0x191   :  { %1962 = vmatpush1.bf16.msra.mxu0 %v7904_v28  ;;  %1993 = vmatprep.mubr.bf16.mxu0 %v8614_v29  ;;  %v7991_v28 = vld [vmem:[#allocation3 + $0x5d0] ss:$8 sps:$4 sm:$0xff]   ;;  %v452_v29 = vcombine.high %v8603_v20, %v8603_v20  ;;  %v8000_v20 = vld [vmem:[#allocation3 + $0x600] ss:$8 sps:$4 sm:$0xff]  }
 0x192   :  { %1963 = vmatprep.subr.bf16.mxu0 %v7909_v30  ;;  %v7996_v30 = vld [vmem:[#allocation3 + $0x5e4] ss:$8 sps:$4 sm:$0xff]  }
 0x195   :  { %1964 = vmatpush1.bf16.msra.mxu0 %v7907_v31  ;;  %v7994_v31 = vld [vmem:[#allocation3 + $0x5e0] ss:$8 sps:$4 sm:$0xff]  }
 0x196   :  { %1965 = vmatprep.subr.bf16.mxu0 %v7912_v32  ;;  %v8627_v32 = vrot.slane %v452_v29, %v8566_v16  ;;  %v8081_v29 = vld [vmem:[#allocation3 + $0x7a4] ss:$8 sps:$4 sm:$0xff]  }
 0x199   :  { %1966 = vmatpush1.bf16.msra.mxu0 %v7910_v33  ;;  %v7999_v33 = vld [vmem:[#allocation3 + $0x5f4] ss:$8 sps:$4 sm:$0xff]  }
 0x19a   :  { %1967 = vmatprep.subr.bf16.mxu0 %v7915_v34  ;;  %v7997_v34 = vld [vmem:[#allocation3 + $0x5f0] ss:$8 sps:$4 sm:$0xff]  }
 0x19d   :  { %1968 = vmatpush1.bf16.msra.mxu0 %v7913_v35  ;;  %v468_v35 = vcombine.high %v8627_v32, %v8627_v32 }
 0x19e   :  { %1969 = vmatprep.subr.bf16.mxu0 %v7918_v36  ;;  %v8002_v36 = vld [vmem:[#allocation3 + $0x604] ss:$8 sps:$4 sm:$0xff]  }
 0x1a1   :  { %1970 = vmatpush1.bf16.msra.mxu0 %v7916_v37  ;;  %v497_v37 = vcombine.high %v8619_v61, %v8619_v61 }
 0x1a2   :  { %1971 = vmatprep.subr.bf16.mxu0 %v7921_v38  ;;  %v8634_v38 = vrot.slane %v468_v35, %v8566_v16  ;;  %v8090_v35 = vld [vmem:[#allocation3 + $0x7d4] ss:$8 sps:$4 sm:$0xff]  }
 0x1a5   :  { %1972 = vmatpush1.bf16.msra.mxu0 %v7919_v39  ;;  %v8005_v39 = vld [vmem:[#allocation3 + $0x614] ss:$8 sps:$4 sm:$0xff]  }
 0x1a6   :  { %1973 = vmatprep.subr.bf16.mxu0 %v7924_v40  ;;  %v8003_v40 = vld [vmem:[#allocation3 + $0x610] ss:$8 sps:$4 sm:$0xff]  }
 0x1a9   :  { %1974 = vmatpush1.bf16.msra.mxu0 %v7922_v41  ;;  %v8008_v41 = vld [vmem:[#allocation3 + $0x624] ss:$8 sps:$4 sm:$0xff]  }
 0x1aa   :  { %1975 = vmatprep.subr.bf16.mxu0 %v7927_v42  ;;  %v8006_v42 = vld [vmem:[#allocation3 + $0x620] ss:$8 sps:$4 sm:$0xff]  }
 0x1ad   :  { %1976 = vmatpush1.bf16.msra.mxu0 %v7925_v43  ;;  %v8011_v43 = vld [vmem:[#allocation3 + $0x634] ss:$8 sps:$4 sm:$0xff]  }
 0x1ae   :  { %1977 = vmatprep.subr.bf16.mxu0 %v7930_v44  ;;  %v8009_v44 = vld [vmem:[#allocation3 + $0x630] ss:$8 sps:$4 sm:$0xff]  }
 0x1b1   :  { %1978 = vmatpush1.bf16.msra.mxu0 %v7928_v45  ;;  %v8014_v45 = vld [vmem:[#allocation3 + $0x644] ss:$8 sps:$4 sm:$0xff]  }
 0x1b2   :  { %1979 = vmatprep.subr.bf16.mxu0 %v7933_v46  ;;  %v8012_v46 = vld [vmem:[#allocation3 + $0x640] ss:$8 sps:$4 sm:$0xff]  }
 0x1b5   :  { %1980 = vmatpush1.bf16.msra.mxu0 %v7931_v47  ;;  %v8017_v47 = vld [vmem:[#allocation3 + $0x654] ss:$8 sps:$4 sm:$0xff]  }
 0x1b6   :  { %1981 = vmatprep.subr.bf16.mxu0 %v7936_v48  ;;  %v8015_v48 = vld [vmem:[#allocation3 + $0x650] ss:$8 sps:$4 sm:$0xff]  }
 0x1b9   :  { %1982 = vmatpush1.bf16.msra.mxu0 %v7934_v49  ;;  %v8020_v49 = vld [vmem:[#allocation3 + $0x664] ss:$8 sps:$4 sm:$0xff]  }
 0x1ba   :  { %1983 = vmatprep.subr.bf16.mxu0 %v7939_v50  ;;  %v8018_v50 = vld [vmem:[#allocation3 + $0x660] ss:$8 sps:$4 sm:$0xff]  }
 0x1bd   :  { %1984 = vmatpush1.bf16.msra.mxu0 %v7937_v51  ;;  %v8023_v51 = vld [vmem:[#allocation3 + $0x674] ss:$8 sps:$4 sm:$0xff]  }
 0x1be   :  { %1985 = vmatprep.subr.bf16.mxu0 %v7942_v52  ;;  %v8021_v52 = vld [vmem:[#allocation3 + $0x670] ss:$8 sps:$4 sm:$0xff]  }
 0x1c1   :  { %1986 = vmatpush1.bf16.msra.mxu0 %v7940_v53  ;;  %v8026_v53 = vld [vmem:[#allocation3 + $0x684] ss:$8 sps:$4 sm:$0xff]  }
 0x1c2   :  { %1987 = vmatprep.subr.bf16.mxu0 %v7945_v54  ;;  %v8024_v54 = vld [vmem:[#allocation3 + $0x680] ss:$8 sps:$4 sm:$0xff]  }
 0x1c5   :  { %1988 = vmatpush1.bf16.msra.mxu0 %v7943_v55  ;;  %v8029_v55 = vld [vmem:[#allocation3 + $0x694] ss:$8 sps:$4 sm:$0xff]  }
 0x1c6   :  { %1989 = vmatprep.subr.bf16.mxu0 %v7948_v56  ;;  %v8027_v56 = vld [vmem:[#allocation3 + $0x690] ss:$8 sps:$4 sm:$0xff]  }
 0x1c9   :  { %1990 = vmatpush1.bf16.msra.mxu0 %v7946_v57  ;;  %v8032_v57 = vld [vmem:[#allocation3 + $0x6a4] ss:$8 sps:$4 sm:$0xff]  }
 0x1ca   :  { %1991 = vmatprep.subr.bf16.mxu0 %v7951_v58  ;;  %v8030_v58 = vld [vmem:[#allocation3 + $0x6a0] ss:$8 sps:$4 sm:$0xff]  }
 0x1cd   :  { %1992 = vmatpush1.bf16.msra.mxu0 %v7949_v59  ;;  %v8035_v59 = vld [vmem:[#allocation3 + $0x6b4] ss:$8 sps:$4 sm:$0xff]  }
 0x1ce   :  { %2002 = vmatprep.subr.bf16.mxu0 %v7954_v60  ;;  %v8033_v60 = vld [vmem:[#allocation3 + $0x6b0] ss:$8 sps:$4 sm:$0xff]  }
 0x1d0   :  { %1994 = vmatmul.mubr.bf16.vlgmr.msra.gmra.mrb[0].mxu0 %v8619_v61  ;;  %v8038_v61 = vld [vmem:[#allocation3 + $0x6c4] ss:$8 sps:$4 sm:$0xff]  }
 0x1d1   :  { %2003 = vmatpush1.bf16.msra.mxu0 %v7952_v62  ;;  %2034 = vmatprep.mubr.bf16.mxu0 %v499_v63  ;;  %v8036_v62 = vld [vmem:[#allocation3 + $0x6c0] ss:$8 sps:$4 sm:$0xff]   ;;  %v8041_v63 = vld [vmem:[#allocation3 + $0x6d4] ss:$8 sps:$4 sm:$0xff]  }
 0x1d2   :  { %2004 = vmatprep.subr.bf16.mxu0 %v7957_v0  ;;  %v8039_v0 = vld [vmem:[#allocation3 + $0x6d0] ss:$8 sps:$4 sm:$0xff]  }
 0x1d5   :  { %2005 = vmatpush1.bf16.msra.mxu0 %v7955_v1  ;;  %v8044_v1 = vld [vmem:[#allocation3 + $0x6e4] ss:$8 sps:$4 sm:$0xff]  }
 0x1d6   :  { %2006 = vmatprep.subr.bf16.mxu0 %v7960_v2  ;;  %v8042_v2 = vld [vmem:[#allocation3 + $0x6e0] ss:$8 sps:$4 sm:$0xff]  }
 0x1d9   :  { %2007 = vmatpush1.bf16.msra.mxu0 %v7958_v3  ;;  %v8047_v3 = vld [vmem:[#allocation3 + $0x6f4] ss:$8 sps:$4 sm:$0xff]  }
 0x1da   :  { %2008 = vmatprep.subr.bf16.mxu0 %v7963_v4  ;;  %v8045_v4 = vld [vmem:[#allocation3 + $0x6f0] ss:$8 sps:$4 sm:$0xff]  }
 0x1dd   :  { %2009 = vmatpush1.bf16.msra.mxu0 %v7961_v5  ;;  %v8051_v5 = vld [vmem:[#allocation3 + $0x704] ss:$8 sps:$4 sm:$0xff]  }
 0x1de   :  { %2010 = vmatprep.subr.bf16.mxu0 %v7966_v6  ;;  %v8639_v6 = vrot.slane %v8627_v32, %v8566_v16  ;;  %v8058_v16 = vld [vmem:[#allocation3 + $0x730] ss:$8 sps:$4 sm:$0xff]  }
 0x1df   :  { %v8082_v32 = vld [vmem:[#allocation3 + $0x7b0] ss:$8 sps:$4 sm:$0xff]  }
 0x1e1   :  { %2011 = vmatpush1.bf16.msra.mxu0 %v7964_v7  ;;  %v8049_v7 = vld [vmem:[#allocation3 + $0x700] ss:$8 sps:$4 sm:$0xff]  }
 0x1e2   :  { %2012 = vmatprep.subr.bf16.mxu0 %v7969_v8  ;;  %v500_v8 = vcombine.high %v8634_v38, %v8634_v38 }
 0x1e5   :  { %2013 = vmatpush1.bf16.msra.mxu0 %v7967_v9  ;;  %v8054_v9 = vld [vmem:[#allocation3 + $0x714] ss:$8 sps:$4 sm:$0xff]  }
 0x1e6   :  { %2014 = vmatprep.subr.bf16.mxu0 %v7972_v10  ;;  %v8052_v10 = vld [vmem:[#allocation3 + $0x710] ss:$8 sps:$4 sm:$0xff]  }
 0x1e9   :  { %2015 = vmatpush1.bf16.msra.mxu0 %v7970_v11  ;;  %v8057_v11 = vld [vmem:[#allocation3 + $0x724] ss:$8 sps:$4 sm:$0xff]  }
 0x1ea   :  { %2016 = vmatprep.subr.bf16.mxu0 %v7975_v13  ;;  %v8055_v13 = vld [vmem:[#allocation3 + $0x720] ss:$8 sps:$4 sm:$0xff]  }
 0x1ed   :  { %2017 = vmatpush1.bf16.msra.mxu0 %v7973_v14  ;;  %v8060_v14 = vld [vmem:[#allocation3 + $0x734] ss:$8 sps:$4 sm:$0xff]  }
 0x1ee   :  { %2018 = vmatprep.subr.bf16.mxu0 %v7978_v15  ;;  %v8063_v15 = vld [vmem:[#allocation3 + $0x744] ss:$8 sps:$4 sm:$0xff]  }
 0x1f1   :  { %2019 = vmatpush1.bf16.msra.mxu0 %v7976_v17  ;;  %v8061_v17 = vld [vmem:[#allocation3 + $0x740] ss:$8 sps:$4 sm:$0xff]  }
 0x1f2   :  { %2020 = vmatprep.subr.bf16.mxu0 %v7981_v18  ;;  %v8066_v18 = vld [vmem:[#allocation3 + $0x754] ss:$8 sps:$4 sm:$0xff]  }
 0x1f5   :  { %2021 = vmatpush1.bf16.msra.mxu0 %v7979_v19  ;;  %v8064_v19 = vld [vmem:[#allocation3 + $0x750] ss:$8 sps:$4 sm:$0xff]  }
 0x1f6   :  { %2022 = vmatprep.subr.bf16.mxu0 %v7984_v21  ;;  %v8069_v21 = vld [vmem:[#allocation3 + $0x764] ss:$8 sps:$4 sm:$0xff]  }
 0x1f9   :  { %2023 = vmatpush1.bf16.msra.mxu0 %v7982_v22  ;;  %v8067_v22 = vld [vmem:[#allocation3 + $0x760] ss:$8 sps:$4 sm:$0xff]  }
 0x1fa   :  { %2024 = vmatprep.subr.bf16.mxu0 %v7987_v23  ;;  %v8072_v23 = vld [vmem:[#allocation3 + $0x774] ss:$8 sps:$4 sm:$0xff]  }
 0x1fd   :  { %2025 = vmatpush1.bf16.msra.mxu0 %v7985_v24  ;;  %v8070_v24 = vld [vmem:[#allocation3 + $0x770] ss:$8 sps:$4 sm:$0xff]  }
 0x1fe   :  { %2026 = vmatprep.subr.bf16.mxu0 %v7990_v25  ;;  %v8075_v25 = vld [vmem:[#allocation3 + $0x784] ss:$8 sps:$4 sm:$0xff]  }
 0x201   :  { %2027 = vmatpush1.bf16.msra.mxu0 %v7988_v26  ;;  %v8073_v26 = vld [vmem:[#allocation3 + $0x780] ss:$8 sps:$4 sm:$0xff]  }
 0x202   :  { %2028 = vmatprep.subr.bf16.mxu0 %v7993_v27  ;;  %v8078_v27 = vld [vmem:[#allocation3 + $0x794] ss:$8 sps:$4 sm:$0xff]  }
 0x205   :  { %2029 = vmatpush1.bf16.msra.mxu0 %v7991_v28  ;;  %v8076_v28 = vld [vmem:[#allocation3 + $0x790] ss:$8 sps:$4 sm:$0xff]  }
 0x206   :  { %2030 = vmatprep.subr.bf16.mxu0 %v7996_v30  ;;  %v8079_v30 = vld [vmem:[#allocation3 + $0x7a0] ss:$8 sps:$4 sm:$0xff]  }
 0x209   :  { %2031 = vmatpush1.bf16.msra.mxu0 %v7994_v31  ;;  %v8084_v31 = vld [vmem:[#allocation3 + $0x7b4] ss:$8 sps:$4 sm:$0xff]  }
 0x20a   :  { %2032 = vmatprep.subr.bf16.mxu0 %v7999_v33  ;;  %v8087_v33 = vld [vmem:[#allocation3 + $0x7c4] ss:$8 sps:$4 sm:$0xff]  }
 0x20d   :  { %2033 = vmatpush1.bf16.msra.mxu0 %v7997_v34  ;;  %v8085_v34 = vld [vmem:[#allocation3 + $0x7c0] ss:$8 sps:$4 sm:$0xff]  }
 0x20e   :  { %2043 = vmatprep.subr.bf16.mxu0 %v8002_v36  ;;  %v8088_v36 = vld [vmem:[#allocation3 + $0x7d0] ss:$8 sps:$4 sm:$0xff]  }
 0x210   :  { %2035 = vmatmul.mubr.bf16.vlgmr.msra.gmra.mrb[0].mxu0 %v497_v37  ;;  %v8093_v37 = vld [vmem:[#allocation3 + $0x7e4] ss:$8 sps:$4 sm:$0xff]  }
 0x211   :  { %2044 = vmatpush1.bf16.msra.mxu0 %v8000_v20  ;;  %2075 = vmatprep.mubr.bf16.mxu0 %v8634_v38  ;;  %v8091_v20 = vld [vmem:[#allocation3 + $0x7e0] ss:$8 sps:$4 sm:$0xff]   ;;  %v8096_v38 = vld [vmem:[#allocation3 + $0x7f4] ss:$8 sps:$4 sm:$0xff]  }
 0x212   :  { %2045 = vmatprep.subr.bf16.mxu0 %v8005_v39  ;;  %v8094_v39 = vld [vmem:[#allocation3 + $0x7f0] ss:$8 sps:$4 sm:$0xff]  }
 0x215   :  { %2046 = vmatpush1.bf16.msra.mxu0 %v8003_v40  ;;  %v498_v40 = vcombine.high %v8639_v6, %v8639_v6 }
 0x216   :  { %2047 = vmatprep.subr.bf16.mxu0 %v8008_v41  ;;  %v8647_v41 = vsub.s32 0, %v8563_v12 }
 0x219   :  { %2048 = vmatpush1.bf16.msra.mxu0 %v8006_v42  ;;  %v389_v42 = vld [vmem:[#allocation5] sm:$0x3] }
 0x21a   :  { %2049 = vmatprep.subr.bf16.mxu0 %v8011_v43  ;;  %v8650_v43 = vsub.s32 1, %v8563_v12 }
 0x21d   :  { %2050 = vmatpush1.bf16.msra.mxu0 %v8009_v44  ;;  %v394_v44 = vrot.slane %v389_v42, %v8647_v41 }
 0x21e   :  { %2051 = vmatprep.subr.bf16.mxu0 %v8014_v45  ;;  %v398_v45 = vrot.slane %v389_v42, %v8650_v43 }
 0x221   :  { %2052 = vmatpush1.bf16.msra.mxu0 %v8012_v46 }
 0x222   :  { %2053 = vmatprep.subr.bf16.mxu0 %v8017_v47 }
 0x225   :  { %2054 = vmatpush1.bf16.msra.mxu0 %v8015_v48 }
 0x226   :  { %2055 = vmatprep.subr.bf16.mxu0 %v8020_v49 }
 0x229   :  { %2056 = vmatpush1.bf16.msra.mxu0 %v8018_v50 }
 0x22a   :  { %2057 = vmatprep.subr.bf16.mxu0 %v8023_v51 }
 0x22d   :  { %2058 = vmatpush1.bf16.msra.mxu0 %v8021_v52 }
 0x22e   :  { %2059 = vmatprep.subr.bf16.mxu0 %v8026_v53 }
 0x231   :  { %2060 = vmatpush1.bf16.msra.mxu0 %v8024_v54 }
 0x232   :  { %2061 = vmatprep.subr.bf16.mxu0 %v8029_v55 }
 0x235   :  { %2062 = vmatpush1.bf16.msra.mxu0 %v8027_v56 }
 0x236   :  { %2063 = vmatprep.subr.bf16.mxu0 %v8032_v57  ;;  %v8097_v57 = vld [vmem:[#allocation10 + $0x4] ss:$16 sps:$4 sm:$0xff]  }
 0x237   :  { %2585 = vmatprep.subr.bf16.mxu1 %v8097_v57  ;;  %v8150_v57 = vld [vmem:[#allocation10 + $0x2c] ss:$16 sps:$4 sm:$0xff]  }
 0x239   :  { %2064 = vmatpush1.bf16.msra.mxu0 %v8030_v58  ;;  %v8099_v58 = vld [vmem:[#allocation10] ss:$16 sps:$4 sm:$0xff]  }
 0x23a   :  { %2065 = vmatprep.subr.bf16.mxu0 %v8035_v59  ;;  %v8100_v59 = vld [vmem:[#allocation10 + $0x24] ss:$16 sps:$4 sm:$0xff]   ;;  %2586 = vmatpush1.bf16.msra.mxu1 %v8099_v58  ;;  %v8148_v58 = vld [vmem:[#allocation10 + $0x28] ss:$16 sps:$4 sm:$0xff]  }
 0x23b   :  { %2587 = vmatprep.subr.bf16.mxu1 %v8100_v59  ;;  %v8153_v59 = vld [vmem:[#allocation10 + $0x4c] ss:$16 sps:$4 sm:$0xff]  }
 0x23d   :  { %2066 = vmatpush1.bf16.msra.mxu0 %v8033_v60  ;;  %v8102_v60 = vld [vmem:[#allocation10 + $0x20] ss:$16 sps:$4 sm:$0xff]  }
 0x23e   :  { %2067 = vmatprep.subr.bf16.mxu0 %v8038_v61  ;;  %v8103_v61 = vld [vmem:[#allocation10 + $0x44] ss:$16 sps:$4 sm:$0xff]   ;;  %2588 = vmatpush1.bf16.msra.mxu1 %v8102_v60  ;;  %v8151_v60 = vld [vmem:[#allocation10 + $0x48] ss:$16 sps:$4 sm:$0xff]  }
 0x23f   :  { %2589 = vmatprep.subr.bf16.mxu1 %v8103_v61  ;;  %v8156_v61 = vld [vmem:[#allocation10 + $0x6c] ss:$16 sps:$4 sm:$0xff]  }
 0x241   :  { %2068 = vmatpush1.bf16.msra.mxu0 %v8036_v62  ;;  %v8105_v62 = vld [vmem:[#allocation10 + $0x40] ss:$16 sps:$4 sm:$0xff]  }
 0x242   :  { %2069 = vmatprep.subr.bf16.mxu0 %v8041_v63  ;;  %v8106_v63 = vld [vmem:[#allocation10 + $0x64] ss:$16 sps:$4 sm:$0xff]   ;;  %2590 = vmatpush1.bf16.msra.mxu1 %v8105_v62  ;;  %v8154_v62 = vld [vmem:[#allocation10 + $0x68] ss:$16 sps:$4 sm:$0xff]  }
 0x243   :  { %2591 = vmatprep.subr.bf16.mxu1 %v8106_v63  ;;  %v8159_v63 = vld [vmem:[#allocation10 + $0x8c] ss:$16 sps:$4 sm:$0xff]  }
 0x245   :  { %2070 = vmatpush1.bf16.msra.mxu0 %v8039_v0  ;;  %v8108_v0 = vld [vmem:[#allocation10 + $0x60] ss:$16 sps:$4 sm:$0xff]  }
 0x246   :  { %2071 = vmatprep.subr.bf16.mxu0 %v8044_v1  ;;  %v8109_v1 = vld [vmem:[#allocation10 + $0x84] ss:$16 sps:$4 sm:$0xff]   ;;  %2592 = vmatpush1.bf16.msra.mxu1 %v8108_v0  ;;  %v8157_v0 = vld [vmem:[#allocation10 + $0x88] ss:$16 sps:$4 sm:$0xff]  }
 0x247   :  { %2593 = vmatprep.subr.bf16.mxu1 %v8109_v1  ;;  %v8162_v1 = vld [vmem:[#allocation10 + $0xac] ss:$16 sps:$4 sm:$0xff]  }
 0x249   :  { %2072 = vmatpush1.bf16.msra.mxu0 %v8042_v2  ;;  %v8111_v2 = vld [vmem:[#allocation10 + $0x80] ss:$16 sps:$4 sm:$0xff]  }
 0x24a   :  { %2073 = vmatprep.subr.bf16.mxu0 %v8047_v3  ;;  %v8112_v3 = vld [vmem:[#allocation10 + $0xa4] ss:$16 sps:$4 sm:$0xff]   ;;  %2594 = vmatpush1.bf16.msra.mxu1 %v8111_v2  ;;  %v8160_v2 = vld [vmem:[#allocation10 + $0xa8] ss:$16 sps:$4 sm:$0xff]  }
 0x24b   :  { %2595 = vmatprep.subr.bf16.mxu1 %v8112_v3  ;;  %v8165_v3 = vld [vmem:[#allocation10 + $0xcc] ss:$16 sps:$4 sm:$0xff]  }
 0x24d   :  { %2074 = vmatpush1.bf16.msra.mxu0 %v8045_v4  ;;  %v8114_v4 = vld [vmem:[#allocation10 + $0xa0] ss:$16 sps:$4 sm:$0xff]  }
 0x24e   :  { %2084 = vmatprep.subr.bf16.mxu0 %v8051_v5  ;;  %v8115_v5 = vld [vmem:[#allocation10 + $0xc4] ss:$16 sps:$4 sm:$0xff]   ;;  %2596 = vmatpush1.bf16.msra.mxu1 %v8114_v4  ;;  %v8163_v4 = vld [vmem:[#allocation10 + $0xc8] ss:$16 sps:$4 sm:$0xff]  }
 0x24f   :  { %2597 = vmatprep.subr.bf16.mxu1 %v8115_v5  ;;  %v8168_v5 = vld [vmem:[#allocation10 + $0xec] ss:$16 sps:$4 sm:$0xff]  }
 0x250   :  { %2076 = vmatmul.mubr.bf16.vlgmr.msra.gmra.mrb[0].mxu0 %v8639_v6  ;;  %v8117_v6 = vld [vmem:[#allocation10 + $0xc0] ss:$16 sps:$4 sm:$0xff]  }
 0x251   :  { %2085 = vmatpush1.bf16.msra.mxu0 %v8049_v7  ;;  %2116 = vmatprep.mubr.bf16.mxu0 %v500_v8  ;;  %v8118_v7 = vld [vmem:[#allocation10 + $0xe4] ss:$16 sps:$4 sm:$0xff]   ;;  %v8120_v8 = vld [vmem:[#allocation10 + $0xe0] ss:$16 sps:$4 sm:$0xff]  }
 0x252   :  { %2086 = vmatprep.subr.bf16.mxu0 %v8054_v9  ;;  %2598 = vmatpush1.bf16.msra.mxu1 %v8117_v6  ;;  %v8121_v9 = vld [vmem:[#allocation10 + $0x104] ss:$16 sps:$4 sm:$0xff]   ;;  %v8166_v6 = vld [vmem:[#allocation10 + $0xe8] ss:$16 sps:$4 sm:$0xff]  }
 0x253   :  { %2599 = vmatprep.subr.bf16.mxu1 %v8118_v7  ;;  %v8171_v7 = vld [vmem:[#allocation10 + $0x10c] ss:$16 sps:$4 sm:$0xff]  }
 0x255   :  { %2087 = vmatpush1.bf16.msra.mxu0 %v8052_v10  ;;  %v8123_v10 = vld [vmem:[#allocation10 + $0x100] ss:$16 sps:$4 sm:$0xff]  }
 0x256   :  { %2088 = vmatprep.subr.bf16.mxu0 %v8057_v11  ;;  %2600 = vmatpush1.bf16.msra.mxu1 %v8120_v8  ;;  %v8124_v11 = vld [vmem:[#allocation10 + $0x124] ss:$16 sps:$4 sm:$0xff]   ;;  %v8169_v8 = vld [vmem:[#allocation10 + $0x108] ss:$16 sps:$4 sm:$0xff]  }
 0x257   :  { %2601 = vmatprep.subr.bf16.mxu1 %v8121_v9  ;;  %v8174_v9 = vld [vmem:[#allocation10 + $0x12c] ss:$16 sps:$4 sm:$0xff]  }
 0x259   :  { %2089 = vmatpush1.bf16.msra.mxu0 %v8055_v13  ;;  %v8126_v13 = vld [vmem:[#allocation10 + $0x120] ss:$16 sps:$4 sm:$0xff]  }
 0x25a   :  { %2090 = vmatprep.subr.bf16.mxu0 %v8060_v14  ;;  %2602 = vmatpush1.bf16.msra.mxu1 %v8123_v10  ;;  %v8127_v14 = vld [vmem:[#allocation10 + $0x144] ss:$16 sps:$4 sm:$0xff]   ;;  %v8172_v10 = vld [vmem:[#allocation10 + $0x128] ss:$16 sps:$4 sm:$0xff]  }
 0x25b   :  { %2603 = vmatprep.subr.bf16.mxu1 %v8124_v11  ;;  %v8177_v11 = vld [vmem:[#allocation10 + $0x14c] ss:$16 sps:$4 sm:$0xff]  }
 0x25d   :  { %2091 = vmatpush1.bf16.msra.mxu0 %v8058_v16 }
 0x25e   :  { %2092 = vmatprep.subr.bf16.mxu0 %v8063_v15  ;;  %2604 = vmatpush1.bf16.msra.mxu1 %v8126_v13  ;;  %v8175_v13 = vld [vmem:[#allocation10 + $0x148] ss:$16 sps:$4 sm:$0xff]  }
 0x25f   :  { %2605 = vmatprep.subr.bf16.mxu1 %v8127_v14  ;;  %v8180_v14 = vld [vmem:[#allocation10 + $0x16c] ss:$16 sps:$4 sm:$0xff]  }
 0x261   :  { %2093 = vmatpush1.bf16.msra.mxu0 %v8061_v17 }
 0x262   :  { %2094 = vmatprep.subr.bf16.mxu0 %v8066_v18 }
 0x265   :  { %2095 = vmatpush1.bf16.msra.mxu0 %v8064_v19 }
 0x266   :  { %2096 = vmatprep.subr.bf16.mxu0 %v8069_v21 }
 0x269   :  { %2097 = vmatpush1.bf16.msra.mxu0 %v8067_v22 }
 0x26a   :  { %2098 = vmatprep.subr.bf16.mxu0 %v8072_v23 }
 0x26d   :  { %2099 = vmatpush1.bf16.msra.mxu0 %v8070_v24 }
 0x26e   :  { %2100 = vmatprep.subr.bf16.mxu0 %v8075_v25  ;;  %v8129_v25 = vld [vmem:[#allocation10 + $0x140] ss:$16 sps:$4 sm:$0xff]  }
 0x26f   :  { %2606 = vmatpush1.bf16.msra.mxu1 %v8129_v25  ;;  %v2697_v25 = vld [vmem:[#allocation13] sm:$0xff] }
 0x271   :  { %2101 = vmatpush1.bf16.msra.mxu0 %v8073_v26  ;;  %v8130_v26 = vld [vmem:[#allocation10 + $0x164] ss:$16 sps:$4 sm:$0xff]  }
 0x272   :  { %2102 = vmatprep.subr.bf16.mxu0 %v8078_v27  ;;  %v8132_v27 = vld [vmem:[#allocation10 + $0x160] ss:$16 sps:$4 sm:$0xff]   ;;  %2607 = vmatprep.subr.bf16.mxu1 %v8130_v26  ;;  %v2713_v26 = vld [vmem:[#allocation13 + $0x80] sm:$0xff] }
 0x273   :  { %2608 = vmatpush1.bf16.msra.mxu1 %v8132_v27  ;;  %v2703_v27 = vld [vmem:[#allocation13 + $0x30] sm:$0xff] }
 0x275   :  { %2103 = vmatpush1.bf16.msra.mxu0 %v8076_v28  ;;  %v8133_v28 = vld [vmem:[#allocation10 + $0x184] ss:$16 sps:$4 sm:$0xff]  }
 0x276   :  { %2104 = vmatprep.subr.bf16.mxu0 %v8081_v29  ;;  %v8135_v29 = vld [vmem:[#allocation10 + $0x180] ss:$16 sps:$4 sm:$0xff]   ;;  %2609 = vmatprep.subr.bf16.mxu1 %v8133_v28  ;;  %v7146_v28 = vcombine.low %v2697_v25, %v2713_v26 }
 0x277   :  { %2610 = vmatpush1.bf16.msra.mxu1 %v8135_v29  ;;  %v7147_v29 = vcombine.high %v2697_v25, %v2713_v26  ;;  %v2953_v26 = vld [vmem:[#allocation13 + $0x800] sm:$0xff] }
 0x279   :  { %2105 = vmatpush1.bf16.msra.mxu0 %v8079_v30  ;;  %v8136_v30 = vld [vmem:[#allocation10 + $0x1a4] ss:$16 sps:$4 sm:$0xff]  }
 0x27a   :  { %2106 = vmatprep.subr.bf16.mxu0 %v8084_v31  ;;  %v8138_v31 = vld [vmem:[#allocation10 + $0x1a0] ss:$16 sps:$4 sm:$0xff]   ;;  %2611 = vmatprep.subr.bf16.mxu1 %v8136_v30  ;;  %v2719_v30 = vld [vmem:[#allocation13 + $0xb0] sm:$0xff] }
 0x27b   :  { %2612 = vmatpush1.bf16.msra.mxu1 %v8138_v31  ;;  %v2729_v31 = vld [vmem:[#allocation13 + $0x100] sm:$0xff] }
 0x27d   :  { %2107 = vmatpush1.bf16.msra.mxu0 %v8082_v32  ;;  %v8139_v32 = vld [vmem:[#allocation10 + $0x1c4] ss:$16 sps:$4 sm:$0xff]  }
 0x27e   :  { %2108 = vmatprep.subr.bf16.mxu0 %v8087_v33  ;;  %v8141_v33 = vld [vmem:[#allocation10 + $0x1c0] ss:$16 sps:$4 sm:$0xff]   ;;  %2613 = vmatprep.subr.bf16.mxu1 %v8139_v32  ;;  %v2745_v32 = vld [vmem:[#allocation13 + $0x180] sm:$0xff] }
 0x27f   :  { %2614 = vmatpush1.bf16.msra.mxu1 %v8141_v33  ;;  %v7158_v33 = vcombine.low %v2703_v27, %v2719_v30 }
 0x281   :  { %2109 = vmatpush1.bf16.msra.mxu0 %v8085_v34  ;;  %v8142_v34 = vld [vmem:[#allocation10 + $0x1e4] ss:$16 sps:$4 sm:$0xff]  }
 0x282   :  { %2110 = vmatprep.subr.bf16.mxu0 %v8090_v35  ;;  %v8144_v35 = vld [vmem:[#allocation10 + $0x1e0] ss:$16 sps:$4 sm:$0xff]   ;;  %2615 = vmatprep.subr.bf16.mxu1 %v8142_v34  ;;  %v7159_v34 = vcombine.high %v2703_v27, %v2719_v30  ;;  %v2969_v27 = vld [vmem:[#allocation13 + $0x880] sm:$0xff] }
 0x283   :  { %2616 = vmatpush1.bf16.msra.mxu1 %v8144_v35  ;;  %v7179_v35 = vcombine.high %v2729_v31, %v2745_v32 }
 0x285   :  { %2111 = vmatpush1.bf16.msra.mxu0 %v8088_v36  ;;  %v8147_v36 = vld [vmem:[#allocation10 + $0xc] ss:$16 sps:$4 sm:$0xff]  }
 0x286   :  { %2112 = vmatprep.subr.bf16.mxu0 %v8093_v37  ;;  %2626 = vmatprep.subr.bf16.mxu1 %v8147_v36  ;;  %v2735_v36 = vld [vmem:[#allocation13 + $0x130] sm:$0xff] }
 0x289   :  { %2113 = vmatpush1.bf16.msra.mxu0 %v8091_v20 }
 0x28a   :  { %2114 = vmatprep.subr.bf16.mxu0 %v8096_v38 }
 0x28d   :  { %2115 = vmatpush1.bf16.msra.mxu0 %v8094_v39  ;;  %v2149_v39 = vld [vmem:[#allocation7] sm:$0x3] }
 0x28e   :  { %v2154_v42 = vrot.slane %v2149_v39, %v8647_v41  ;;  %6194 = vmatprep.subr.bf16.mxu0 %v7159_v34  ;;  %v2985_v34 = vld [vmem:[#allocation13 + $0x900] sm:$0xff] }
 0x290   :  { %2117 = vmatmul.mubr.bf16.vlgmr.msra.gmra.mrb[0].mxu0 %v498_v40  ;;  %v2163_v40 = vld [vmem:[#allocation8] sm:$0x3] }
 0x291   :  { %6195 = vmatpush1.bf16.msra.mxu0 %v7158_v33 }
 0x363   :  { %v2118_v46 = vpop.f32.mrb[0].mxu0 }
 0x364   :  { %v7666_v47 = vadd.f32 %v2118_v46, %v394_v44  ;;  %v2120_v48 = vpop.f32.mrb[1].mxu0  ;;  %v2158_v44 = vrot.slane %v2149_v39, %v8650_v43  ;;  %v2777_v39 = vld [vmem:[#allocation13 + $0x280] sm:$0xff] }
 0x365   :  { %v7667_v49 = vadd.f32 %v2120_v48, %v398_v45  ;;  %v2122_v50 = vpop.f32.mrb[2].mxu0  ;;  %v2172_v48 = vrot.slane %v2163_v40, %v8650_v43 }
 0x366   :  { %v2125_v51 = vmax.f32 %v7666_v47, 0.0  ;;  %v2123_v52 = vpop.f32.mrb[3].mxu0  ;;  %v2168_v47 = vrot.slane %v2163_v40, %v8647_v41  ;;  %v2767_v40 = vld [vmem:[#allocation13 + $0x230] sm:$0xff] }
 0x367   :  { %v2126_v53 = vmax.f32 %v7667_v49, 0.0 }
 0x368   :  { %v2128_v54 = vsel %vm2127_vm0, %v2125_v51, 0.0 }
 0x369   :  { %v2129_v55 = vsel %vm2127_vm0, %v2126_v53, 0.0 }
 0x36a   :  { %v2130_v56 = vadd.f32 %v2129_v55, %v2128_v54  ;;  %v8145_v55 = vld [vmem:[#allocation10 + $0x8] ss:$16 sps:$4 sm:$0xff]  }
 0x36c   :  { %2131 = vadd.xlane.f32.xlu0 %v2130_v56 }
 0x3f9   :  { %v2132_v16 = vpop.xlane.xlu0 %2131 }
 0x3fa   :  { %v2134_v15 = vmul.f32 0.00390625, %v2132_v16  ;;  %v8178_v16 = vld [vmem:[#allocation10 + $0x168] ss:$16 sps:$4 sm:$0xff]  }
 0x3fc   :  { %v2135_v17 = vsub.f32 %v2125_v51, %v2134_v15  ;;  %v2136_v18 = vsub.f32 %v2126_v53, %v2134_v15  ;;  %v8183_v15 = vld [vmem:[#allocation10 + $0x18c] ss:$16 sps:$4 sm:$0xff]  }
 0x3fe   :  { %v2137_v19 = vmul.f32 %v2135_v17, %v2135_v17  ;;  %v2138_v21 = vmul.f32 %v2136_v18, %v2136_v18 }
 0x400   :  { %v2139_v22 = vsel %vm2127_vm0, %v2137_v19, 0.0  ;;  %v2140_v23 = vsel %vm2127_vm0, %v2138_v21, 0.0  ;;  %v8184_v19 = vld [vmem:[#allocation10 + $0x1a8] ss:$16 sps:$4 sm:$0xff]   ;;  %v8189_v21 = vld [vmem:[#allocation10 + $0x1cc] ss:$16 sps:$4 sm:$0xff]  }
 0x401   :  { %v2141_v24 = vadd.f32 %v2140_v23, %v2139_v22  ;;  %v8187_v22 = vld [vmem:[#allocation10 + $0x1c8] ss:$16 sps:$4 sm:$0xff]   ;;  %v8192_v23 = vld [vmem:[#allocation10 + $0x1ec] ss:$16 sps:$4 sm:$0xff]  }
 0x403   :  { %2142 = vadd.xlane.f32.xlu0 %v2141_v24  ;;  %v8190_v24 = vld [vmem:[#allocation10 + $0x1e8] ss:$16 sps:$4 sm:$0xff]  }
 0x490   :  { %v2143_v37 = vpop.xlane.xlu0 %2142 }
 0x491   :  { %v2144_v20 = vmul.f32 0.00390625, %v2143_v37  ;;  %v2751_v37 = vld [vmem:[#allocation13 + $0x1b0] sm:$0xff] }
 0x493   :  { %v2145_v38 = vadd.f32 1e-05, %v2144_v20  ;;  %v2761_v20 = vld [vmem:[#allocation13 + $0x200] sm:$0xff] }
 0x495   :  { %8193 = vrsqrt.f32 %v2145_v38  ;;  %v7191_v38 = vcombine.high %v2735_v36, %v2751_v37 }
 0x497   :  { %6196 = vmatprep.subr.bf16.mxu0 %v7191_v38 }
 0x49f   :  { %v8194_v45 = vpop.eup %8193 }
 0x4a0   :  { %v2148_v46 = vmul.f32 %v8194_v45, %v2136_v18  ;;  %v2147_v49 = vmul.f32 %v8194_v45, %v2135_v17  ;;  %v8181_v17 = vld [vmem:[#allocation10 + $0x188] ss:$16 sps:$4 sm:$0xff]   ;;  %v8186_v18 = vld [vmem:[#allocation10 + $0x1ac] ss:$16 sps:$4 sm:$0xff]   ;;  %v7190_v45 = vcombine.low %v2735_v36, %v2751_v37 }
 0x4a1   :  { %v2991_v36 = vld [vmem:[#allocation13 + $0x930] sm:$0xff] }
 0x4a2   :  { %v2162_v50 = vmul.f32 %v2158_v44, %v2148_v46  ;;  %v2161_v51 = vmul.f32 %v2154_v42, %v2147_v49  ;;  %v2783_v42 = vld [vmem:[#allocation13 + $0x2b0] sm:$0xff]  ;;  %v7178_v44 = vcombine.low %v2729_v31, %v2745_v32  ;;  %v7211_v46 = vcombine.high %v2761_v20, %v2777_v39  ;;  %v2809_v49 = vld [vmem:[#allocation13 + $0x380] sm:$0xff]  ;;  %6197 = vmatpush1.bf16.msra.mxu0 %v7190_v45 }
 0x4a3   :  { %v7403_v32 = vcombine.high %v2953_v26, %v2969_v27  ;;  %v3007_v37 = vld [vmem:[#allocation13 + $0x9b0] sm:$0xff] }
 0x4a4   :  { %v2176_v52 = vadd.f32 %v2172_v48, %v2162_v50  ;;  %v2175_v53 = vadd.f32 %v2168_v47, %v2161_v51  ;;  %v7223_v47 = vcombine.high %v2767_v40, %v2783_v42  ;;  %v2793_v48 = vld [vmem:[#allocation13 + $0x300] sm:$0xff]  ;;  %v2799_v50 = vld [vmem:[#allocation13 + $0x330] sm:$0xff] }
 0x4a5   :  { %v2815_v51 = vld [vmem:[#allocation13 + $0x3b0] sm:$0xff] }
 0x4a6   :  { %v2178_v54 = vpack.c.bf16 %v2176_v52, %v2176_v52  ;;  %v8662_v56 = vpack.c.bf16 %v2175_v53, %v2175_v53  ;;  %v7210_v52 = vcombine.low %v2761_v20, %v2777_v39  ;;  %v7222_v53 = vcombine.low %v2767_v40, %v2783_v42  ;;  %6198 = vmatprep.subr.bf16.mxu0 %v7223_v47  ;;  %v3017_v42 = vld [vmem:[#allocation13 + $0xa00] sm:$0xff]  ;;  %v3023_v45 = vld [vmem:[#allocation13 + $0xa30] sm:$0xff] }
 0x4a7   :  { %v7402_v20 = vcombine.low %v2953_v26, %v2969_v27  ;;  %v7447_v40 = vcombine.high %v2991_v36, %v3007_v37  ;;  %v3199_v27 = vld [vmem:[#allocation13 + $0xfb0] sm:$0xff] }
 0x4a8   :  { %2617 = vmatprep.mubr.bf16.mxu1 %v2178_v54  ;;  %6199 = vmatpush1.bf16.msra.mxu0 %v7222_v53  ;;  %v3049_v53 = vld [vmem:[#allocation13 + $0xb00] sm:$0xff] }
 0x4a9   :  { %2618 = vmatmul.mubr.bf16.vlgmr.msra.gmra.mrb[0].mxu1 %v8662_v56 }
 0x4aa   :  { %2627 = vmatpush1.bf16.msra.mxu1 %v8145_v55  ;;  %2658 = vmatprep.mubr.bf16.mxu1 %v2178_v54  ;;  %v7243_v54 = vcombine.high %v2793_v48, %v2809_v49  ;;  %v7255_v55 = vcombine.high %v2799_v50, %v2815_v51 }
 0x4ab   :  { %2628 = vmatprep.subr.bf16.mxu1 %v8150_v57  ;;  %v2841_v57 = vld [vmem:[#allocation13 + $0x480] sm:$0xff] }
 0x4ac   :  { %6200 = vmatprep.subr.bf16.mxu0 %v7255_v55  ;;  %v3055_v55 = vld [vmem:[#allocation13 + $0xb30] sm:$0xff] }
 0x4ae   :  { %2629 = vmatpush1.bf16.msra.mxu1 %v8148_v58  ;;  %v2831_v58 = vld [vmem:[#allocation13 + $0x430] sm:$0xff] }
 0x4af   :  { %2630 = vmatprep.subr.bf16.mxu1 %v8153_v59  ;;  %v2847_v59 = vld [vmem:[#allocation13 + $0x4b0] sm:$0xff] }
 0x4b2   :  { %2631 = vmatpush1.bf16.msra.mxu1 %v8151_v60  ;;  %v7242_v60 = vcombine.low %v2793_v48, %v2809_v49  ;;  %v7446_v48 = vcombine.low %v2991_v36, %v3007_v37 }
 0x4b3   :  { %2632 = vmatprep.subr.bf16.mxu1 %v8156_v61  ;;  %v7254_v61 = vcombine.low %v2799_v50, %v2815_v51 }
 0x4b5   :  { %6201 = vmatpush1.bf16.msra.mxu0 %v7254_v61  ;;  %v3081_v61 = vld [vmem:[#allocation13 + $0xc00] sm:$0xff] }
 0x4b6   :  { %2633 = vmatpush1.bf16.msra.mxu1 %v8154_v62 }
 0x4b7   :  { %2634 = vmatprep.subr.bf16.mxu1 %v8159_v63  ;;  %v7287_v63 = vcombine.high %v2831_v58, %v2847_v59 }
 0x4b9   :  { %6202 = vmatprep.subr.bf16.mxu0 %v7287_v63  ;;  %v3087_v63 = vld [vmem:[#allocation13 + $0xc30] sm:$0xff] }
 0x4ba   :  { %2635 = vmatpush1.bf16.msra.mxu1 %v8157_v0  ;;  %v2857_v0 = vld [vmem:[#allocation13 + $0x500] sm:$0xff] }
 0x4bb   :  { %2636 = vmatprep.subr.bf16.mxu1 %v8162_v1  ;;  %v2873_v1 = vld [vmem:[#allocation13 + $0x580] sm:$0xff] }
 0x4be   :  { %2637 = vmatpush1.bf16.msra.mxu1 %v8160_v2  ;;  %v2863_v2 = vld [vmem:[#allocation13 + $0x530] sm:$0xff] }
 0x4bf   :  { %2638 = vmatprep.subr.bf16.mxu1 %v8165_v3  ;;  %v2879_v3 = vld [vmem:[#allocation13 + $0x5b0] sm:$0xff] }
 0x4c2   :  { %2639 = vmatpush1.bf16.msra.mxu1 %v8163_v4 }
 0x4c3   :  { %2640 = vmatprep.subr.bf16.mxu1 %v8168_v5  ;;  %v7286_v5 = vcombine.low %v2831_v58, %v2847_v59 }
 0x4c5   :  { %6203 = vmatpush1.bf16.msra.mxu0 %v7286_v5  ;;  %v3113_v5 = vld [vmem:[#allocation13 + $0xd00] sm:$0xff] }
 0x4c6   :  { %2641 = vmatpush1.bf16.msra.mxu1 %v8166_v6  ;;  %v7307_v6 = vcombine.high %v2857_v0, %v2873_v1 }
 0x4c7   :  { %2642 = vmatprep.subr.bf16.mxu1 %v8171_v7  ;;  %v7319_v7 = vcombine.high %v2863_v2, %v2879_v3 }
 0x4c9   :  { %6204 = vmatprep.subr.bf16.mxu0 %v7319_v7  ;;  %v3119_v7 = vld [vmem:[#allocation13 + $0xd30] sm:$0xff] }
 0x4ca   :  { %2643 = vmatpush1.bf16.msra.mxu1 %v8169_v8  ;;  %v2889_v8 = vld [vmem:[#allocation13 + $0x600] sm:$0xff] }
 0x4cb   :  { %2644 = vmatprep.subr.bf16.mxu1 %v8174_v9  ;;  %v2905_v9 = vld [vmem:[#allocation13 + $0x680] sm:$0xff] }
 0x4ce   :  { %2645 = vmatpush1.bf16.msra.mxu1 %v8172_v10  ;;  %v2895_v10 = vld [vmem:[#allocation13 + $0x630] sm:$0xff] }
 0x4cf   :  { %2646 = vmatprep.subr.bf16.mxu1 %v8177_v11  ;;  %v2911_v11 = vld [vmem:[#allocation13 + $0x6b0] sm:$0xff] }
 0x4d2   :  { %2647 = vmatpush1.bf16.msra.mxu1 %v8175_v13  ;;  %v7306_v13 = vcombine.low %v2857_v0, %v2873_v1  ;;  %v3103_v1 = vld [vmem:[#allocation13 + $0xcb0] sm:$0xff] }
 0x4d3   :  { %2648 = vmatprep.subr.bf16.mxu1 %v8180_v14  ;;  %v7318_v14 = vcombine.low %v2863_v2, %v2879_v3  ;;  %v7542_v3 = vcombine.low %v3087_v63, %v3103_v1 }
 0x4d5   :  { %6205 = vmatpush1.bf16.msra.mxu0 %v7318_v14  ;;  %v3145_v14 = vld [vmem:[#allocation13 + $0xe00] sm:$0xff] }
 0x4d6   :  { %2649 = vmatpush1.bf16.msra.mxu1 %v8178_v16  ;;  %v7339_v16 = vcombine.high %v2889_v8, %v2905_v9 }
 0x4d7   :  { %2650 = vmatprep.subr.bf16.mxu1 %v8183_v15  ;;  %v7351_v15 = vcombine.high %v2895_v10, %v2911_v11 }
 0x4d9   :  { %6206 = vmatprep.subr.bf16.mxu0 %v7351_v15  ;;  %v3151_v15 = vld [vmem:[#allocation13 + $0xe30] sm:$0xff] }
 0x4da   :  { %2651 = vmatpush1.bf16.msra.mxu1 %v8181_v17  ;;  %v2921_v17 = vld [vmem:[#allocation13 + $0x700] sm:$0xff] }
 0x4db   :  { %2652 = vmatprep.subr.bf16.mxu1 %v8186_v18  ;;  %v2937_v18 = vld [vmem:[#allocation13 + $0x780] sm:$0xff] }
 0x4dc   :  { %v7370_v30 = vcombine.low %v2921_v17, %v2937_v18 }
 0x4de   :  { %2653 = vmatpush1.bf16.msra.mxu1 %v8184_v19  ;;  %v2927_v19 = vld [vmem:[#allocation13 + $0x730] sm:$0xff] }
 0x4df   :  { %2654 = vmatprep.subr.bf16.mxu1 %v8189_v21  ;;  %v2943_v21 = vld [vmem:[#allocation13 + $0x7b0] sm:$0xff] }
 0x4e0   :  { %v7383_v25 = vcombine.high %v2927_v19, %v2943_v21  ;;  %v7382_v31 = vcombine.low %v2927_v19, %v2943_v21 }
 0x4e2   :  { %2655 = vmatpush1.bf16.msra.mxu1 %v8187_v22  ;;  %v7338_v22 = vcombine.low %v2889_v8, %v2905_v9  ;;  %v3135_v9 = vld [vmem:[#allocation13 + $0xdb0] sm:$0xff] }
 0x4e3   :  { %2656 = vmatprep.subr.bf16.mxu1 %v8192_v23  ;;  %v7350_v23 = vcombine.low %v2895_v10, %v2911_v11  ;;  %v7574_v11 = vcombine.low %v3119_v7, %v3135_v9 }
 0x4e5   :  { %6207 = vmatpush1.bf16.msra.mxu0 %v7350_v23  ;;  %v3177_v23 = vld [vmem:[#allocation13 + $0xf00] sm:$0xff] }
 0x4e6   :  { %2657 = vmatpush1.bf16.msra.mxu1 %v8190_v24  ;;  %v7371_v24 = vcombine.high %v2921_v17, %v2937_v18  ;;  %6208 = vmatprep.subr.bf16.mxu0 %v7383_v25  ;;  %v3167_v18 = vld [vmem:[#allocation13 + $0xeb0] sm:$0xff] }
 0x4e7   :  { %5948 = vmatprep.subr.bf16.mxu1 %v7147_v29  ;;  %v2975_v29 = vld [vmem:[#allocation13 + $0x8b0] sm:$0xff]  ;;  %v7606_v21 = vcombine.low %v3151_v15, %v3167_v18 }
 0x4e8   :  { %v3183_v25 = vld [vmem:[#allocation13 + $0xf30] sm:$0xff] }
 0x4e9   :  { %2659 = vmatmul.mubr.bf16.vlgmr.msra.gmra.mrb[4].mxu1 %v8662_v56  ;;  %v2825_v56 = vld [vmem:[#allocation13 + $0x400] sm:$0xff]  ;;  %6209 = vmatpush1.bf16.msra.mxu0 %v7382_v31  ;;  %v2698_v31 = vld [vmem:[#allocation13 + $0x8] sm:$0xff] }
 0x4ea   :  { %5949 = vmatpush1.bf16.msra.mxu1 %v7146_v28  ;;  %v7275_v62 = vcombine.high %v2825_v56, %v2841_v57  ;;  %v7274_v4 = vcombine.low %v2825_v56, %v2841_v57  ;;  %v2959_v28 = vld [vmem:[#allocation13 + $0x830] sm:$0xff] }
 0x4eb   :  { %5950 = vmatprep.subr.bf16.mxu1 %v7179_v35  ;;  %v7415_v33 = vcombine.high %v2959_v28, %v2975_v29  ;;  %v3001_v35 = vld [vmem:[#allocation13 + $0x980] sm:$0xff]  ;;  %v7414_v38 = vcombine.low %v2959_v28, %v2975_v29  ;;  %v3071_v57 = vld [vmem:[#allocation13 + $0xbb0] sm:$0xff]  ;;  %v7638_v29 = vcombine.low %v3183_v25, %v3199_v27 }
 0x4ec   :  { %v7435_v39 = vcombine.high %v2985_v34, %v3001_v35  ;;  %v7434_v47 = vcombine.low %v2985_v34, %v3001_v35  ;;  %v7510_v59 = vcombine.low %v3055_v55, %v3071_v57  ;;  %v2721_v35 = vld [vmem:[#allocation13 + $0xc0] sm:$0xff] }
 0x4ed   :  { %6210 = vmatprep.subr.bf16.mxu0 %v7415_v33  ;;  %v2705_v33 = vld [vmem:[#allocation13 + $0x40] sm:$0xff] }
 0x4ee   :  { %5951 = vmatpush1.bf16.msra.mxu1 %v7178_v44  ;;  %v3033_v44 = vld [vmem:[#allocation13 + $0xa80] sm:$0xff]  ;;  %6211 = vmatpush1.bf16.msra.mxu0 %v7414_v38  ;;  %v7162_v37 = vcombine.low %v2705_v33, %v2721_v35  ;;  %v2243_v38 = vld [vmem:[#allocation11] sm:$0xf] }
 0x4ef   :  { %5952 = vmatprep.subr.bf16.mxu1 %v7211_v46  ;;  %v3039_v46 = vld [vmem:[#allocation13 + $0xab0] sm:$0xff]  ;;  %v7467_v49 = vcombine.high %v3017_v42, %v3033_v44  ;;  %6212 = vmatprep.subr.bf16.mxu0 %v7447_v40  ;;  %v7466_v51 = vcombine.low %v3017_v42, %v3033_v44  ;;  %v2252_v40 = vrot.slane %v2243_v38, %v8650_v43 }
 0x4f0   :  { %v7479_v50 = vcombine.high %v3023_v45, %v3039_v46 }
 0x4f2   :  { %5953 = vmatpush1.bf16.msra.mxu1 %v7210_v52  ;;  %6213 = vmatpush1.bf16.msra.mxu0 %v7446_v48  ;;  %v7478_v52 = vcombine.low %v3023_v45, %v3039_v46 }
 0x4f3   :  { %5954 = vmatprep.subr.bf16.mxu1 %v7243_v54  ;;  %6214 = vmatprep.subr.bf16.mxu0 %v7479_v50  ;;  %v3065_v54 = vld [vmem:[#allocation13 + $0xb80] sm:$0xff]  ;;  %v8669_v50 = vsub.s32 2, %v8563_v12 }
 0x4f4   :  { %v7499_v56 = vcombine.high %v3049_v53, %v3065_v54  ;;  %v7498_v58 = vcombine.low %v3049_v53, %v3065_v54 }
 0x4f5   :  { %v2256_v54 = vrot.slane %v2243_v38, %v8669_v50 }
 0x4f6   :  { %5955 = vmatpush1.bf16.msra.mxu1 %v7242_v60  ;;  %6215 = vmatpush1.bf16.msra.mxu0 %v7478_v52  ;;  %v7511_v60 = vcombine.high %v3055_v55, %v3071_v57  ;;  %v8399_v52 = vmov 1983009808  }
 0x4f7   :  { %5956 = vmatprep.subr.bf16.mxu1 %v7275_v62  ;;  %v3097_v62 = vld [vmem:[#allocation13 + $0xc80] sm:$0xff]  ;;  %v2687_v53 = vunpack.c.l.s4 %v8399_v52 }
 0x4f8   :  { %6216 = vmatprep.subr.bf16.mxu0 %v7511_v60  ;;  %v7531_v0 = vcombine.high %v3081_v61, %v3097_v62  ;;  %v7530_v2 = vcombine.low %v3081_v61, %v3097_v62 }
 0x4fa   :  { %5957 = vmatpush1.bf16.msra.mxu1 %v7274_v4  ;;  %6217 = vmatpush1.bf16.msra.mxu0 %v7510_v59  ;;  %v7543_v4 = vcombine.high %v3087_v63, %v3103_v1 }
 0x4fb   :  { %5958 = vmatprep.subr.bf16.mxu1 %v7307_v6  ;;  %v3129_v6 = vld [vmem:[#allocation13 + $0xd80] sm:$0xff] }
 0x4fc   :  { %6218 = vmatprep.subr.bf16.mxu0 %v7543_v4  ;;  %v7563_v8 = vcombine.high %v3113_v5, %v3129_v6  ;;  %v7562_v10 = vcombine.low %v3113_v5, %v3129_v6  ;;  %v2746_v4 = vld [vmem:[#allocation13 + $0x188] sm:$0xff]  ;;  %v2737_v6 = vld [vmem:[#allocation13 + $0x140] sm:$0xff] }
 0x4fe   :  { %5959 = vmatpush1.bf16.msra.mxu1 %v7306_v13  ;;  %6219 = vmatpush1.bf16.msra.mxu0 %v7542_v3  ;;  %v7575_v13 = vcombine.high %v3119_v7, %v3135_v9  ;;  %v2730_v3 = vld [vmem:[#allocation13 + $0x108] sm:$0xff]  ;;  %v2753_v7 = vld [vmem:[#allocation13 + $0x1c0] sm:$0xff] }
 0x4ff   :  { %5960 = vmatprep.subr.bf16.mxu1 %v7339_v16  ;;  %v3161_v16 = vld [vmem:[#allocation13 + $0xe80] sm:$0xff]  ;;  %v2762_v9 = vld [vmem:[#allocation13 + $0x208] sm:$0xff] }
 0x500   :  { %6220 = vmatprep.subr.bf16.mxu0 %v7575_v13  ;;  %v7595_v17 = vcombine.high %v3145_v14, %v3161_v16  ;;  %v7594_v19 = vcombine.low %v3145_v14, %v3161_v16  ;;  %v2778_v13 = vld [vmem:[#allocation13 + $0x288] sm:$0xff]  ;;  %v2769_v14 = vld [vmem:[#allocation13 + $0x240] sm:$0xff] }
 0x501   :  { %v2785_v16 = vld [vmem:[#allocation13 + $0x2c0] sm:$0xff] }
 0x502   :  { %5961 = vmatpush1.bf16.msra.mxu1 %v7338_v22  ;;  %6221 = vmatpush1.bf16.msra.mxu0 %v7574_v11  ;;  %v7607_v22 = vcombine.high %v3151_v15, %v3167_v18  ;;  %v7195_v11 = vcombine.high %v2737_v6, %v2753_v7  ;;  %v7180_v15 = vcombine.low %v2730_v3, %v2746_v4 }
 0x503   :  { %5962 = vmatprep.subr.bf16.mxu1 %v7371_v24  ;;  %v3193_v24 = vld [vmem:[#allocation13 + $0xf80] sm:$0xff]  ;;  %v7213_v18 = vcombine.high %v2762_v9, %v2778_v13 }
 0x504   :  { %6222 = vmatprep.subr.bf16.mxu0 %v7607_v22  ;;  %v7627_v26 = vcombine.high %v3177_v23, %v3193_v24  ;;  %v7626_v28 = vcombine.low %v3177_v23, %v3193_v24  ;;  %v2810_v22 = vld [vmem:[#allocation13 + $0x388] sm:$0xff]  ;;  %v2801_v23 = vld [vmem:[#allocation13 + $0x340] sm:$0xff] }
 0x505   :  { %v2817_v24 = vld [vmem:[#allocation13 + $0x3c0] sm:$0xff] }
 0x506   :  { %5963 = vmatpush1.bf16.msra.mxu1 %v7370_v30  ;;  %6223 = vmatpush1.bf16.msra.mxu0 %v7606_v21  ;;  %v7639_v30 = vcombine.high %v3183_v25, %v3199_v27  ;;  %v2794_v21 = vld [vmem:[#allocation13 + $0x308] sm:$0xff]  ;;  %v7212_v25 = vcombine.low %v2762_v9, %v2778_v13 }
 0x507   :  { %5964 = vmatprep.subr.bf16.mxu1 %v7403_v32  ;;  %v2714_v32 = vld [vmem:[#allocation13 + $0x88] sm:$0xff]  ;;  %v7245_v27 = vcombine.high %v2794_v21, %v2810_v22 }
 0x508   :  { %6224 = vmatprep.subr.bf16.mxu0 %v7639_v30  ;;  %v7149_v34 = vcombine.high %v2698_v31, %v2714_v32  ;;  %v7148_v36 = vcombine.low %v2698_v31, %v2714_v32  ;;  %v2842_v30 = vld [vmem:[#allocation13 + $0x488] sm:$0xff]  ;;  %v2833_v31 = vld [vmem:[#allocation13 + $0x440] sm:$0xff] }
 0x509   :  { %v2849_v32 = vld [vmem:[#allocation13 + $0x4c0] sm:$0xff]  ;;  %v3002_v13 = vld [vmem:[#allocation13 + $0x988] sm:$0xff] }
 0x50a   :  { %5965 = vmatpush1.bf16.msra.mxu1 %v7402_v20  ;;  %6225 = vmatpush1.bf16.msra.mxu0 %v7638_v29  ;;  %v7163_v20 = vcombine.high %v2705_v33, %v2721_v35  ;;  %v2826_v29 = vld [vmem:[#allocation13 + $0x408] sm:$0xff]  ;;  %v7244_v33 = vcombine.low %v2794_v21, %v2810_v22 }
 0x50b   :  { %5966 = vmatprep.subr.bf16.mxu1 %v7435_v39  ;;  %v2248_v39 = vrot.slane %v2243_v38, %v8647_v41  ;;  %v7277_v35 = vcombine.high %v2826_v29, %v2842_v30  ;;  %v3018_v21 = vld [vmem:[#allocation13 + $0xa08] sm:$0xff] }
 0x50c   :  { %6276 = vmatprep.subr.bf16.mxu0 %v7163_v20  ;;  %v2874_v20 = vld [vmem:[#allocation13 + $0x588] sm:$0xff] }
 0x50d   :  { %v3034_v22 = vld [vmem:[#allocation13 + $0xa88] sm:$0xff] }
 0x50e   :  { %5967 = vmatpush1.bf16.msra.mxu1 %v7434_v47 }
 0x50f   :  { %5968 = vmatprep.subr.bf16.mxu1 %v7467_v49 }
 0x512   :  { %5969 = vmatpush1.bf16.msra.mxu1 %v7466_v51  ;;  %v8672_v51 = vsub.s32 3, %v8563_v12 }
 0x513   :  { %5970 = vmatprep.subr.bf16.mxu1 %v7499_v56  ;;  %v2688_v56 = vunpack.c.0.s8 %v2687_v53 }
 0x514   :  { %v2260_v55 = vrot.slane %v2243_v38, %v8672_v51  ;;  %v2865_v38 = vld [vmem:[#allocation13 + $0x540] sm:$0xff] }
 0x515   :  { %v8677_v61 = vsub.s32 %v2688_v56, %v8563_v12  ;;  %v2922_v56 = vld [vmem:[#allocation13 + $0x708] sm:$0xff] }
 0x516   :  { %5971 = vmatpush1.bf16.msra.mxu1 %v7498_v58 }
 0x517   :  { %5972 = vmatprep.subr.bf16.mxu1 %v7531_v0 }
 0x51a   :  { %5973 = vmatpush1.bf16.msra.mxu1 %v7530_v2 }
 0x51b   :  { %5974 = vmatprep.subr.bf16.mxu1 %v7563_v8 }
 0x51e   :  { %5975 = vmatpush1.bf16.msra.mxu1 %v7562_v10  ;;  %v7181_v10 = vcombine.high %v2730_v3, %v2746_v4  ;;  %v2961_v3 = vld [vmem:[#allocation13 + $0x840] sm:$0xff] }
 0x51f   :  { %5976 = vmatprep.subr.bf16.mxu1 %v7595_v17  ;;  %v7194_v17 = vcombine.low %v2737_v6, %v2753_v7  ;;  %v2977_v4 = vld [vmem:[#allocation13 + $0x8c0] sm:$0xff] }
 0x522   :  { %5977 = vmatpush1.bf16.msra.mxu1 %v7594_v19  ;;  %v7227_v19 = vcombine.high %v2769_v14, %v2785_v16 }
 0x523   :  { %5978 = vmatprep.subr.bf16.mxu1 %v7627_v26  ;;  %v7226_v26 = vcombine.low %v2769_v14, %v2785_v16  ;;  %v2993_v14 = vld [vmem:[#allocation13 + $0x940] sm:$0xff] }
 0x524   :  { %v3009_v16 = vld [vmem:[#allocation13 + $0x9c0] sm:$0xff] }
 0x526   :  { %5979 = vmatpush1.bf16.msra.mxu1 %v7626_v28  ;;  %v7259_v28 = vcombine.high %v2801_v23, %v2817_v24 }
 0x527   :  { %5989 = vmatprep.subr.bf16.mxu1 %v7149_v34  ;;  %v7258_v34 = vcombine.low %v2801_v23, %v2817_v24  ;;  %v3025_v23 = vld [vmem:[#allocation13 + $0xa40] sm:$0xff] }
 0x528   :  { %v3041_v24 = vld [vmem:[#allocation13 + $0xac0] sm:$0xff] }
 0x57c   :  { %v2619_v42 = vpop.f32.mrb[0].mxu1 }
 0x57d   :  { %v2620_v44 = vadd.f32 %v2619_v42, %v2248_v39  ;;  %v2621_v45 = vpop.f32.mrb[1].mxu1  ;;  %v2881_v39 = vld [vmem:[#allocation13 + $0x5c0] sm:$0xff]  ;;  %v7290_v42 = vcombine.low %v2833_v31, %v2849_v32 }
 0x57e   :  { %v2622_v46 = vadd.f32 %v2621_v45, %v2252_v40  ;;  %v2623_v47 = vpop.f32.mrb[2].mxu1  ;;  %v7276_v40 = vcombine.low %v2826_v29, %v2842_v30  ;;  %v7323_v45 = vcombine.high %v2865_v38, %v2881_v39  ;;  %v7322_v53 = vcombine.low %v2865_v38, %v2881_v39  ;;  %v3050_v29 = vld [vmem:[#allocation13 + $0xb08] sm:$0xff]  ;;  %v3089_v38 = vld [vmem:[#allocation13 + $0xc40] sm:$0xff] }
 0x57f   :  { %v2624_v48 = vpop.f32.mrb[3].mxu1  ;;  %v2906_v47 = vld [vmem:[#allocation13 + $0x688] sm:$0xff]  ;;  %v3105_v39 = vld [vmem:[#allocation13 + $0xcc0] sm:$0xff] }
 0x580   :  { %v7142_v49 = vpack.c.bf16 %v2622_v46, %v2620_v44  ;;  %v2890_v46 = vld [vmem:[#allocation13 + $0x608] sm:$0xff]  ;;  %v2897_v48 = vld [vmem:[#allocation13 + $0x640] sm:$0xff] }
 0x581   :  { %v3066_v30 = vld [vmem:[#allocation13 + $0xb88] sm:$0xff] }
 0x582   :  { %7143 = vst.sshfl [vmem:[#allocation2] sm:$0x11 pattern:$0x76325410] %v7142_v49  ;;  %v2913_v49 = vld [vmem:[#allocation13 + $0x6c0] sm:$0xff] }
 0x5bc   :  { %v2660_v57 = vpop.f32.mrb[4].mxu1 }
 0x5bd   :  { %v2661_v58 = vadd.f32 %v2660_v57, %v2256_v54  ;;  %v2662_v59 = vpop.f32.mrb[5].mxu1  ;;  %v7341_v54 = vcombine.high %v2890_v46, %v2906_v47  ;;  %v2938_v57 = vld [vmem:[#allocation13 + $0x788] sm:$0xff] }
 0x5be   :  { %v2663_v60 = vadd.f32 %v2662_v59, %v2260_v55  ;;  %v2664_v62 = vpop.f32.mrb[6].mxu1  ;;  %v7355_v55 = vcombine.high %v2897_v48, %v2913_v49  ;;  %v2945_v59 = vld [vmem:[#allocation13 + $0x7c0] sm:$0xff]  ;;  %v7372_v6 = vcombine.low %v2922_v56, %v2938_v57 }
 0x5bf   :  { %v2665_v63 = vpop.f32.mrb[7].mxu1  ;;  %v7354_v62 = vcombine.low %v2897_v48, %v2913_v49  ;;  %v3121_v48 = vld [vmem:[#allocation13 + $0xd40] sm:$0xff] }
 0x5c0   :  { %v7144_v0 = vpack.c.bf16 %v2663_v60, %v2661_v58  ;;  %v2929_v58 = vld [vmem:[#allocation13 + $0x740] sm:$0xff]  ;;  %v7340_v60 = vcombine.low %v2890_v46, %v2906_v47  ;;  %v7373_v63 = vcombine.high %v2922_v56, %v2938_v57  ;;  %v3114_v46 = vld [vmem:[#allocation13 + $0xd08] sm:$0xff] }
 0x5c1   :  { %v7386_v7 = vcombine.low %v2929_v58, %v2945_v59  ;;  %v3130_v47 = vld [vmem:[#allocation13 + $0xd88] sm:$0xff]  ;;  %v3137_v49 = vld [vmem:[#allocation13 + $0xdc0] sm:$0xff] }
 0x5c2   :  { %v2692_v1 = vrot.slane %v7144_v0, %v8677_v61  ;;  %v7387_v0 = vcombine.high %v2929_v58, %v2945_v59  ;;  %v3146_v56 = vld [vmem:[#allocation13 + $0xe08] sm:$0xff]  ;;  %v3153_v58 = vld [vmem:[#allocation13 + $0xe40] sm:$0xff] }
 0x5c3   :  { %v3162_v57 = vld [vmem:[#allocation13 + $0xe88] sm:$0xff]  ;;  %v3169_v59 = vld [vmem:[#allocation13 + $0xec0] sm:$0xff] }
 0x5c4   :  { %v2693_v2 = vrot.slane %v2692_v1, 7  ;;  %v2954_v1 = vld [vmem:[#allocation13 + $0x808] sm:$0xff] }
 0x5c6   :  { %2695 = vst [vmem:[#allocation2] sm:$0xa] %v2693_v2  ;;  %v2970_v2 = vld [vmem:[#allocation13 + $0x888] sm:$0xff] }
 0x5c7   :  { %v7405_v9 = vcombine.high %v2954_v1, %v2970_v2 }
 0x5cd   :  { %v8680_v5 = vld.sshfl [vmem:[#allocation2] sm:$0x33 pattern:$0x76325410] }
 0x5ce   :  { %v8684_v8 = vcombine.high %v8680_v5, %v8680_v5 }
 0x5d0   :  { %5980 = vmatprep.mubr.bf16.mxu1 %v8684_v8  ;;  %6226 = vmatprep.mubr.bf16.mxu0 %v8684_v8 }
 0x5d1   :  { %5981 = vmatmul.mubr.bf16.vlgmr.msra.gmra.mrb[8].mxu1 %v8680_v5  ;;  %6227 = vmatmul.mubr.bf16.vlgmr.msra.gmra.mrb[4].mxu0 %v8680_v5 }
 0x5d2   :  { %5990 = vmatpush1.bf16.msra.mxu1 %v7148_v36  ;;  %6277 = vmatpush1.bf16.msra.mxu0 %v7162_v37  ;;  %v7291_v36 = vcombine.high %v2833_v31, %v2849_v32  ;;  %v2858_v37 = vld [vmem:[#allocation13 + $0x508] sm:$0xff]  ;;  %v3057_v31 = vld [vmem:[#allocation13 + $0xb40] sm:$0xff] }
 0x5d3   :  { %6021 = vmatprep.mubr.bf16.mxu1 %v8684_v8  ;;  %6308 = vmatprep.mubr.bf16.mxu0 %v8684_v8  ;;  %v7309_v44 = vcombine.high %v2858_v37, %v2874_v20  ;;  %v7308_v52 = vcombine.low %v2858_v37, %v2874_v20  ;;  %v3073_v32 = vld [vmem:[#allocation13 + $0xbc0] sm:$0xff]  ;;  %v3082_v37 = vld [vmem:[#allocation13 + $0xc08] sm:$0xff] }
 0x5d4   :  { %5991 = vmatprep.subr.bf16.mxu1 %v7181_v10  ;;  %6278 = vmatprep.subr.bf16.mxu0 %v7195_v11  ;;  %v7419_v10 = vcombine.high %v2961_v3, %v2977_v4  ;;  %v2986_v11 = vld [vmem:[#allocation13 + $0x908] sm:$0xff] }
 0x5d5   :  { %v3098_v20 = vld [vmem:[#allocation13 + $0xc88] sm:$0xff] }
 0x5d6   :  { %5992 = vmatpush1.bf16.msra.mxu1 %v7180_v15  ;;  %6279 = vmatpush1.bf16.msra.mxu0 %v7194_v17  ;;  %v7404_v15 = vcombine.low %v2954_v1, %v2970_v2  ;;  %v7418_v17 = vcombine.low %v2961_v3, %v2977_v4  ;;  %v3178_v1 = vld [vmem:[#allocation13 + $0xf08] sm:$0xff]  ;;  %v3185_v3 = vld [vmem:[#allocation13 + $0xf40] sm:$0xff] }
 0x5d7   :  { %5993 = vmatprep.subr.bf16.mxu1 %v7213_v18  ;;  %6280 = vmatprep.subr.bf16.mxu0 %v7227_v19  ;;  %v7437_v18 = vcombine.high %v2986_v11, %v3002_v13  ;;  %v7451_v19 = vcombine.high %v2993_v14, %v3009_v16  ;;  %v3194_v2 = vld [vmem:[#allocation13 + $0xf88] sm:$0xff]  ;;  %v3201_v4 = vld [vmem:[#allocation13 + $0xfc0] sm:$0xff] }
 0x5da   :  { %5994 = vmatpush1.bf16.msra.mxu1 %v7212_v25  ;;  %6281 = vmatpush1.bf16.msra.mxu0 %v7226_v26  ;;  %v7436_v25 = vcombine.low %v2986_v11, %v3002_v13  ;;  %v7450_v26 = vcombine.low %v2993_v14, %v3009_v16  ;;  %v2699_v11 = vld [vmem:[#allocation13 + $0x10] sm:$0xff] }
 0x5db   :  { %5995 = vmatprep.subr.bf16.mxu1 %v7245_v27  ;;  %6282 = vmatprep.subr.bf16.mxu0 %v7259_v28  ;;  %v7469_v27 = vcombine.high %v3018_v21, %v3034_v22  ;;  %v7483_v28 = vcombine.high %v3025_v23, %v3041_v24  ;;  %v2715_v13 = vld [vmem:[#allocation13 + $0x90] sm:$0xff] }
 0x5dc   :  { %v2707_v14 = vld [vmem:[#allocation13 + $0x50] sm:$0xff] }
 0x5dd   :  { %v2723_v16 = vld [vmem:[#allocation13 + $0xd0] sm:$0xff] }
 0x5de   :  { %5996 = vmatpush1.bf16.msra.mxu1 %v7244_v33  ;;  %6283 = vmatpush1.bf16.msra.mxu0 %v7258_v34  ;;  %v7468_v33 = vcombine.low %v3018_v21, %v3034_v22  ;;  %v7482_v34 = vcombine.low %v3025_v23, %v3041_v24  ;;  %v2731_v21 = vld [vmem:[#allocation13 + $0x110] sm:$0xff] }
 0x5df   :  { %5997 = vmatprep.subr.bf16.mxu1 %v7277_v35  ;;  %6284 = vmatprep.subr.bf16.mxu0 %v7291_v36  ;;  %v7501_v35 = vcombine.high %v3050_v29, %v3066_v30  ;;  %v7515_v36 = vcombine.high %v3057_v31, %v3073_v32  ;;  %v2747_v22 = vld [vmem:[#allocation13 + $0x190] sm:$0xff] }
 0x5e0   :  { %v2739_v23 = vld [vmem:[#allocation13 + $0x150] sm:$0xff] }
 0x5e1   :  { %v2755_v24 = vld [vmem:[#allocation13 + $0x1d0] sm:$0xff] }
 0x5e2   :  { %5998 = vmatpush1.bf16.msra.mxu1 %v7276_v40  ;;  %6285 = vmatpush1.bf16.msra.mxu0 %v7290_v42  ;;  %v7500_v40 = vcombine.low %v3050_v29, %v3066_v30  ;;  %v7514_v42 = vcombine.low %v3057_v31, %v3073_v32  ;;  %v2763_v29 = vld [vmem:[#allocation13 + $0x210] sm:$0xff] }
 0x5e3   :  { %5999 = vmatprep.subr.bf16.mxu1 %v7309_v44  ;;  %6286 = vmatprep.subr.bf16.mxu0 %v7323_v45  ;;  %v7533_v44 = vcombine.high %v3082_v37, %v3098_v20  ;;  %v7547_v45 = vcombine.high %v3089_v38, %v3105_v39  ;;  %v2779_v30 = vld [vmem:[#allocation13 + $0x290] sm:$0xff] }
 0x5e4   :  { %v2771_v31 = vld [vmem:[#allocation13 + $0x250] sm:$0xff] }
 0x5e5   :  { %v2787_v32 = vld [vmem:[#allocation13 + $0x2d0] sm:$0xff] }
 0x5e6   :  { %6000 = vmatpush1.bf16.msra.mxu1 %v7308_v52  ;;  %6287 = vmatpush1.bf16.msra.mxu0 %v7322_v53  ;;  %v7532_v52 = vcombine.low %v3082_v37, %v3098_v20  ;;  %v7546_v53 = vcombine.low %v3089_v38, %v3105_v39  ;;  %v2795_v37 = vld [vmem:[#allocation13 + $0x310] sm:$0xff] }
 0x5e7   :  { %6001 = vmatprep.subr.bf16.mxu1 %v7341_v54  ;;  %6288 = vmatprep.subr.bf16.mxu0 %v7355_v55  ;;  %v7565_v54 = vcombine.high %v3114_v46, %v3130_v47  ;;  %v7579_v55 = vcombine.high %v3121_v48, %v3137_v49  ;;  %v2811_v20 = vld [vmem:[#allocation13 + $0x390] sm:$0xff] }
 0x5e8   :  { %v2803_v38 = vld [vmem:[#allocation13 + $0x350] sm:$0xff] }
 0x5e9   :  { %v2819_v39 = vld [vmem:[#allocation13 + $0x3d0] sm:$0xff] }
 0x5ea   :  { %6002 = vmatpush1.bf16.msra.mxu1 %v7340_v60  ;;  %6289 = vmatpush1.bf16.msra.mxu0 %v7354_v62  ;;  %v7564_v60 = vcombine.low %v3114_v46, %v3130_v47  ;;  %v7578_v62 = vcombine.low %v3121_v48, %v3137_v49  ;;  %v2827_v46 = vld [vmem:[#allocation13 + $0x410] sm:$0xff] }
 0x5eb   :  { %6003 = vmatprep.subr.bf16.mxu1 %v7373_v63  ;;  %6290 = vmatprep.subr.bf16.mxu0 %v7387_v0  ;;  %v7597_v63 = vcombine.high %v3146_v56, %v3162_v57  ;;  %v7611_v0 = vcombine.high %v3153_v58, %v3169_v59  ;;  %v2843_v47 = vld [vmem:[#allocation13 + $0x490] sm:$0xff] }
 0x5ec   :  { %v2835_v48 = vld [vmem:[#allocation13 + $0x450] sm:$0xff] }
 0x5ed   :  { %v2851_v49 = vld [vmem:[#allocation13 + $0x4d0] sm:$0xff] }
 0x5ee   :  { %6004 = vmatpush1.bf16.msra.mxu1 %v7372_v6  ;;  %6291 = vmatpush1.bf16.msra.mxu0 %v7386_v7  ;;  %v7596_v6 = vcombine.low %v3146_v56, %v3162_v57  ;;  %v7610_v7 = vcombine.low %v3153_v58, %v3169_v59  ;;  %v2859_v56 = vld [vmem:[#allocation13 + $0x510] sm:$0xff] }
 0x5ef   :  { %6005 = vmatprep.subr.bf16.mxu1 %v7405_v9  ;;  %6292 = vmatprep.subr.bf16.mxu0 %v7419_v10  ;;  %v7629_v9 = vcombine.high %v3178_v1, %v3194_v2  ;;  %v7643_v10 = vcombine.high %v3185_v3, %v3201_v4  ;;  %v2875_v57 = vld [vmem:[#allocation13 + $0x590] sm:$0xff] }
 0x5f0   :  { %v2867_v58 = vld [vmem:[#allocation13 + $0x550] sm:$0xff] }
 0x5f1   :  { %v2883_v59 = vld [vmem:[#allocation13 + $0x5d0] sm:$0xff] }
 0x5f2   :  { %6006 = vmatpush1.bf16.msra.mxu1 %v7404_v15  ;;  %6293 = vmatpush1.bf16.msra.mxu0 %v7418_v17  ;;  %v7628_v15 = vcombine.low %v3178_v1, %v3194_v2  ;;  %v7642_v17 = vcombine.low %v3185_v3, %v3201_v4  ;;  %v2891_v1 = vld [vmem:[#allocation13 + $0x610] sm:$0xff] }
 0x5f3   :  { %6007 = vmatprep.subr.bf16.mxu1 %v7437_v18  ;;  %6294 = vmatprep.subr.bf16.mxu0 %v7451_v19  ;;  %v7151_v18 = vcombine.high %v2699_v11, %v2715_v13  ;;  %v7167_v19 = vcombine.high %v2707_v14, %v2723_v16  ;;  %v2907_v2 = vld [vmem:[#allocation13 + $0x690] sm:$0xff] }
 0x5f4   :  { %v2899_v3 = vld [vmem:[#allocation13 + $0x650] sm:$0xff] }
 0x5f5   :  { %v2915_v4 = vld [vmem:[#allocation13 + $0x6d0] sm:$0xff] }
 0x5f6   :  { %6008 = vmatpush1.bf16.msra.mxu1 %v7436_v25  ;;  %6295 = vmatpush1.bf16.msra.mxu0 %v7450_v26  ;;  %v7150_v25 = vcombine.low %v2699_v11, %v2715_v13  ;;  %v7166_v26 = vcombine.low %v2707_v14, %v2723_v16  ;;  %v2923_v11 = vld [vmem:[#allocation13 + $0x710] sm:$0xff] }
 0x5f7   :  { %6009 = vmatprep.subr.bf16.mxu1 %v7469_v27  ;;  %6296 = vmatprep.subr.bf16.mxu0 %v7483_v28  ;;  %v7183_v27 = vcombine.high %v2731_v21, %v2747_v22  ;;  %v7199_v28 = vcombine.high %v2739_v23, %v2755_v24  ;;  %v2939_v13 = vld [vmem:[#allocation13 + $0x790] sm:$0xff] }
 0x5f8   :  { %v2931_v14 = vld [vmem:[#allocation13 + $0x750] sm:$0xff] }
 0x5f9   :  { %v2947_v16 = vld [vmem:[#allocation13 + $0x7d0] sm:$0xff] }
 0x5fa   :  { %6010 = vmatpush1.bf16.msra.mxu1 %v7468_v33  ;;  %6297 = vmatpush1.bf16.msra.mxu0 %v7482_v34  ;;  %v7182_v33 = vcombine.low %v2731_v21, %v2747_v22  ;;  %v7198_v34 = vcombine.low %v2739_v23, %v2755_v24  ;;  %v2955_v21 = vld [vmem:[#allocation13 + $0x810] sm:$0xff] }
 0x5fb   :  { %6011 = vmatprep.subr.bf16.mxu1 %v7501_v35  ;;  %6298 = vmatprep.subr.bf16.mxu0 %v7515_v36  ;;  %v7215_v35 = vcombine.high %v2763_v29, %v2779_v30  ;;  %v7231_v36 = vcombine.high %v2771_v31, %v2787_v32  ;;  %v2971_v22 = vld [vmem:[#allocation13 + $0x890] sm:$0xff] }
 0x5fc   :  { %v2963_v23 = vld [vmem:[#allocation13 + $0x850] sm:$0xff] }
 0x5fd   :  { %v2979_v24 = vld [vmem:[#allocation13 + $0x8d0] sm:$0xff] }
 0x5fe   :  { %6012 = vmatpush1.bf16.msra.mxu1 %v7500_v40  ;;  %6299 = vmatpush1.bf16.msra.mxu0 %v7514_v42  ;;  %v7214_v40 = vcombine.low %v2763_v29, %v2779_v30  ;;  %v7230_v42 = vcombine.low %v2771_v31, %v2787_v32  ;;  %v2987_v29 = vld [vmem:[#allocation13 + $0x910] sm:$0xff] }
 0x5ff   :  { %6013 = vmatprep.subr.bf16.mxu1 %v7533_v44  ;;  %6300 = vmatprep.subr.bf16.mxu0 %v7547_v45  ;;  %v7247_v44 = vcombine.high %v2795_v37, %v2811_v20  ;;  %v7263_v45 = vcombine.high %v2803_v38, %v2819_v39  ;;  %v3003_v30 = vld [vmem:[#allocation13 + $0x990] sm:$0xff] }
 0x600   :  { %v2995_v31 = vld [vmem:[#allocation13 + $0x950] sm:$0xff] }
 0x601   :  { %v3011_v32 = vld [vmem:[#allocation13 + $0x9d0] sm:$0xff] }
 0x602   :  { %6014 = vmatpush1.bf16.msra.mxu1 %v7532_v52  ;;  %6301 = vmatpush1.bf16.msra.mxu0 %v7546_v53  ;;  %v7246_v52 = vcombine.low %v2795_v37, %v2811_v20  ;;  %v7262_v53 = vcombine.low %v2803_v38, %v2819_v39  ;;  %v3019_v37 = vld [vmem:[#allocation13 + $0xa10] sm:$0xff] }
 0x603   :  { %6015 = vmatprep.subr.bf16.mxu1 %v7565_v54  ;;  %6302 = vmatprep.subr.bf16.mxu0 %v7579_v55  ;;  %v7279_v54 = vcombine.high %v2827_v46, %v2843_v47  ;;  %v7295_v55 = vcombine.high %v2835_v48, %v2851_v49  ;;  %v3035_v20 = vld [vmem:[#allocation13 + $0xa90] sm:$0xff] }
 0x604   :  { %v3027_v38 = vld [vmem:[#allocation13 + $0xa50] sm:$0xff] }
 0x605   :  { %v3043_v39 = vld [vmem:[#allocation13 + $0xad0] sm:$0xff] }
 0x606   :  { %6016 = vmatpush1.bf16.msra.mxu1 %v7564_v60  ;;  %6303 = vmatpush1.bf16.msra.mxu0 %v7578_v62  ;;  %v7278_v60 = vcombine.low %v2827_v46, %v2843_v47  ;;  %v7294_v62 = vcombine.low %v2835_v48, %v2851_v49  ;;  %v3051_v46 = vld [vmem:[#allocation13 + $0xb10] sm:$0xff] }
 0x607   :  { %6017 = vmatprep.subr.bf16.mxu1 %v7597_v63  ;;  %6304 = vmatprep.subr.bf16.mxu0 %v7611_v0  ;;  %v7311_v63 = vcombine.high %v2859_v56, %v2875_v57  ;;  %v7327_v0 = vcombine.high %v2867_v58, %v2883_v59  ;;  %v3067_v47 = vld [vmem:[#allocation13 + $0xb90] sm:$0xff] }
 0x608   :  { %v3059_v48 = vld [vmem:[#allocation13 + $0xb50] sm:$0xff] }
 0x609   :  { %v3075_v49 = vld [vmem:[#allocation13 + $0xbd0] sm:$0xff] }
 0x60a   :  { %6018 = vmatpush1.bf16.msra.mxu1 %v7596_v6  ;;  %6305 = vmatpush1.bf16.msra.mxu0 %v7610_v7  ;;  %v7310_v6 = vcombine.low %v2859_v56, %v2875_v57  ;;  %v7326_v7 = vcombine.low %v2867_v58, %v2883_v59  ;;  %v3083_v56 = vld [vmem:[#allocation13 + $0xc10] sm:$0xff] }
 0x60b   :  { %6019 = vmatprep.subr.bf16.mxu1 %v7629_v9  ;;  %6306 = vmatprep.subr.bf16.mxu0 %v7643_v10  ;;  %v7343_v9 = vcombine.high %v2891_v1, %v2907_v2  ;;  %v7359_v10 = vcombine.high %v2899_v3, %v2915_v4  ;;  %v3099_v57 = vld [vmem:[#allocation13 + $0xc90] sm:$0xff] }
 0x60c   :  { %v3091_v58 = vld [vmem:[#allocation13 + $0xc50] sm:$0xff] }
 0x60d   :  { %v3107_v59 = vld [vmem:[#allocation13 + $0xcd0] sm:$0xff] }
 0x60e   :  { %6020 = vmatpush1.bf16.msra.mxu1 %v7628_v15  ;;  %6307 = vmatpush1.bf16.msra.mxu0 %v7642_v17  ;;  %v7342_v15 = vcombine.low %v2891_v1, %v2907_v2  ;;  %v7358_v17 = vcombine.low %v2899_v3, %v2915_v4  ;;  %v3115_v1 = vld [vmem:[#allocation13 + $0xd10] sm:$0xff] }
 0x60f   :  { %6030 = vmatprep.subr.bf16.mxu1 %v7151_v18  ;;  %6358 = vmatprep.subr.bf16.mxu0 %v7167_v19  ;;  %v7375_v18 = vcombine.high %v2923_v11, %v2939_v13  ;;  %v7391_v19 = vcombine.high %v2931_v14, %v2947_v16  ;;  %v3131_v2 = vld [vmem:[#allocation13 + $0xd90] sm:$0xff] }
 0x610   :  { %v3123_v3 = vld [vmem:[#allocation13 + $0xd50] sm:$0xff] }
 0x611   :  { %6022 = vmatmul.mubr.bf16.vlgmr.msra.gmra.mrb[12].mxu1 %v8680_v5  ;;  %6309 = vmatmul.mubr.bf16.vlgmr.msra.gmra.mrb[8].mxu0 %v8680_v5  ;;  %v3139_v4 = vld [vmem:[#allocation13 + $0xdd0] sm:$0xff] }
 0x612   :  { %6031 = vmatpush1.bf16.msra.mxu1 %v7150_v25  ;;  %6062 = vmatprep.mubr.bf16.mxu1 %v8684_v8  ;;  %v7374_v25 = vcombine.low %v2923_v11, %v2939_v13  ;;  %v3147_v11 = vld [vmem:[#allocation13 + $0xe10] sm:$0xff] }
 0x613   :  { %6359 = vmatpush1.bf16.msra.mxu0 %v7166_v26  ;;  %6390 = vmatprep.mubr.bf16.mxu0 %v8684_v8  ;;  %v7390_v26 = vcombine.low %v2931_v14, %v2947_v16  ;;  %v3163_v13 = vld [vmem:[#allocation13 + $0xe90] sm:$0xff] }
 0x614   :  { %6032 = vmatprep.subr.bf16.mxu1 %v7183_v27  ;;  %6360 = vmatprep.subr.bf16.mxu0 %v7199_v28  ;;  %v7407_v27 = vcombine.high %v2955_v21, %v2971_v22  ;;  %v7423_v28 = vcombine.high %v2963_v23, %v2979_v24  ;;  %v3155_v14 = vld [vmem:[#allocation13 + $0xe50] sm:$0xff] }
 0x615   :  { %v3171_v16 = vld [vmem:[#allocation13 + $0xed0] sm:$0xff] }
 0x616   :  { %6033 = vmatpush1.bf16.msra.mxu1 %v7182_v33  ;;  %v7406_v33 = vcombine.low %v2955_v21, %v2971_v22  ;;  %v3179_v21 = vld [vmem:[#allocation13 + $0xf10] sm:$0xff] }
 0x617   :  { %6361 = vmatpush1.bf16.msra.mxu0 %v7198_v34  ;;  %6034 = vmatprep.subr.bf16.mxu1 %v7215_v35  ;;  %v7422_v34 = vcombine.low %v2963_v23, %v2979_v24  ;;  %v7439_v35 = vcombine.high %v2987_v29, %v3003_v30  ;;  %v3195_v22 = vld [vmem:[#allocation13 + $0xf90] sm:$0xff] }
 0x618   :  { %6362 = vmatprep.subr.bf16.mxu0 %v7231_v36  ;;  %v7455_v36 = vcombine.high %v2995_v31, %v3011_v32  ;;  %v3187_v23 = vld [vmem:[#allocation13 + $0xf50] sm:$0xff] }
 0x619   :  { %v3203_v24 = vld [vmem:[#allocation13 + $0xfd0] sm:$0xff] }
 0x61a   :  { %6035 = vmatpush1.bf16.msra.mxu1 %v7214_v40  ;;  %v7438_v40 = vcombine.low %v2987_v29, %v3003_v30  ;;  %v2700_v29 = vld [vmem:[#allocation13 + $0x18] sm:$0xff] }
 0x61b   :  { %6363 = vmatpush1.bf16.msra.mxu0 %v7230_v42  ;;  %6036 = vmatprep.subr.bf16.mxu1 %v7247_v44  ;;  %v7454_v42 = vcombine.low %v2995_v31, %v3011_v32  ;;  %v7471_v44 = vcombine.high %v3019_v37, %v3035_v20  ;;  %v2716_v30 = vld [vmem:[#allocation13 + $0x98] sm:$0xff]  ;;  %v2709_v31 = vld [vmem:[#allocation13 + $0x60] sm:$0xff] }
 0x61c   :  { %6364 = vmatprep.subr.bf16.mxu0 %v7263_v45  ;;  %v7487_v45 = vcombine.high %v3027_v38, %v3043_v39  ;;  %v2725_v32 = vld [vmem:[#allocation13 + $0xe0] sm:$0xff] }
 0x61e   :  { %6037 = vmatpush1.bf16.msra.mxu1 %v7246_v52  ;;  %v7470_v52 = vcombine.low %v3019_v37, %v3035_v20  ;;  %v2732_v37 = vld [vmem:[#allocation13 + $0x118] sm:$0xff] }
 0x61f   :  { %6365 = vmatpush1.bf16.msra.mxu0 %v7262_v53  ;;  %6038 = vmatprep.subr.bf16.mxu1 %v7279_v54  ;;  %v7486_v53 = vcombine.low %v3027_v38, %v3043_v39  ;;  %v7503_v54 = vcombine.high %v3051_v46, %v3067_v47  ;;  %v2748_v20 = vld [vmem:[#allocation13 + $0x198] sm:$0xff]  ;;  %v7152_v38 = vcombine.low %v2700_v29, %v2716_v30  ;;  %v2741_v39 = vld [vmem:[#allocation13 + $0x160] sm:$0xff] }
 0x620   :  { %6366 = vmatprep.subr.bf16.mxu0 %v7295_v55  ;;  %v7519_v55 = vcombine.high %v3059_v48, %v3075_v49 }
 0x622   :  { %6039 = vmatpush1.bf16.msra.mxu1 %v7278_v60  ;;  %v7502_v60 = vcombine.low %v3051_v46, %v3067_v47  ;;  %v2780_v46 = vld [vmem:[#allocation13 + $0x298] sm:$0xff] }
 0x623   :  { %6367 = vmatpush1.bf16.msra.mxu0 %v7294_v62  ;;  %6040 = vmatprep.subr.bf16.mxu1 %v7311_v63  ;;  %v7518_v62 = vcombine.low %v3059_v48, %v3075_v49  ;;  %v7535_v63 = vcombine.high %v3083_v56, %v3099_v57  ;;  %v2773_v48 = vld [vmem:[#allocation13 + $0x260] sm:$0xff] }
 0x624   :  { %6368 = vmatprep.subr.bf16.mxu0 %v7327_v0  ;;  %v7551_v0 = vcombine.high %v3091_v58, %v3107_v59  ;;  %v2789_v49 = vld [vmem:[#allocation13 + $0x2e0] sm:$0xff] }
 0x626   :  { %6041 = vmatpush1.bf16.msra.mxu1 %v7310_v6  ;;  %v7534_v6 = vcombine.low %v3083_v56, %v3099_v57  ;;  %v2796_v56 = vld [vmem:[#allocation13 + $0x318] sm:$0xff] }
 0x627   :  { %6369 = vmatpush1.bf16.msra.mxu0 %v7326_v7  ;;  %6042 = vmatprep.subr.bf16.mxu1 %v7343_v9  ;;  %v7550_v7 = vcombine.low %v3091_v58, %v3107_v59  ;;  %v7567_v9 = vcombine.high %v3115_v1, %v3131_v2  ;;  %v2812_v57 = vld [vmem:[#allocation13 + $0x398] sm:$0xff]  ;;  %v2805_v58 = vld [vmem:[#allocation13 + $0x360] sm:$0xff] }
 0x628   :  { %6370 = vmatprep.subr.bf16.mxu0 %v7359_v10  ;;  %v7583_v10 = vcombine.high %v3123_v3, %v3139_v4  ;;  %v2821_v59 = vld [vmem:[#allocation13 + $0x3e0] sm:$0xff] }
 0x62a   :  { %6043 = vmatpush1.bf16.msra.mxu1 %v7342_v15  ;;  %v7566_v15 = vcombine.low %v3115_v1, %v3131_v2  ;;  %v2844_v1 = vld [vmem:[#allocation13 + $0x498] sm:$0xff]  ;;  %v2837_v2 = vld [vmem:[#allocation13 + $0x460] sm:$0xff] }
 0x62b   :  { %6371 = vmatpush1.bf16.msra.mxu0 %v7358_v17  ;;  %6044 = vmatprep.subr.bf16.mxu1 %v7375_v18  ;;  %v7582_v17 = vcombine.low %v3123_v3, %v3139_v4  ;;  %v7599_v18 = vcombine.high %v3147_v11, %v3163_v13  ;;  %v2853_v3 = vld [vmem:[#allocation13 + $0x4e0] sm:$0xff]  ;;  %v7248_v4 = vcombine.low %v2796_v56, %v2812_v57 }
 0x62c   :  { %6372 = vmatprep.subr.bf16.mxu0 %v7391_v19  ;;  %v7615_v19 = vcombine.high %v3155_v14, %v3171_v16 }
 0x62e   :  { %6045 = vmatpush1.bf16.msra.mxu1 %v7374_v25  ;;  %v7598_v25 = vcombine.low %v3147_v11, %v3163_v13  ;;  %v2876_v11 = vld [vmem:[#allocation13 + $0x598] sm:$0xff]  ;;  %v2869_v13 = vld [vmem:[#allocation13 + $0x560] sm:$0xff] }
 0x62f   :  { %6373 = vmatpush1.bf16.msra.mxu0 %v7390_v26  ;;  %6046 = vmatprep.subr.bf16.mxu1 %v7407_v27  ;;  %v7614_v26 = vcombine.low %v3155_v14, %v3171_v16  ;;  %v7631_v27 = vcombine.high %v3179_v21, %v3195_v22  ;;  %v2885_v14 = vld [vmem:[#allocation13 + $0x5e0] sm:$0xff] }
 0x630   :  { %6374 = vmatprep.subr.bf16.mxu0 %v7423_v28  ;;  %v7647_v28 = vcombine.high %v3187_v23, %v3203_v24 }
 0x632   :  { %6047 = vmatpush1.bf16.msra.mxu1 %v7406_v33  ;;  %v7630_v33 = vcombine.low %v3179_v21, %v3195_v22  ;;  %v2908_v21 = vld [vmem:[#allocation13 + $0x698] sm:$0xff]  ;;  %v2901_v22 = vld [vmem:[#allocation13 + $0x660] sm:$0xff] }
 0x633   :  { %6375 = vmatpush1.bf16.msra.mxu0 %v7422_v34  ;;  %6048 = vmatprep.subr.bf16.mxu1 %v7439_v35  ;;  %v7646_v34 = vcombine.low %v3187_v23, %v3203_v24  ;;  %v7153_v35 = vcombine.high %v2700_v29, %v2716_v30  ;;  %v2917_v23 = vld [vmem:[#allocation13 + $0x6e0] sm:$0xff]  ;;  %v2940_v29 = vld [vmem:[#allocation13 + $0x798] sm:$0xff] }
 0x634   :  { %6376 = vmatprep.subr.bf16.mxu0 %v7455_v36  ;;  %v7171_v36 = vcombine.high %v2709_v31, %v2725_v32  ;;  %v2933_v30 = vld [vmem:[#allocation13 + $0x760] sm:$0xff] }
 0x636   :  { %6049 = vmatpush1.bf16.msra.mxu1 %v7438_v40  ;;  %v2757_v40 = vld [vmem:[#allocation13 + $0x1e0] sm:$0xff] }
 0x637   :  { %6377 = vmatpush1.bf16.msra.mxu0 %v7454_v42  ;;  %6050 = vmatprep.subr.bf16.mxu1 %v7471_v44  ;;  %v7170_v42 = vcombine.low %v2709_v31, %v2725_v32  ;;  %v7185_v44 = vcombine.high %v2732_v37, %v2748_v20  ;;  %v7203_v47 = vcombine.high %v2741_v39, %v2757_v40  ;;  %v2949_v31 = vld [vmem:[#allocation13 + $0x7e0] sm:$0xff] }
 0x638   :  { %6378 = vmatprep.subr.bf16.mxu0 %v7487_v45  ;;  %v2764_v45 = vld [vmem:[#allocation13 + $0x218] sm:$0xff] }
 0x63a   :  { %6051 = vmatpush1.bf16.msra.mxu1 %v7470_v52  ;;  %v7184_v52 = vcombine.low %v2732_v37, %v2748_v20  ;;  %v2972_v37 = vld [vmem:[#allocation13 + $0x898] sm:$0xff]  ;;  %v2965_v20 = vld [vmem:[#allocation13 + $0x860] sm:$0xff] }
 0x63b   :  { %6379 = vmatpush1.bf16.msra.mxu0 %v7486_v53  ;;  %6052 = vmatprep.subr.bf16.mxu1 %v7503_v54  ;;  %v7202_v53 = vcombine.low %v2741_v39, %v2757_v40  ;;  %v7217_v54 = vcombine.high %v2764_v45, %v2780_v46  ;;  %v7394_v40 = vcombine.low %v2933_v30, %v2949_v31 }
 0x63c   :  { %6380 = vmatprep.subr.bf16.mxu0 %v7519_v55  ;;  %v7235_v55 = vcombine.high %v2773_v48, %v2789_v49 }
 0x63e   :  { %6053 = vmatpush1.bf16.msra.mxu1 %v7502_v60  ;;  %v7216_v60 = vcombine.low %v2764_v45, %v2780_v46  ;;  %v2988_v45 = vld [vmem:[#allocation13 + $0x918] sm:$0xff] }
 0x63f   :  { %6381 = vmatpush1.bf16.msra.mxu0 %v7518_v62  ;;  %6054 = vmatprep.subr.bf16.mxu1 %v7535_v63  ;;  %v7249_v62 = vcombine.high %v2796_v56, %v2812_v57  ;;  %v7267_v63 = vcombine.high %v2805_v58, %v2821_v59  ;;  %v3004_v46 = vld [vmem:[#allocation13 + $0x998] sm:$0xff]  ;;  %v3029_v57 = vld [vmem:[#allocation13 + $0xa60] sm:$0xff] }
 0x640   :  { %6382 = vmatprep.subr.bf16.mxu0 %v7551_v0  ;;  %v2828_v0 = vld [vmem:[#allocation13 + $0x418] sm:$0xff] }
 0x641   :  { %v7280_v16 = vcombine.low %v2828_v0, %v2844_v1  ;;  %v3036_v56 = vld [vmem:[#allocation13 + $0xa98] sm:$0xff] }
 0x642   :  { %6055 = vmatpush1.bf16.msra.mxu1 %v7534_v6  ;;  %v7266_v6 = vcombine.low %v2805_v58, %v2821_v59  ;;  %v3045_v58 = vld [vmem:[#allocation13 + $0xae0] sm:$0xff]  ;;  %v7440_v59 = vcombine.low %v2988_v45, %v3004_v46 }
 0x643   :  { %6383 = vmatpush1.bf16.msra.mxu0 %v7550_v7  ;;  %6056 = vmatprep.subr.bf16.mxu1 %v7567_v9  ;;  %v7281_v7 = vcombine.high %v2828_v0, %v2844_v1  ;;  %v7299_v9 = vcombine.high %v2837_v2, %v2853_v3  ;;  %v3068_v0 = vld [vmem:[#allocation13 + $0xb98] sm:$0xff]  ;;  %v3061_v1 = vld [vmem:[#allocation13 + $0xb60] sm:$0xff] }
 0x644   :  { %6384 = vmatprep.subr.bf16.mxu0 %v7583_v10  ;;  %v2860_v10 = vld [vmem:[#allocation13 + $0x518] sm:$0xff] }
 0x645   :  { %v7312_v24 = vcombine.low %v2860_v10, %v2876_v11 }
 0x646   :  { %6057 = vmatpush1.bf16.msra.mxu1 %v7566_v15  ;;  %v7298_v15 = vcombine.low %v2837_v2, %v2853_v3  ;;  %v3077_v2 = vld [vmem:[#allocation13 + $0xbe0] sm:$0xff] }
 0x647   :  { %6385 = vmatpush1.bf16.msra.mxu0 %v7582_v17  ;;  %6058 = vmatprep.subr.bf16.mxu1 %v7599_v18  ;;  %v7313_v17 = vcombine.high %v2860_v10, %v2876_v11  ;;  %v7331_v18 = vcombine.high %v2869_v13, %v2885_v14  ;;  %v3100_v10 = vld [vmem:[#allocation13 + $0xc98] sm:$0xff]  ;;  %v3093_v11 = vld [vmem:[#allocation13 + $0xc60] sm:$0xff] }
 0x648   :  { %6386 = vmatprep.subr.bf16.mxu0 %v7615_v19  ;;  %v2892_v19 = vld [vmem:[#allocation13 + $0x618] sm:$0xff] }
 0x649   :  { %v7344_v32 = vcombine.low %v2892_v19, %v2908_v21 }
 0x64a   :  { %6059 = vmatpush1.bf16.msra.mxu1 %v7598_v25  ;;  %v7330_v25 = vcombine.low %v2869_v13, %v2885_v14  ;;  %v3109_v13 = vld [vmem:[#allocation13 + $0xce0] sm:$0xff] }
 0x64b   :  { %6387 = vmatpush1.bf16.msra.mxu0 %v7614_v26  ;;  %6060 = vmatprep.subr.bf16.mxu1 %v7631_v27  ;;  %v7345_v26 = vcombine.high %v2892_v19, %v2908_v21  ;;  %v7363_v27 = vcombine.high %v2901_v22, %v2917_v23  ;;  %v3132_v19 = vld [vmem:[#allocation13 + $0xd98] sm:$0xff]  ;;  %v3125_v21 = vld [vmem:[#allocation13 + $0xd60] sm:$0xff] }
 0x64c   :  { %6388 = vmatprep.subr.bf16.mxu0 %v7647_v28  ;;  %v2924_v28 = vld [vmem:[#allocation13 + $0x718] sm:$0xff] }
 0x64d   :  { %v7376_v39 = vcombine.low %v2924_v28, %v2940_v29 }
 0x64e   :  { %6061 = vmatpush1.bf16.msra.mxu1 %v7630_v33  ;;  %v7362_v33 = vcombine.low %v2901_v22, %v2917_v23  ;;  %v3141_v22 = vld [vmem:[#allocation13 + $0xde0] sm:$0xff] }
 0x64f   :  { %6389 = vmatpush1.bf16.msra.mxu0 %v7646_v34  ;;  %6071 = vmatprep.subr.bf16.mxu1 %v7153_v35  ;;  %v7377_v34 = vcombine.high %v2924_v28, %v2940_v29  ;;  %v7395_v35 = vcombine.high %v2933_v30, %v2949_v31  ;;  %v3164_v28 = vld [vmem:[#allocation13 + $0xe98] sm:$0xff]  ;;  %v3157_v29 = vld [vmem:[#allocation13 + $0xe60] sm:$0xff] }
 0x650   :  { %6440 = vmatprep.subr.bf16.mxu0 %v7171_v36  ;;  %v2956_v36 = vld [vmem:[#allocation13 + $0x818] sm:$0xff]  ;;  %v3173_v30 = vld [vmem:[#allocation13 + $0xee0] sm:$0xff] }
 0x651   :  { %6063 = vmatmul.mubr.bf16.vlgmr.msra.gmra.mrb[16].mxu1 %v8680_v5 }
 0x652   :  { %6391 = vmatmul.mubr.bf16.vlgmr.msra.gmra.mrb[12].mxu0 %v8680_v5  ;;  %6072 = vmatpush1.bf16.msra.mxu1 %v7152_v38  ;;  %v7234_v5 = vcombine.low %v2773_v48, %v2789_v49  ;;  %v2981_v38 = vld [vmem:[#allocation13 + $0x8e0] sm:$0xff]  ;;  %v7408_v49 = vcombine.low %v2956_v36, %v2972_v37 }
 0x653   :  { %6103 = vmatprep.mubr.bf16.mxu1 %v8684_v8  ;;  %6441 = vmatpush1.bf16.msra.mxu0 %v7170_v42  ;;  %v7409_v42 = vcombine.high %v2956_v36, %v2972_v37  ;;  %v3013_v48 = vld [vmem:[#allocation13 + $0x9e0] sm:$0xff]  ;;  %v3196_v36 = vld [vmem:[#allocation13 + $0xf98] sm:$0xff] }
 0x654   :  { %6472 = vmatprep.mubr.bf16.mxu0 %v8684_v8  ;;  %6073 = vmatprep.subr.bf16.mxu1 %v7185_v44  ;;  %v7427_v44 = vcombine.high %v2965_v20, %v2981_v38  ;;  %v3189_v37 = vld [vmem:[#allocation13 + $0xf60] sm:$0xff] }
 0x655   :  { %6442 = vmatprep.subr.bf16.mxu0 %v7203_v47  ;;  %v2997_v47 = vld [vmem:[#allocation13 + $0x960] sm:$0xff] }
 0x656   :  { %6074 = vmatpush1.bf16.msra.mxu1 %v7184_v52  ;;  %v7426_v52 = vcombine.low %v2965_v20, %v2981_v38  ;;  %v3205_v20 = vld [vmem:[#allocation13 + $0xfe0] sm:$0xff] }
 0x657   :  { %6443 = vmatpush1.bf16.msra.mxu0 %v7202_v53  ;;  %6075 = vmatprep.subr.bf16.mxu1 %v7217_v54  ;;  %v7441_v53 = vcombine.high %v2988_v45, %v3004_v46  ;;  %v7459_v54 = vcombine.high %v2997_v47, %v3013_v48  ;;  %v2717_v45 = vld [vmem:[#allocation13 + $0xa0] sm:$0xff]  ;;  %v2711_v46 = vld [vmem:[#allocation13 + $0x70] sm:$0xff] }
 0x658   :  { %6444 = vmatprep.subr.bf16.mxu0 %v7235_v55  ;;  %v3020_v55 = vld [vmem:[#allocation13 + $0xa18] sm:$0xff] }
 0x659   :  { %v7472_v3 = vcombine.low %v3020_v55, %v3036_v56 }
 0x65a   :  { %6076 = vmatpush1.bf16.msra.mxu1 %v7216_v60  ;;  %v7458_v60 = vcombine.low %v2997_v47, %v3013_v48  ;;  %v2727_v47 = vld [vmem:[#allocation13 + $0xf0] sm:$0xff] }
 0x65b   :  { %6445 = vmatpush1.bf16.msra.mxu0 %v7234_v5  ;;  %6077 = vmatprep.subr.bf16.mxu1 %v7249_v62  ;;  %v7473_v5 = vcombine.high %v3020_v55, %v3036_v56  ;;  %v7491_v62 = vcombine.high %v3029_v57, %v3045_v58  ;;  %v2749_v55 = vld [vmem:[#allocation13 + $0x1a0] sm:$0xff] }
 0x65c   :  { %6446 = vmatprep.subr.bf16.mxu0 %v7267_v63  ;;  %v3052_v63 = vld [vmem:[#allocation13 + $0xb18] sm:$0xff] }
 0x65d   :  { %v7504_v14 = vcombine.low %v3052_v63, %v3068_v0 }
 0x65e   :  { %6078 = vmatpush1.bf16.msra.mxu1 %v7248_v4  ;;  %v7490_v4 = vcombine.low %v3029_v57, %v3045_v58  ;;  %v2743_v57 = vld [vmem:[#allocation13 + $0x170] sm:$0xff] }
 0x65f   :  { %6447 = vmatpush1.bf16.msra.mxu0 %v7266_v6  ;;  %6079 = vmatprep.subr.bf16.mxu1 %v7281_v7  ;;  %v7505_v6 = vcombine.high %v3052_v63, %v3068_v0  ;;  %v7523_v7 = vcombine.high %v3061_v1, %v3077_v2  ;;  %v2759_v58 = vld [vmem:[#allocation13 + $0x1f0] sm:$0xff] }
 0x660   :  { %6448 = vmatprep.subr.bf16.mxu0 %v7299_v9  ;;  %v3084_v9 = vld [vmem:[#allocation13 + $0xc18] sm:$0xff]  ;;  %v8700_v63 = vld.sshfl [vmem:[#allocation2] sm:$0x33 pattern:$0x76325410]  ;;  %v7207_v0 = vcombine.high %v2743_v57, %v2759_v58 }
 0x661   :  { %v7536_v23 = vcombine.low %v3084_v9, %v3100_v10 }
 0x662   :  { %6080 = vmatpush1.bf16.msra.mxu1 %v7280_v16  ;;  %v7522_v16 = vcombine.low %v3061_v1, %v3077_v2  ;;  %v2775_v1 = vld [vmem:[#allocation13 + $0x270] sm:$0xff] }
 0x663   :  { %6449 = vmatpush1.bf16.msra.mxu0 %v7298_v15  ;;  %6081 = vmatprep.subr.bf16.mxu1 %v7313_v17  ;;  %v7537_v15 = vcombine.high %v3084_v9, %v3100_v10  ;;  %v7555_v17 = vcombine.high %v3093_v11, %v3109_v13  ;;  %v2791_v2 = vld [vmem:[#allocation13 + $0x2f0] sm:$0xff]  ;;  %v2797_v9 = vld [vmem:[#allocation13 + $0x320] sm:$0xff] }
 0x664   :  { %6450 = vmatprep.subr.bf16.mxu0 %v7331_v18  ;;  %v3116_v18 = vld [vmem:[#allocation13 + $0xd18] sm:$0xff]  ;;  %v2813_v10 = vld [vmem:[#allocation13 + $0x3a0] sm:$0xff] }
 0x665   :  { %v7568_v31 = vcombine.low %v3116_v18, %v3132_v19 }
 0x666   :  { %6082 = vmatpush1.bf16.msra.mxu1 %v7312_v24  ;;  %v7554_v24 = vcombine.low %v3093_v11, %v3109_v13  ;;  %v2807_v11 = vld [vmem:[#allocation13 + $0x370] sm:$0xff] }
 0x667   :  { %6451 = vmatpush1.bf16.msra.mxu0 %v7330_v25  ;;  %6083 = vmatprep.subr.bf16.mxu1 %v7345_v26  ;;  %v7569_v25 = vcombine.high %v3116_v18, %v3132_v19  ;;  %v7587_v26 = vcombine.high %v3125_v21, %v3141_v22  ;;  %v2823_v13 = vld [vmem:[#allocation13 + $0x3f0] sm:$0xff]  ;;  %v2829_v18 = vld [vmem:[#allocation13 + $0x420] sm:$0xff] }
 0x668   :  { %6452 = vmatprep.subr.bf16.mxu0 %v7363_v27  ;;  %v3148_v27 = vld [vmem:[#allocation13 + $0xe18] sm:$0xff]  ;;  %v2845_v19 = vld [vmem:[#allocation13 + $0x4a0] sm:$0xff] }
 0x669   :  { %v7600_v38 = vcombine.low %v3148_v27, %v3164_v28 }
 0x66a   :  { %6084 = vmatpush1.bf16.msra.mxu1 %v7344_v32  ;;  %v7586_v32 = vcombine.low %v3125_v21, %v3141_v22  ;;  %v2839_v21 = vld [vmem:[#allocation13 + $0x470] sm:$0xff] }
 0x66b   :  { %6453 = vmatpush1.bf16.msra.mxu0 %v7362_v33  ;;  %6085 = vmatprep.subr.bf16.mxu1 %v7377_v34  ;;  %v7601_v33 = vcombine.high %v3148_v27, %v3164_v28  ;;  %v7619_v34 = vcombine.high %v3157_v29, %v3173_v30  ;;  %v2855_v22 = vld [vmem:[#allocation13 + $0x4f0] sm:$0xff]  ;;  %v2861_v27 = vld [vmem:[#allocation13 + $0x520] sm:$0xff] }
 0x66c   :  { %6454 = vmatprep.subr.bf16.mxu0 %v7395_v35  ;;  %v3180_v35 = vld [vmem:[#allocation13 + $0xf18] sm:$0xff]  ;;  %v2877_v28 = vld [vmem:[#allocation13 + $0x5a0] sm:$0xff] }
 0x66d   :  { %v7632_v48 = vcombine.low %v3180_v35, %v3196_v36 }
 0x66e   :  { %6086 = vmatpush1.bf16.msra.mxu1 %v7376_v39  ;;  %v7618_v39 = vcombine.low %v3157_v29, %v3173_v30  ;;  %v8707_v29 = vsub.s32 4, %v8563_v12  ;;  %v2871_v30 = vld [vmem:[#allocation13 + $0x570] sm:$0xff] }
 0x66f   :  { %6455 = vmatpush1.bf16.msra.mxu0 %v7394_v40  ;;  %6087 = vmatprep.subr.bf16.mxu1 %v7409_v42  ;;  %v7633_v40 = vcombine.high %v3180_v35, %v3196_v36  ;;  %v7651_v42 = vcombine.high %v3189_v37, %v3205_v20  ;;  %v8712_v35 = vsub.s32 5, %v8563_v12  ;;  %v7302_v36 = vcombine.low %v2839_v21, %v2855_v22 }
 0x670   :  { %6456 = vmatprep.subr.bf16.mxu0 %v7427_v44  ;;  %v2701_v44 = vld [vmem:[#allocation13 + $0x20] sm:$0xff] }
 0x671   :  { %v7154_v56 = vcombine.low %v2701_v44, %v2717_v45 }
 0x672   :  { %6088 = vmatpush1.bf16.msra.mxu1 %v7408_v49  ;;  %v7650_v49 = vcombine.low %v3189_v37, %v3205_v20  ;;  %v7315_v37 = vcombine.high %v2861_v27, %v2877_v28 }
 0x673   :  { %6457 = vmatpush1.bf16.msra.mxu0 %v7426_v52  ;;  %6089 = vmatprep.subr.bf16.mxu1 %v7441_v53  ;;  %v7155_v52 = vcombine.high %v2701_v44, %v2717_v45  ;;  %v7175_v53 = vcombine.high %v2711_v46, %v2727_v47  ;;  %v2903_v44 = vld [vmem:[#allocation13 + $0x670] sm:$0xff] }
 0x674   :  { %6458 = vmatprep.subr.bf16.mxu0 %v7459_v54  ;;  %v2733_v54 = vld [vmem:[#allocation13 + $0x120] sm:$0xff]  ;;  %v2919_v45 = vld [vmem:[#allocation13 + $0x6f0] sm:$0xff] }
 0x676   :  { %6090 = vmatpush1.bf16.msra.mxu1 %v7440_v59  ;;  %v7174_v59 = vcombine.low %v2711_v46, %v2727_v47  ;;  %v7314_v46 = vcombine.low %v2861_v27, %v2877_v28  ;;  %v2999_v27 = vld [vmem:[#allocation13 + $0x970] sm:$0xff] }
 0x677   :  { %6459 = vmatpush1.bf16.msra.mxu0 %v7458_v60  ;;  %6091 = vmatprep.subr.bf16.mxu1 %v7473_v5  ;;  %v7187_v60 = vcombine.high %v2733_v54, %v2749_v55  ;;  %v2765_v5 = vld [vmem:[#allocation13 + $0x220] sm:$0xff]  ;;  %v3015_v28 = vld [vmem:[#allocation13 + $0x9f0] sm:$0xff] }
 0x678   :  { %6460 = vmatprep.subr.bf16.mxu0 %v7491_v62  ;;  %v2781_v62 = vld [vmem:[#allocation13 + $0x2a0] sm:$0xff] }
 0x67a   :  { %6092 = vmatpush1.bf16.msra.mxu1 %v7472_v3  ;;  %v7186_v3 = vcombine.low %v2733_v54, %v2749_v55  ;;  %v7367_v55 = vcombine.high %v2903_v44, %v2919_v45 }
 0x67b   :  { %6461 = vmatpush1.bf16.msra.mxu0 %v7490_v4  ;;  %6093 = vmatprep.subr.bf16.mxu1 %v7505_v6  ;;  %v7206_v4 = vcombine.low %v2743_v57, %v2759_v58  ;;  %v7219_v6 = vcombine.high %v2765_v5, %v2781_v62  ;;  %v2941_v57 = vld [vmem:[#allocation13 + $0x7a0] sm:$0xff] }
 0x67c   :  { %6462 = vmatprep.subr.bf16.mxu0 %v7523_v7  ;;  %v7239_v7 = vcombine.high %v2775_v1, %v2791_v2 }
 0x67e   :  { %6094 = vmatpush1.bf16.msra.mxu1 %v7504_v14  ;;  %v7218_v14 = vcombine.low %v2765_v5, %v2781_v62  ;;  %v2935_v62 = vld [vmem:[#allocation13 + $0x770] sm:$0xff] }
 0x67f   :  { %6463 = vmatpush1.bf16.msra.mxu0 %v7522_v16  ;;  %6095 = vmatprep.subr.bf16.mxu1 %v7537_v15  ;;  %v7238_v16 = vcombine.low %v2775_v1, %v2791_v2  ;;  %v7251_v15 = vcombine.high %v2797_v9, %v2813_v10 }
 0x680   :  { %6464 = vmatprep.subr.bf16.mxu0 %v7555_v17  ;;  %v7271_v17 = vcombine.high %v2807_v11, %v2823_v13 }
 0x682   :  { %6096 = vmatpush1.bf16.msra.mxu1 %v7536_v23  ;;  %v7250_v23 = vcombine.low %v2797_v9, %v2813_v10  ;;  %v7366_v10 = vcombine.low %v2903_v44, %v2919_v45  ;;  %v3053_v45 = vld [vmem:[#allocation13 + $0xb20] sm:$0xff] }
 0x683   :  { %6465 = vmatpush1.bf16.msra.mxu0 %v7554_v24  ;;  %6097 = vmatprep.subr.bf16.mxu1 %v7569_v25  ;;  %v7270_v24 = vcombine.low %v2807_v11, %v2823_v13  ;;  %v7283_v25 = vcombine.high %v2829_v18, %v2845_v19 }
 0x684   :  { %6466 = vmatprep.subr.bf16.mxu0 %v7587_v26  ;;  %v7303_v26 = vcombine.high %v2839_v21, %v2855_v22 }
 0x686   :  { %6098 = vmatpush1.bf16.msra.mxu1 %v7568_v31  ;;  %v2887_v31 = vld [vmem:[#allocation13 + $0x5f0] sm:$0xff] }
 0x687   :  { %6467 = vmatpush1.bf16.msra.mxu0 %v7586_v32  ;;  %6099 = vmatprep.subr.bf16.mxu1 %v7601_v33  ;;  %v7282_v32 = vcombine.low %v2829_v18, %v2845_v19  ;;  %v8709_v33 = vld [vmem:[#allocation14] sm:$0xff]  ;;  %v7335_v20 = vcombine.high %v2871_v30, %v2887_v31  ;;  %v2967_v18 = vld [vmem:[#allocation13 + $0x870] sm:$0xff] }
 0x688   :  { %6468 = vmatprep.subr.bf16.mxu0 %v7619_v34  ;;  %v3210_v34 = vld [vmem:[#allocation14 + $0x8] sm:$0xff]  ;;  %v3224_v47 = vrot.slane %v8709_v33, %v8650_v43  ;;  %v2983_v19 = vld [vmem:[#allocation13 + $0x8f0] sm:$0xff] }
 0x68a   :  { %6100 = vmatpush1.bf16.msra.mxu1 %v7600_v38  ;;  %v2893_v38 = vld [vmem:[#allocation13 + $0x620] sm:$0xff] }
 0x68b   :  { %6469 = vmatpush1.bf16.msra.mxu0 %v7618_v39  ;;  %6101 = vmatprep.subr.bf16.mxu1 %v7633_v40  ;;  %v2909_v39 = vld [vmem:[#allocation13 + $0x6a0] sm:$0xff]  ;;  %v3220_v40 = vrot.slane %v8709_v33, %v8647_v41 }
 0x68c   :  { %6470 = vmatprep.subr.bf16.mxu0 %v7651_v42  ;;  %v3268_v42 = vrot.slane %v3210_v34, %v8707_v29 }
 0x68e   :  { %6102 = vmatpush1.bf16.msra.mxu1 %v7632_v48  ;;  %v3272_v48 = vrot.slane %v3210_v34, %v8712_v35  ;;  %v7463_v34 = vcombine.high %v2999_v27, %v3015_v28 }
 0x68f   :  { %6471 = vmatpush1.bf16.msra.mxu0 %v7650_v49  ;;  %6112 = vmatprep.subr.bf16.mxu1 %v7155_v52  ;;  %v7334_v49 = vcombine.low %v2871_v30, %v2887_v31  ;;  %v7347_v52 = vcombine.high %v2893_v38, %v2909_v39  ;;  %v7430_v31 = vcombine.low %v2967_v18, %v2983_v19 }
 0x690   :  { %6522 = vmatprep.subr.bf16.mxu0 %v7175_v53 }
 0x691   :  { %6104 = vmatmul.mubr.bf16.vlgmr.msra.gmra.mrb[20].mxu1 %v8700_v63 }
 0x692   :  { %6473 = vmatmul.mubr.bf16.vlgmr.msra.gmra.mrb[16].mxu0 %v8700_v63  ;;  %6113 = vmatpush1.bf16.msra.mxu1 %v7154_v56  ;;  %v2925_v56 = vld [vmem:[#allocation13 + $0x720] sm:$0xff] }
 0x693   :  { %6144 = vmatprep.mubr.bf16.mxu1 %v8684_v8  ;;  %6523 = vmatpush1.bf16.msra.mxu0 %v7174_v59  ;;  %v7379_v11 = vcombine.high %v2925_v56, %v2941_v57  ;;  %v7378_v21 = vcombine.low %v2925_v56, %v2941_v57  ;;  %v3101_v56 = vld [vmem:[#allocation13 + $0xca0] sm:$0xff]  ;;  %v3095_v57 = vld [vmem:[#allocation13 + $0xc70] sm:$0xff] }
 0x694   :  { %6554 = vmatprep.mubr.bf16.mxu0 %v8684_v8  ;;  %6114 = vmatprep.subr.bf16.mxu1 %v7187_v60 }
 0x695   :  { %6524 = vmatprep.subr.bf16.mxu0 %v7207_v0  ;;  %v2951_v0 = vld [vmem:[#allocation13 + $0x7f0] sm:$0xff] }
 0x696   :  { %6115 = vmatpush1.bf16.msra.mxu1 %v7186_v3  ;;  %v7398_v22 = vcombine.low %v2935_v62, %v2951_v0 }
 0x697   :  { %6525 = vmatpush1.bf16.msra.mxu0 %v7206_v4  ;;  %6116 = vmatprep.subr.bf16.mxu1 %v7219_v6  ;;  %v7346_v6 = vcombine.low %v2893_v38, %v2909_v39  ;;  %v3047_v38 = vld [vmem:[#allocation13 + $0xaf0] sm:$0xff] }
 0x698   :  { %6526 = vmatprep.subr.bf16.mxu0 %v7239_v7 }
 0x69a   :  { %6117 = vmatpush1.bf16.msra.mxu1 %v7218_v14 }
 0x69b   :  { %6527 = vmatpush1.bf16.msra.mxu0 %v7238_v16  ;;  %6118 = vmatprep.subr.bf16.mxu1 %v7251_v15  ;;  %v7399_v16 = vcombine.high %v2935_v62, %v2951_v0  ;;  %v2957_v15 = vld [vmem:[#allocation13 + $0x820] sm:$0xff] }
 0x69c   :  { %6528 = vmatprep.subr.bf16.mxu0 %v7271_v17  ;;  %v2973_v17 = vld [vmem:[#allocation13 + $0x8a0] sm:$0xff] }
 0x69d   :  { %v7410_v30 = vcombine.low %v2957_v15, %v2973_v17 }
 0x69e   :  { %6119 = vmatpush1.bf16.msra.mxu1 %v7250_v23  ;;  %v7411_v23 = vcombine.high %v2957_v15, %v2973_v17  ;;  %v3149_v17 = vld [vmem:[#allocation13 + $0xe20] sm:$0xff] }
 0x69f   :  { %6529 = vmatpush1.bf16.msra.mxu0 %v7270_v24  ;;  %6120 = vmatprep.subr.bf16.mxu1 %v7283_v25  ;;  %v7431_v24 = vcombine.high %v2967_v18, %v2983_v19  ;;  %v2989_v25 = vld [vmem:[#allocation13 + $0x920] sm:$0xff]  ;;  %v3159_v19 = vld [vmem:[#allocation13 + $0xe70] sm:$0xff] }
 0x6a0   :  { %6530 = vmatprep.subr.bf16.mxu0 %v7303_v26  ;;  %v3005_v26 = vld [vmem:[#allocation13 + $0x9a0] sm:$0xff] }
 0x6a1   :  { %v7442_v39 = vcombine.low %v2989_v25, %v3005_v26  ;;  %v3165_v18 = vld [vmem:[#allocation13 + $0xea0] sm:$0xff] }
 0x6a2   :  { %6121 = vmatpush1.bf16.msra.mxu1 %v7282_v32  ;;  %v7443_v32 = vcombine.high %v2989_v25, %v3005_v26  ;;  %v3181_v26 = vld [vmem:[#allocation13 + $0xf20] sm:$0xff] }
 0x6a3   :  { %6531 = vmatpush1.bf16.msra.mxu0 %v7302_v36  ;;  %6122 = vmatprep.subr.bf16.mxu1 %v7315_v37  ;;  %v3021_v36 = vld [vmem:[#allocation13 + $0xa20] sm:$0xff] }
 0x6a4   :  { %v5982_v53 = vpop.f32.mrb[8].mxu1  ;;  %v6228_v54 = vpop.f32.mrb[4].mxu0  ;;  %6532 = vmatprep.subr.bf16.mxu0 %v7335_v20  ;;  %v3037_v37 = vld [vmem:[#allocation13 + $0xaa0] sm:$0xff]  ;;  %v3031_v20 = vld [vmem:[#allocation13 + $0xa70] sm:$0xff] }
 0x6a5   :  { %v8720_v58 = vadd.f32 %v5982_v53, %v3220_v40  ;;  %v8722_v59 = vadd.f32 %v6228_v54, %v3268_v42  ;;  %v5984_v60 = vpop.f32.mrb[9].mxu1  ;;  %v6230_v5 = vpop.f32.mrb[5].mxu0  ;;  %v7462_v40 = vcombine.low %v2999_v27, %v3015_v28  ;;  %v7475_v42 = vcombine.high %v3021_v36, %v3037_v37  ;;  %v3197_v27 = vld [vmem:[#allocation13 + $0xfa0] sm:$0xff]  ;;  %v3191_v28 = vld [vmem:[#allocation13 + $0xf70] sm:$0xff] }
 0x6a6   :  { %v8724_v1 = vadd.f32 %v5984_v60, %v3224_v47  ;;  %6123 = vmatpush1.bf16.msra.mxu1 %v7314_v46  ;;  %v8726_v2 = vadd.f32 %v6230_v5, %v3272_v48  ;;  %v5986_v3 = vpop.f32.mrb[10].mxu1  ;;  %v6232_v4 = vpop.f32.mrb[6].mxu0  ;;  %v7495_v44 = vcombine.high %v3031_v20, %v3047_v38  ;;  %v3069_v46 = vld [vmem:[#allocation13 + $0xba0] sm:$0xff]  ;;  %v3063_v47 = vld [vmem:[#allocation13 + $0xb70] sm:$0xff] }
 0x6a7   :  { %6533 = vmatpush1.bf16.msra.mxu0 %v7334_v49  ;;  %v5987_v7 = vpop.f32.mrb[11].mxu1  ;;  %v6233_v9 = vpop.f32.mrb[7].mxu0  ;;  %6124 = vmatprep.subr.bf16.mxu1 %v7347_v52  ;;  %v3079_v48 = vld [vmem:[#allocation13 + $0xbf0] sm:$0xff]  ;;  %v7474_v49 = vcombine.low %v3021_v36, %v3037_v37  ;;  %v7494_v52 = vcombine.low %v3031_v20, %v3047_v38  ;;  %v7507_v53 = vcombine.high %v3053_v45, %v3069_v46  ;;  %v3117_v4 = vld [vmem:[#allocation13 + $0xd20] sm:$0xff]  ;;  %v2702_v37 = vld [vmem:[#allocation13 + $0x28] sm:$0xff] }
 0x6a8   :  { %v6636_v13 = vcombine.low %v8720_v58, %v8724_v1  ;;  %v6687_v14 = vcombine.low %v8722_v59, %v8726_v2  ;;  %6534 = vmatprep.subr.bf16.mxu0 %v7367_v55  ;;  %v7527_v54 = vcombine.high %v3063_v47, %v3079_v48  ;;  %v3085_v55 = vld [vmem:[#allocation13 + $0xc20] sm:$0xff]  ;;  %v3111_v60 = vld [vmem:[#allocation13 + $0xcf0] sm:$0xff]  ;;  %v7506_v5 = vcombine.low %v3053_v45, %v3069_v46  ;;  %v2718_v20 = vld [vmem:[#allocation13 + $0xa8] sm:$0xff] }
 0x6a9   :  { %v7526_v62 = vcombine.low %v3063_v47, %v3079_v48  ;;  %v7539_v0 = vcombine.high %v3085_v55, %v3101_v56  ;;  %v7559_v3 = vcombine.high %v3095_v57, %v3111_v60  ;;  %v3127_v7 = vld [vmem:[#allocation13 + $0xd70] sm:$0xff]  ;;  %v7634_v38 = vcombine.low %v3181_v26, %v3197_v27  ;;  %v2766_v47 = vld [vmem:[#allocation13 + $0x228] sm:$0xff] }
 0x6aa   :  { %6125 = vmatpush1.bf16.msra.mxu1 %v7346_v6  ;;  %v3133_v6 = vld [vmem:[#allocation13 + $0xda0] sm:$0xff]  ;;  %v3143_v9 = vld [vmem:[#allocation13 + $0xdf0] sm:$0xff]  ;;  %v7156_v45 = vcombine.low %v2702_v37, %v2718_v20  ;;  %v2782_v48 = vld [vmem:[#allocation13 + $0x2a8] sm:$0xff] }
 0x6ab   :  { %6535 = vmatpush1.bf16.msra.mxu0 %v7366_v10  ;;  %6126 = vmatprep.subr.bf16.mxu1 %v7379_v11  ;;  %v7538_v10 = vcombine.low %v3085_v55, %v3101_v56  ;;  %v7558_v11 = vcombine.low %v3095_v57, %v3111_v60  ;;  %v7591_v15 = vcombine.high %v3127_v7, %v3143_v9  ;;  %v2830_v57 = vld [vmem:[#allocation13 + $0x428] sm:$0xff] }
 0x6ac   :  { %6536 = vmatprep.subr.bf16.mxu0 %v7399_v16  ;;  %v7571_v16 = vcombine.high %v3117_v4, %v3133_v6  ;;  %v7220_v55 = vcombine.low %v2766_v47, %v2782_v48  ;;  %v2846_v60 = vld [vmem:[#allocation13 + $0x4a8] sm:$0xff] }
 0x6ae   :  { %6127 = vmatpush1.bf16.msra.mxu1 %v7378_v21  ;;  %v3175_v21 = vld [vmem:[#allocation13 + $0xef0] sm:$0xff] }
 0x6af   :  { %6537 = vmatpush1.bf16.msra.mxu0 %v7398_v22  ;;  %6128 = vmatprep.subr.bf16.mxu1 %v7411_v23  ;;  %v7570_v22 = vcombine.low %v3117_v4, %v3133_v6  ;;  %v7590_v23 = vcombine.low %v3127_v7, %v3143_v9  ;;  %v7623_v25 = vcombine.high %v3159_v19, %v3175_v21  ;;  %v8735_v6 = vld [vmem:[#allocation14 + $0x10] sm:$0xff]  ;;  %v2894_v9 = vld [vmem:[#allocation13 + $0x628] sm:$0xff] }
 0x6b0   :  { %6538 = vmatprep.subr.bf16.mxu0 %v7431_v24  ;;  %v7603_v24 = vcombine.high %v3149_v17, %v3165_v18  ;;  %v7284_v4 = vcombine.low %v2830_v57, %v2846_v60 }
 0x6b2   :  { %6129 = vmatpush1.bf16.msra.mxu1 %v7410_v30  ;;  %v3207_v30 = vld [vmem:[#allocation13 + $0xff0] sm:$0xff] }
 0x6b3   :  { %6539 = vmatpush1.bf16.msra.mxu0 %v7430_v31  ;;  %6130 = vmatprep.subr.bf16.mxu1 %v7443_v32  ;;  %v7602_v31 = vcombine.low %v3149_v17, %v3165_v18  ;;  %v7622_v32 = vcombine.low %v3159_v19, %v3175_v21  ;;  %v7655_v36 = vcombine.high %v3191_v28, %v3207_v30 }
 0x6b4   :  { %6540 = vmatprep.subr.bf16.mxu0 %v7463_v34  ;;  %v7635_v34 = vcombine.high %v3181_v26, %v3197_v27  ;;  %v3288_v18 = vrot.slane %v8735_v6, %v8650_v43 }
 0x6b6   :  { %6131 = vmatpush1.bf16.msra.mxu1 %v7442_v39  ;;  %v7654_v39 = vcombine.low %v3191_v28, %v3207_v30 }
 0x6b7   :  { %6541 = vmatpush1.bf16.msra.mxu0 %v7462_v40  ;;  %6132 = vmatprep.subr.bf16.mxu1 %v7475_v42  ;;  %v7157_v40 = vcombine.high %v2702_v37, %v2718_v20  ;;  %v2734_v42 = vld [vmem:[#allocation13 + $0x128] sm:$0xff] }
 0x6b8   :  { %6542 = vmatprep.subr.bf16.mxu0 %v7495_v44  ;;  %v2750_v44 = vld [vmem:[#allocation13 + $0x1a8] sm:$0xff] }
 0x6b9   :  { %v7189_v46 = vcombine.high %v2734_v42, %v2750_v44 }
 0x6ba   :  { %6133 = vmatpush1.bf16.msra.mxu1 %v7474_v49  ;;  %v7188_v49 = vcombine.low %v2734_v42, %v2750_v44  ;;  %v2958_v42 = vld [vmem:[#allocation13 + $0x828] sm:$0xff] }
 0x6bb   :  { %6543 = vmatpush1.bf16.msra.mxu0 %v7494_v52  ;;  %6134 = vmatprep.subr.bf16.mxu1 %v7507_v53  ;;  %v7221_v52 = vcombine.high %v2766_v47, %v2782_v48  ;;  %v2798_v53 = vld [vmem:[#allocation13 + $0x328] sm:$0xff] }
 0x6bc   :  { %6544 = vmatprep.subr.bf16.mxu0 %v7527_v54  ;;  %v2814_v54 = vld [vmem:[#allocation13 + $0x3a8] sm:$0xff] }
 0x6bd   :  { %v7253_v56 = vcombine.high %v2798_v53, %v2814_v54  ;;  %v2974_v44 = vld [vmem:[#allocation13 + $0x8a8] sm:$0xff] }
 0x6be   :  { %6135 = vmatpush1.bf16.msra.mxu1 %v7506_v5  ;;  %v7252_v5 = vcombine.low %v2798_v53, %v2814_v54  ;;  %v7413_v48 = vcombine.high %v2958_v42, %v2974_v44  ;;  %v2990_v53 = vld [vmem:[#allocation13 + $0x928] sm:$0xff]  ;;  %v7412_v58 = vcombine.low %v2958_v42, %v2974_v44 }
 0x6bf   :  { %6545 = vmatpush1.bf16.msra.mxu0 %v7526_v62  ;;  %6136 = vmatprep.subr.bf16.mxu1 %v7539_v0  ;;  %v7285_v62 = vcombine.high %v2830_v57, %v2846_v60  ;;  %v2862_v0 = vld [vmem:[#allocation13 + $0x528] sm:$0xff] }
 0x6c0   :  { %6546 = vmatprep.subr.bf16.mxu0 %v7559_v3  ;;  %v2878_v3 = vld [vmem:[#allocation13 + $0x5a8] sm:$0xff] }
 0x6c1   :  { %v7317_v7 = vcombine.high %v2862_v0, %v2878_v3  ;;  %v7316_v17 = vcombine.low %v2862_v0, %v2878_v3  ;;  %v3006_v54 = vld [vmem:[#allocation13 + $0x9a8] sm:$0xff] }
 0x6c2   :  { %6137 = vmatpush1.bf16.msra.mxu1 %v7538_v10  ;;  %v2910_v10 = vld [vmem:[#allocation13 + $0x6a8] sm:$0xff]  ;;  %v7445_v1 = vcombine.high %v2990_v53, %v3006_v54 }
 0x6c3   :  { %6547 = vmatpush1.bf16.msra.mxu0 %v7558_v11  ;;  %6138 = vmatprep.subr.bf16.mxu1 %v7571_v16  ;;  %v3228_v11 = vrot.slane %v8709_v33, %v8669_v50  ;;  %v3284_v16 = vrot.slane %v8735_v6, %v8647_v41  ;;  %v7349_v19 = vcombine.high %v2894_v9, %v2910_v10  ;;  %v3054_v60 = vld [vmem:[#allocation13 + $0xb28] sm:$0xff] }
 0x6c4   :  { %6548 = vmatprep.subr.bf16.mxu0 %v7591_v15  ;;  %v3232_v15 = vrot.slane %v8709_v33, %v8672_v51  ;;  %v3086_v3 = vld [vmem:[#allocation13 + $0xc28] sm:$0xff] }
 0x6c6   :  { %6139 = vmatpush1.bf16.msra.mxu1 %v7570_v22 }
 0x6c7   :  { %6549 = vmatpush1.bf16.msra.mxu0 %v7590_v23  ;;  %6140 = vmatprep.subr.bf16.mxu1 %v7603_v24  ;;  %v2926_v23 = vld [vmem:[#allocation13 + $0x728] sm:$0xff] }
 0x6c8   :  { %6550 = vmatprep.subr.bf16.mxu0 %v7623_v25  ;;  %v2942_v24 = vld [vmem:[#allocation13 + $0x7a8] sm:$0xff] }
 0x6c9   :  { %v7380_v47 = vcombine.low %v2926_v23, %v2942_v24 }
 0x6ca   :  { %6141 = vmatpush1.bf16.msra.mxu1 %v7602_v31 }
 0x6cb   :  { %6551 = vmatpush1.bf16.msra.mxu0 %v7622_v32  ;;  %6142 = vmatprep.subr.bf16.mxu1 %v7635_v34 }
 0x6cc   :  { %6552 = vmatprep.subr.bf16.mxu0 %v7655_v36  ;;  %v7348_v36 = vcombine.low %v2894_v9, %v2910_v10  ;;  %v3118_v10 = vld [vmem:[#allocation13 + $0xd28] sm:$0xff] }
 0x6ce   :  { %6143 = vmatpush1.bf16.msra.mxu1 %v7634_v38  ;;  %v7381_v38 = vcombine.high %v2926_v23, %v2942_v24  ;;  %v3198_v23 = vld [vmem:[#allocation13 + $0xfa8] sm:$0xff] }
 0x6cf   :  { %6553 = vmatpush1.bf16.msra.mxu0 %v7654_v39  ;;  %6153 = vmatprep.subr.bf16.mxu1 %v7157_v40 }
 0x6d1   :  { %6145 = vmatmul.mubr.bf16.vlgmr.msra.gmra.mrb[24].mxu1 %v8700_v63 }
 0x6d2   :  { %6555 = vmatmul.mubr.bf16.vlgmr.msra.gmra.mrb[20].mxu0 %v8700_v63  ;;  %6154 = vmatpush1.bf16.msra.mxu1 %v7156_v45  ;;  %v6644_v45 = vrot.slane %v6636_v13, %v8677_v61  ;;  %v3022_v13 = vld [vmem:[#allocation13 + $0xa28] sm:$0xff] }
 0x6d3   :  { %6185 = vmatprep.mubr.bf16.mxu1 %v8684_v8  ;;  %6155 = vmatprep.subr.bf16.mxu1 %v7189_v46 }
 0x6d6   :  { %6156 = vmatpush1.bf16.msra.mxu1 %v7188_v49 }
 0x6d7   :  { %6157 = vmatprep.subr.bf16.mxu1 %v7221_v52 }
 0x6da   :  { %6158 = vmatpush1.bf16.msra.mxu1 %v7220_v55  ;;  %v3038_v55 = vld [vmem:[#allocation13 + $0xaa8] sm:$0xff] }
 0x6db   :  { %6159 = vmatprep.subr.bf16.mxu1 %v7253_v56  ;;  %v7444_v56 = vcombine.low %v2990_v53, %v3006_v54  ;;  %v7477_v57 = vcombine.high %v3022_v13, %v3038_v55 }
 0x6de   :  { %6160 = vmatpush1.bf16.msra.mxu1 %v7252_v5  ;;  %v3070_v5 = vld [vmem:[#allocation13 + $0xba8] sm:$0xff] }
 0x6df   :  { %6161 = vmatprep.subr.bf16.mxu1 %v7285_v62  ;;  %v7476_v62 = vcombine.low %v3022_v13, %v3038_v55  ;;  %v7509_v0 = vcombine.high %v3054_v60, %v3070_v5 }
 0x6e2   :  { %6162 = vmatpush1.bf16.msra.mxu1 %v7284_v4  ;;  %v3102_v4 = vld [vmem:[#allocation13 + $0xca8] sm:$0xff] }
 0x6e3   :  { %6163 = vmatprep.subr.bf16.mxu1 %v7317_v7  ;;  %v7508_v7 = vcombine.low %v3054_v60, %v3070_v5  ;;  %v7541_v9 = vcombine.high %v3086_v3, %v3102_v4  ;;  %v3236_v60 = vrot.slane %v8709_v33, %v8707_v29  ;;  %v3300_v5 = vrot.slane %v8735_v6, %v8707_v29 }
 0x6e4   :  { %v6023_v21 = vpop.f32.mrb[12].mxu1  ;;  %v6310_v22 = vpop.f32.mrb[8].mxu0 }
 0x6e5   :  { %v6024_v25 = vadd.f32 %v6023_v21, %v3228_v11  ;;  %v8745_v26 = vadd.f32 %v6310_v22, %v3284_v16  ;;  %v6025_v27 = vpop.f32.mrb[13].mxu1  ;;  %v6312_v28 = vpop.f32.mrb[9].mxu0  ;;  %v3134_v11 = vld [vmem:[#allocation13 + $0xda8] sm:$0xff]  ;;  %v7540_v16 = vcombine.low %v3086_v3, %v3102_v4  ;;  %v3304_v3 = vrot.slane %v8735_v6, %v8712_v35 }
 0x6e6   :  { %v6026_v30 = vadd.f32 %v6025_v27, %v3232_v15  ;;  %v8747_v31 = vadd.f32 %v6312_v28, %v3288_v18  ;;  %v6027_v32 = vpop.f32.mrb[14].mxu1  ;;  %6164 = vmatpush1.bf16.msra.mxu1 %v7316_v17  ;;  %v6314_v34 = vpop.f32.mrb[10].mxu0  ;;  %v7573_v15 = vcombine.high %v3118_v10, %v3134_v11  ;;  %v3150_v17 = vld [vmem:[#allocation13 + $0xe28] sm:$0xff]  ;;  %v2704_v27 = vld [vmem:[#allocation13 + $0x38] sm:$0xff] }
 0x6e7   :  { %v6028_v37 = vpop.f32.mrb[15].mxu1  ;;  %v6315_v20 = vpop.f32.mrb[11].mxu0  ;;  %6165 = vmatprep.subr.bf16.mxu1 %v7349_v19  ;;  %v3166_v18 = vld [vmem:[#allocation13 + $0xea8] sm:$0xff]  ;;  %v7572_v19 = vcombine.low %v3118_v10, %v3134_v11  ;;  %v2720_v28 = vld [vmem:[#allocation13 + $0xb8] sm:$0xff] }
 0x6e8   :  { %v6637_v39 = vcombine.low %v6024_v25, %v6026_v30  ;;  %v6704_v40 = vcombine.low %v8745_v26, %v8747_v31  ;;  %v7605_v21 = vcombine.high %v3150_v17, %v3166_v18  ;;  %v3182_v22 = vld [vmem:[#allocation13 + $0xf28] sm:$0xff]  ;;  %v7604_v24 = vcombine.low %v3150_v17, %v3166_v18  ;;  %v2736_v34 = vld [vmem:[#allocation13 + $0x138] sm:$0xff] }
 0x6e9   :  { %v7637_v25 = vcombine.high %v3182_v22, %v3198_v23  ;;  %v7636_v30 = vcombine.low %v3182_v22, %v3198_v23  ;;  %v7161_v32 = vcombine.high %v2704_v27, %v2720_v28  ;;  %v7160_v37 = vcombine.low %v2704_v27, %v2720_v28  ;;  %v2944_v10 = vld [vmem:[#allocation13 + $0x7b8] sm:$0xff] }
 0x6ea   :  { %v6651_v46 = vrot.slane %v6637_v39, %v8677_v61  ;;  %6166 = vmatpush1.bf16.msra.mxu1 %v7348_v36  ;;  %v2752_v36 = vld [vmem:[#allocation13 + $0x1b8] sm:$0xff] }
 0x6eb   :  { %6167 = vmatprep.subr.bf16.mxu1 %v7381_v38  ;;  %v7193_v20 = vcombine.high %v2736_v34, %v2752_v36  ;;  %v2768_v38 = vld [vmem:[#allocation13 + $0x238] sm:$0xff]  ;;  %v7192_v42 = vcombine.low %v2736_v34, %v2752_v36 }
 0x6ec   :  { %v6652_v49 = vcombine.low %v6644_v45, %v6651_v46  ;;  %v6788_v52 = vcombine.high %v6644_v45, %v6651_v46  ;;  %v2784_v39 = vld [vmem:[#allocation13 + $0x2b8] sm:$0xff] }
 0x6ed   :  { %v7225_v44 = vcombine.high %v2768_v38, %v2784_v39  ;;  %v2800_v45 = vld [vmem:[#allocation13 + $0x338] sm:$0xff] }
 0x6ee   :  { %6780 = vst [vmem:[%s8945_s9] sm:$0xff] %v6652_v49  ;;  %7658 = vst [vmem:[%s8945_s9 + $0x40] sm:$0xff] %v6788_v52  ;;  %6168 = vmatpush1.bf16.msra.mxu1 %v7380_v47  ;;  %v2816_v46 = vld [vmem:[#allocation13 + $0x3b8] sm:$0xff]  ;;  %v7224_v47 = vcombine.low %v2768_v38, %v2784_v39 }
 0x6ef   :  { %6169 = vmatprep.subr.bf16.mxu1 %v7413_v48  ;;  %v7257_v48 = vcombine.high %v2800_v45, %v2816_v46  ;;  %v2832_v49 = vld [vmem:[#allocation13 + $0x438] sm:$0xff]  ;;  %v7256_v53 = vcombine.low %v2800_v45, %v2816_v46 }
 0x6f0   :  { %v2848_v52 = vld [vmem:[#allocation13 + $0x4b8] sm:$0xff] }
 0x6f1   :  { %v7289_v54 = vcombine.high %v2832_v49, %v2848_v52  ;;  %v7288_v13 = vcombine.low %v2832_v49, %v2848_v52  ;;  %v3008_v38 = vld [vmem:[#allocation13 + $0x9b8] sm:$0xff] }
 0x6f2   :  { %6170 = vmatpush1.bf16.msra.mxu1 %v7412_v58  ;;  %v2864_v58 = vld [vmem:[#allocation13 + $0x538] sm:$0xff] }
 0x6f3   :  { %6171 = vmatprep.subr.bf16.mxu1 %v7445_v1  ;;  %v2880_v1 = vld [vmem:[#allocation13 + $0x5b8] sm:$0xff] }
 0x6f4   :  { %v7321_v55 = vcombine.high %v2864_v58, %v2880_v1  ;;  %v3040_v45 = vld [vmem:[#allocation13 + $0xab8] sm:$0xff] }
 0x6f5   :  { %v3072_v49 = vld [vmem:[#allocation13 + $0xbb8] sm:$0xff] }
 0x6f6   :  { %6172 = vmatpush1.bf16.msra.mxu1 %v7444_v56  ;;  %v2896_v56 = vld [vmem:[#allocation13 + $0x638] sm:$0xff] }
 0x6f7   :  { %6173 = vmatprep.subr.bf16.mxu1 %v7477_v57  ;;  %v2912_v57 = vld [vmem:[#allocation13 + $0x6b8] sm:$0xff] }
 0x6f8   :  { %v7353_v4 = vcombine.high %v2896_v56, %v2912_v57  ;;  %v7352_v22 = vcombine.low %v2896_v56, %v2912_v57  ;;  %v3136_v56 = vld [vmem:[#allocation13 + $0xdb8] sm:$0xff] }
 0x6fa   :  { %6174 = vmatpush1.bf16.msra.mxu1 %v7476_v62  ;;  %v3240_v62 = vrot.slane %v8709_v33, %v8712_v35 }
 0x6fb   :  { %6175 = vmatprep.subr.bf16.mxu1 %v7509_v0  ;;  %v7320_v0 = vcombine.low %v2864_v58, %v2880_v1  ;;  %v3104_v58 = vld [vmem:[#allocation13 + $0xcb8] sm:$0xff] }
 0x6fe   :  { %6176 = vmatpush1.bf16.msra.mxu1 %v7508_v7 }
 0x6ff   :  { %6177 = vmatprep.subr.bf16.mxu1 %v7541_v9  ;;  %v2928_v9 = vld [vmem:[#allocation13 + $0x738] sm:$0xff] }
 0x700   :  { %v7384_v36 = vcombine.low %v2928_v9, %v2944_v10 }
 0x702   :  { %6178 = vmatpush1.bf16.msra.mxu1 %v7540_v16 }
 0x703   :  { %6179 = vmatprep.subr.bf16.mxu1 %v7573_v15 }
 0x706   :  { %6180 = vmatpush1.bf16.msra.mxu1 %v7572_v19 }
 0x707   :  { %6181 = vmatprep.subr.bf16.mxu1 %v7605_v21 }
 0x70a   :  { %6182 = vmatpush1.bf16.msra.mxu1 %v7604_v24 }
 0x70b   :  { %6183 = vmatprep.subr.bf16.mxu1 %v7637_v25  ;;  %v7385_v25 = vcombine.high %v2928_v9, %v2944_v10 }
 0x70e   :  { %6184 = vmatpush1.bf16.msra.mxu1 %v7636_v30  ;;  %v2960_v30 = vld [vmem:[#allocation13 + $0x838] sm:$0xff] }
 0x70f   :  { %6235 = vmatprep.subr.bf16.mxu1 %v7161_v32  ;;  %v2976_v32 = vld [vmem:[#allocation13 + $0x8b8] sm:$0xff] }
 0x710   :  { %v7416_v39 = vcombine.low %v2960_v30, %v2976_v32 }
 0x711   :  { %6186 = vmatmul.mubr.bf16.vlgmr.msra.gmra.mrb[28].mxu1 %v8700_v63 }
 0x712   :  { %6236 = vmatpush1.bf16.msra.mxu1 %v7160_v37  ;;  %6267 = vmatprep.mubr.bf16.mxu1 %v8684_v8  ;;  %v7417_v37 = vcombine.high %v2960_v30, %v2976_v32  ;;  %v2786_v30 = vld [vmem:[#allocation13 + $0x2c8] sm:$0xff] }
 0x713   :  { %6237 = vmatprep.subr.bf16.mxu1 %v7193_v20  ;;  %v2992_v20 = vld [vmem:[#allocation13 + $0x938] sm:$0xff] }
 0x714   :  { %v7448_v46 = vcombine.low %v2992_v20, %v3008_v38 }
 0x716   :  { %6238 = vmatpush1.bf16.msra.mxu1 %v7192_v42  ;;  %v7449_v42 = vcombine.high %v2992_v20, %v3008_v38  ;;  %v2818_v20 = vld [vmem:[#allocation13 + $0x3c8] sm:$0xff] }
 0x717   :  { %6239 = vmatprep.subr.bf16.mxu1 %v7225_v44  ;;  %v3024_v44 = vld [vmem:[#allocation13 + $0xa38] sm:$0xff] }
 0x718   :  { %v7480_v52 = vcombine.low %v3024_v44, %v3040_v45 }
 0x71a   :  { %6240 = vmatpush1.bf16.msra.mxu1 %v7224_v47  ;;  %v7481_v47 = vcombine.high %v3024_v44, %v3040_v45  ;;  %v2850_v44 = vld [vmem:[#allocation13 + $0x4c8] sm:$0xff] }
 0x71b   :  { %6241 = vmatprep.subr.bf16.mxu1 %v7257_v48  ;;  %v3056_v48 = vld [vmem:[#allocation13 + $0xb38] sm:$0xff] }
 0x71c   :  { %v7512_v1 = vcombine.low %v3056_v48, %v3072_v49 }
 0x71e   :  { %6242 = vmatpush1.bf16.msra.mxu1 %v7256_v53  ;;  %v7513_v53 = vcombine.high %v3056_v48, %v3072_v49  ;;  %v8787_v48 = vsub.s32 6, %v8563_v12 }
 0x71f   :  { %6243 = vmatprep.subr.bf16.mxu1 %v7289_v54  ;;  %v3088_v54 = vld [vmem:[#allocation13 + $0xc38] sm:$0xff] }
 0x720   :  { %v7544_v57 = vcombine.low %v3088_v54, %v3104_v58 }
 0x722   :  { %6244 = vmatpush1.bf16.msra.mxu1 %v7288_v13  ;;  %v7545_v13 = vcombine.high %v3088_v54, %v3104_v58  ;;  %v2898_v58 = vld [vmem:[#allocation13 + $0x648] sm:$0xff] }
 0x723   :  { %6245 = vmatprep.subr.bf16.mxu1 %v7321_v55  ;;  %v3120_v55 = vld [vmem:[#allocation13 + $0xd38] sm:$0xff] }
 0x724   :  { %v6064_v7 = vpop.f32.mrb[16].mxu1 }
 0x725   :  { %v8772_v11 = vadd.f32 %v6064_v7, %v3236_v60  ;;  %v6392_v16 = vpop.f32.mrb[12].mxu0  ;;  %v6066_v15 = vpop.f32.mrb[17].mxu1  ;;  %v7577_v60 = vcombine.high %v3120_v55, %v3136_v56  ;;  %v3200_v7 = vld [vmem:[#allocation13 + $0xfb8] sm:$0xff] }
 0x726   :  { %v8774_v17 = vadd.f32 %v6392_v16, %v3300_v5  ;;  %v8776_v18 = vadd.f32 %v6066_v15, %v3240_v62  ;;  %v6394_v19 = vpop.f32.mrb[13].mxu0  ;;  %v6068_v21 = vpop.f32.mrb[18].mxu1  ;;  %6246 = vmatpush1.bf16.msra.mxu1 %v7320_v0  ;;  %v3152_v5 = vld [vmem:[#allocation13 + $0xe38] sm:$0xff]  ;;  %v7576_v0 = vcombine.low %v3120_v55, %v3136_v56  ;;  %v2706_v16 = vld [vmem:[#allocation13 + $0x48] sm:$0xff] }
 0x727   :  { %v8778_v23 = vadd.f32 %v6394_v19, %v3304_v3  ;;  %v6396_v24 = vpop.f32.mrb[14].mxu0  ;;  %v6069_v6 = vpop.f32.mrb[19].mxu1  ;;  %6247 = vmatprep.subr.bf16.mxu1 %v7353_v4  ;;  %v3168_v62 = vld [vmem:[#allocation13 + $0xeb8] sm:$0xff]  ;;  %v2722_v15 = vld [vmem:[#allocation13 + $0xc8] sm:$0xff] }
 0x728   :  { %v6653_v27 = vcombine.low %v8772_v11, %v8776_v18  ;;  %v6397_v28 = vpop.f32.mrb[15].mxu0  ;;  %v7609_v3 = vcombine.high %v3152_v5, %v3168_v62  ;;  %v3184_v4 = vld [vmem:[#allocation13 + $0xf38] sm:$0xff]  ;;  %v7608_v9 = vcombine.low %v3152_v5, %v3168_v62  ;;  %v7165_v21 = vcombine.high %v2706_v16, %v2722_v15  ;;  %v2754_v24 = vld [vmem:[#allocation13 + $0x1c8] sm:$0xff] }
 0x729   :  { %v6721_v34 = vcombine.low %v8774_v17, %v8778_v23  ;;  %v7641_v10 = vcombine.high %v3184_v4, %v3200_v7  ;;  %v7640_v19 = vcombine.low %v3184_v4, %v3200_v7  ;;  %v7164_v6 = vcombine.low %v2706_v16, %v2722_v15  ;;  %v2770_v28 = vld [vmem:[#allocation13 + $0x248] sm:$0xff] }
 0x72a   :  { %6248 = vmatpush1.bf16.msra.mxu1 %v7352_v22  ;;  %v2738_v22 = vld [vmem:[#allocation13 + $0x148] sm:$0xff]  ;;  %v7228_v38 = vcombine.low %v2770_v28, %v2786_v30 }
 0x72b   :  { %6249 = vmatprep.subr.bf16.mxu1 %v7385_v25  ;;  %v7197_v25 = vcombine.high %v2738_v22, %v2754_v24  ;;  %v7196_v32 = vcombine.low %v2738_v22, %v2754_v24  ;;  %v2930_v62 = vld [vmem:[#allocation13 + $0x748] sm:$0xff] }
 0x72e   :  { %6250 = vmatpush1.bf16.msra.mxu1 %v7384_v36  ;;  %v7229_v36 = vcombine.high %v2770_v28, %v2786_v30  ;;  %v2962_v28 = vld [vmem:[#allocation13 + $0x848] sm:$0xff] }
 0x72f   :  { %6251 = vmatprep.subr.bf16.mxu1 %v7417_v37  ;;  %v2802_v37 = vld [vmem:[#allocation13 + $0x348] sm:$0xff] }
 0x730   :  { %v7260_v45 = vcombine.low %v2802_v37, %v2818_v20  ;;  %v2978_v30 = vld [vmem:[#allocation13 + $0x8c8] sm:$0xff] }
 0x731   :  { %v7420_v11 = vcombine.low %v2962_v28, %v2978_v30 }
 0x732   :  { %6252 = vmatpush1.bf16.msra.mxu1 %v7416_v39  ;;  %v7261_v39 = vcombine.high %v2802_v37, %v2818_v20 }
 0x733   :  { %6253 = vmatprep.subr.bf16.mxu1 %v7449_v42  ;;  %v2834_v42 = vld [vmem:[#allocation13 + $0x448] sm:$0xff] }
 0x734   :  { %v7292_v49 = vcombine.low %v2834_v42, %v2850_v44 }
 0x736   :  { %6254 = vmatpush1.bf16.msra.mxu1 %v7448_v46  ;;  %v7293_v46 = vcombine.high %v2834_v42, %v2850_v44  ;;  %v2994_v44 = vld [vmem:[#allocation13 + $0x948] sm:$0xff] }
 0x737   :  { %6255 = vmatprep.subr.bf16.mxu1 %v7481_v47  ;;  %v2866_v47 = vld [vmem:[#allocation13 + $0x548] sm:$0xff] }
 0x73a   :  { %6256 = vmatpush1.bf16.msra.mxu1 %v7480_v52  ;;  %v8790_v52 = vsub.s32 7, %v8563_v12 }
 0x73b   :  { %6257 = vmatprep.subr.bf16.mxu1 %v7513_v53  ;;  %v8792_v53 = vld [vmem:[#allocation14 + $0x18] sm:$0xff] }
 0x73c   :  { %v3316_v55 = vrot.slane %v8792_v53, %v8647_v41  ;;  %v3248_v56 = vrot.slane %v8709_v33, %v8790_v52  ;;  %v3320_v12 = vrot.slane %v8792_v53, %v8650_v43 }
 0x73e   :  { %6258 = vmatpush1.bf16.msra.mxu1 %v7512_v1  ;;  %v2914_v1 = vld [vmem:[#allocation13 + $0x6c8] sm:$0xff] }
 0x73f   :  { %6259 = vmatprep.subr.bf16.mxu1 %v7545_v13  ;;  %v3244_v13 = vrot.slane %v8709_v33, %v8787_v48 }
 0x742   :  { %6260 = vmatpush1.bf16.msra.mxu1 %v7544_v57 }
 0x743   :  { %6261 = vmatprep.subr.bf16.mxu1 %v7577_v60  ;;  %v7357_v60 = vcombine.high %v2898_v58, %v2914_v1 }
 0x746   :  { %6262 = vmatpush1.bf16.msra.mxu1 %v7576_v0  ;;  %v2946_v0 = vld [vmem:[#allocation13 + $0x7c8] sm:$0xff] }
 0x747   :  { %6263 = vmatprep.subr.bf16.mxu1 %v7609_v3  ;;  %v7389_v24 = vcombine.high %v2930_v62, %v2946_v0  ;;  %v7388_v20 = vcombine.low %v2930_v62, %v2946_v0  ;;  %v3154_v0 = vld [vmem:[#allocation13 + $0xe48] sm:$0xff] }
 0x74a   :  { %6264 = vmatpush1.bf16.msra.mxu1 %v7608_v9 }
 0x74b   :  { %6265 = vmatprep.subr.bf16.mxu1 %v7641_v10 }
 0x74e   :  { %6266 = vmatpush1.bf16.msra.mxu1 %v7640_v19  ;;  %v7356_v19 = vcombine.low %v2898_v58, %v2914_v1 }
 0x74f   :  { %6317 = vmatprep.subr.bf16.mxu1 %v7165_v21 }
 0x751   :  { %6268 = vmatmul.mubr.bf16.vlgmr.msra.gmra.mrb[32].mxu1 %v8700_v63  ;;  %v2882_v63 = vld [vmem:[#allocation13 + $0x5c8] sm:$0xff] }
 0x752   :  { %6318 = vmatpush1.bf16.msra.mxu1 %v7164_v6  ;;  %6349 = vmatprep.mubr.bf16.mxu1 %v8684_v8  ;;  %v7325_v54 = vcombine.high %v2866_v47, %v2882_v63  ;;  %v7324_v57 = vcombine.low %v2866_v47, %v2882_v63 }
 0x753   :  { %6319 = vmatprep.subr.bf16.mxu1 %v7197_v25 }
 0x756   :  { %6320 = vmatpush1.bf16.msra.mxu1 %v7196_v32 }
 0x757   :  { %6321 = vmatprep.subr.bf16.mxu1 %v7229_v36  ;;  %v6661_v36 = vrot.slane %v6653_v27, %v8677_v61  ;;  %v3026_v27 = vld [vmem:[#allocation13 + $0xa48] sm:$0xff] }
 0x75a   :  { %6322 = vmatpush1.bf16.msra.mxu1 %v7228_v38  ;;  %v7421_v38 = vcombine.high %v2962_v28, %v2978_v30  ;;  %v2756_v28 = vld [vmem:[#allocation13 + $0x1d8] sm:$0xff] }
 0x75b   :  { %6323 = vmatprep.subr.bf16.mxu1 %v7261_v39 }
 0x75e   :  { %6324 = vmatpush1.bf16.msra.mxu1 %v7260_v45  ;;  %v3010_v45 = vld [vmem:[#allocation13 + $0x9c8] sm:$0xff] }
 0x75f   :  { %6325 = vmatprep.subr.bf16.mxu1 %v7293_v46  ;;  %v7453_v18 = vcombine.high %v2994_v44, %v3010_v45  ;;  %v3042_v46 = vld [vmem:[#allocation13 + $0xac8] sm:$0xff]  ;;  %v7452_v47 = vcombine.low %v2994_v44, %v3010_v45  ;;  %v2804_v44 = vld [vmem:[#allocation13 + $0x358] sm:$0xff] }
 0x760   :  { %v7485_v63 = vcombine.high %v3026_v27, %v3042_v46  ;;  %v7484_v58 = vcombine.low %v3026_v27, %v3042_v46  ;;  %v2820_v45 = vld [vmem:[#allocation13 + $0x3d8] sm:$0xff] }
 0x761   :  { %v2836_v27 = vld [vmem:[#allocation13 + $0x458] sm:$0xff] }
 0x762   :  { %6326 = vmatpush1.bf16.msra.mxu1 %v7292_v49  ;;  %v3058_v49 = vld [vmem:[#allocation13 + $0xb48] sm:$0xff]  ;;  %v2852_v46 = vld [vmem:[#allocation13 + $0x4d8] sm:$0xff] }
 0x763   :  { %6327 = vmatprep.subr.bf16.mxu1 %v7325_v54  ;;  %v3074_v54 = vld [vmem:[#allocation13 + $0xbc8] sm:$0xff] }
 0x764   :  { %v6105_v5 = vpop.f32.mrb[20].mxu1  ;;  %v7517_v1 = vcombine.high %v3058_v49, %v3074_v54 }
 0x765   :  { %v6106_v3 = vadd.f32 %v6105_v5, %v3244_v13  ;;  %v6474_v4 = vpop.f32.mrb[16].mxu0  ;;  %v6107_v7 = vpop.f32.mrb[21].mxu1  ;;  %v3090_v13 = vld [vmem:[#allocation13 + $0xc48] sm:$0xff] }
 0x766   :  { %v8802_v9 = vadd.f32 %v6474_v4, %v3316_v55  ;;  %v6108_v10 = vadd.f32 %v6107_v7, %v3248_v56  ;;  %v6476_v16 = vpop.f32.mrb[17].mxu0  ;;  %v6109_v15 = vpop.f32.mrb[22].mxu1  ;;  %6328 = vmatpush1.bf16.msra.mxu1 %v7324_v57  ;;  %v3106_v55 = vld [vmem:[#allocation13 + $0xcc8] sm:$0xff]  ;;  %v7516_v56 = vcombine.low %v3058_v49, %v3074_v54  ;;  %v2868_v49 = vld [vmem:[#allocation13 + $0x558] sm:$0xff] }
 0x767   :  { %v8804_v33 = vadd.f32 %v6476_v16, %v3320_v12  ;;  %v6478_v21 = vpop.f32.mrb[18].mxu0  ;;  %v6110_v22 = vpop.f32.mrb[23].mxu1  ;;  %6329 = vmatprep.subr.bf16.mxu1 %v7357_v60  ;;  %v7549_v57 = vcombine.high %v3090_v13, %v3106_v55  ;;  %v3122_v12 = vld [vmem:[#allocation13 + $0xd48] sm:$0xff]  ;;  %v7548_v5 = vcombine.low %v3090_v13, %v3106_v55  ;;  %v2884_v54 = vld [vmem:[#allocation13 + $0x5d8] sm:$0xff] }
 0x768   :  { %v6654_v6 = vcombine.low %v6106_v3, %v6108_v10  ;;  %v6479_v25 = vpop.f32.mrb[19].mxu0  ;;  %v3138_v60 = vld [vmem:[#allocation13 + $0xdc8] sm:$0xff]  ;;  %v2708_v21 = vld [vmem:[#allocation13 + $0x58] sm:$0xff] }
 0x769   :  { %v6738_v32 = vcombine.low %v8802_v9, %v8804_v33  ;;  %v7581_v62 = vcombine.high %v3122_v12, %v3138_v60  ;;  %v3170_v3 = vld [vmem:[#allocation13 + $0xec8] sm:$0xff]  ;;  %v7580_v4 = vcombine.low %v3122_v12, %v3138_v60  ;;  %v2724_v22 = vld [vmem:[#allocation13 + $0xd8] sm:$0xff]  ;;  %v3332_v12 = vrot.slane %v8792_v53, %v8707_v29 }
 0x76a   :  { %v6668_v37 = vrot.slane %v6654_v6, %v8677_v61  ;;  %6330 = vmatpush1.bf16.msra.mxu1 %v7356_v19  ;;  %v7613_v7 = vcombine.high %v3154_v0, %v3170_v3  ;;  %v3186_v10 = vld [vmem:[#allocation13 + $0xf48] sm:$0xff]  ;;  %v7612_v15 = vcombine.low %v3154_v0, %v3170_v3  ;;  %v7169_v6 = vcombine.high %v2708_v21, %v2724_v22  ;;  %v2740_v25 = vld [vmem:[#allocation13 + $0x158] sm:$0xff] }
 0x76b   :  { %6331 = vmatprep.subr.bf16.mxu1 %v7389_v24  ;;  %v3202_v16 = vld [vmem:[#allocation13 + $0xfc8] sm:$0xff]  ;;  %v7168_v30 = vcombine.low %v2708_v21, %v2724_v22  ;;  %v2900_v13 = vld [vmem:[#allocation13 + $0x658] sm:$0xff] }
 0x76c   :  { %v6669_v39 = vcombine.low %v6661_v36, %v6668_v37  ;;  %v6789_v42 = vcombine.high %v6661_v36, %v6668_v37  ;;  %v7645_v19 = vcombine.high %v3186_v10, %v3202_v16  ;;  %v7644_v24 = vcombine.low %v3186_v10, %v3202_v16  ;;  %v2772_v37 = vld [vmem:[#allocation13 + $0x258] sm:$0xff] }
 0x76d   :  { %v7201_v36 = vcombine.high %v2740_v25, %v2756_v28  ;;  %v2916_v55 = vld [vmem:[#allocation13 + $0x6d8] sm:$0xff] }
 0x76e   :  { %6781 = vst [vmem:[%s8945_s9 + $0x8] sm:$0xff] %v6669_v39  ;;  %7659 = vst [vmem:[%s8945_s9 + $0x48] sm:$0xff] %v6789_v42  ;;  %6332 = vmatpush1.bf16.msra.mxu1 %v7388_v20  ;;  %v2788_v20 = vld [vmem:[#allocation13 + $0x2d8] sm:$0xff]  ;;  %v7200_v39 = vcombine.low %v2740_v25, %v2756_v28  ;;  %v7361_v0 = vcombine.high %v2900_v13, %v2916_v55 }
 0x76f   :  { %6333 = vmatprep.subr.bf16.mxu1 %v7421_v38  ;;  %v8819_v38 = vld.sshfl [vmem:[#allocation2] sm:$0x33 pattern:$0x76325410]  ;;  %v7233_v42 = vcombine.high %v2772_v37, %v2788_v20 }
 0x772   :  { %6334 = vmatpush1.bf16.msra.mxu1 %v7420_v11  ;;  %v7232_v11 = vcombine.low %v2772_v37, %v2788_v20 }
 0x773   :  { %6335 = vmatprep.subr.bf16.mxu1 %v7453_v18  ;;  %v7265_v18 = vcombine.high %v2804_v44, %v2820_v45 }
 0x776   :  { %6336 = vmatpush1.bf16.msra.mxu1 %v7452_v47  ;;  %v7264_v47 = vcombine.low %v2804_v44, %v2820_v45  ;;  %v3012_v44 = vld [vmem:[#allocation13 + $0x9d8] sm:$0xff] }
 0x777   :  { %6337 = vmatprep.subr.bf16.mxu1 %v7485_v63  ;;  %v7297_v63 = vcombine.high %v2836_v27, %v2852_v46 }
 0x77a   :  { %6338 = vmatpush1.bf16.msra.mxu1 %v7484_v58  ;;  %v7296_v58 = vcombine.low %v2836_v27, %v2852_v46  ;;  %v3044_v27 = vld [vmem:[#allocation13 + $0xad8] sm:$0xff] }
 0x77b   :  { %6339 = vmatprep.subr.bf16.mxu1 %v7517_v1  ;;  %v7329_v1 = vcombine.high %v2868_v49, %v2884_v54 }
 0x77e   :  { %6340 = vmatpush1.bf16.msra.mxu1 %v7516_v56  ;;  %v8823_v56 = vld [vmem:[#allocation14 + $0x8] sm:$0xff] }
 0x77f   :  { %6341 = vmatprep.subr.bf16.mxu1 %v7549_v57  ;;  %v3252_v57 = vrot.slane %v8823_v56, %v8647_v41  ;;  %v3256_v60 = vrot.slane %v8823_v56, %v8650_v43  ;;  %v7360_v43 = vcombine.low %v2900_v13, %v2916_v55  ;;  %v3108_v13 = vld [vmem:[#allocation13 + $0xcd8] sm:$0xff] }
 0x782   :  { %6342 = vmatpush1.bf16.msra.mxu1 %v7548_v5  ;;  %v7328_v5 = vcombine.low %v2868_v49, %v2884_v54  ;;  %v3076_v49 = vld [vmem:[#allocation13 + $0xbd8] sm:$0xff] }
 0x783   :  { %6343 = vmatprep.subr.bf16.mxu1 %v7581_v62  ;;  %v3336_v62 = vrot.slane %v8792_v53, %v8712_v35 }
 0x786   :  { %6344 = vmatpush1.bf16.msra.mxu1 %v7580_v4  ;;  %v2932_v4 = vld [vmem:[#allocation13 + $0x758] sm:$0xff] }
 0x787   :  { %6345 = vmatprep.subr.bf16.mxu1 %v7613_v7  ;;  %v2948_v7 = vld [vmem:[#allocation13 + $0x7d8] sm:$0xff] }
 0x788   :  { %v7392_v20 = vcombine.low %v2932_v4, %v2948_v7 }
 0x78a   :  { %6346 = vmatpush1.bf16.msra.mxu1 %v7612_v15 }
 0x78b   :  { %6347 = vmatprep.subr.bf16.mxu1 %v7645_v19 }
 0x78e   :  { %6348 = vmatpush1.bf16.msra.mxu1 %v7644_v24 }
 0x78f   :  { %6399 = vmatprep.subr.bf16.mxu1 %v7169_v6  ;;  %v7393_v6 = vcombine.high %v2932_v4, %v2948_v7 }
 0x791   :  { %6350 = vmatmul.mubr.bf16.vlgmr.msra.gmra.mrb[36].mxu1 %v8819_v38 }
 0x792   :  { %6400 = vmatpush1.bf16.msra.mxu1 %v7168_v30  ;;  %6431 = vmatprep.mubr.bf16.mxu1 %v8684_v8  ;;  %v2964_v30 = vld [vmem:[#allocation13 + $0x858] sm:$0xff] }
 0x793   :  { %6401 = vmatprep.subr.bf16.mxu1 %v7201_v36  ;;  %v2980_v36 = vld [vmem:[#allocation13 + $0x8d8] sm:$0xff] }
 0x794   :  { %v7424_v45 = vcombine.low %v2964_v30, %v2980_v36 }
 0x796   :  { %6402 = vmatpush1.bf16.msra.mxu1 %v7200_v39  ;;  %v7425_v39 = vcombine.high %v2964_v30, %v2980_v36  ;;  %v2758_v30 = vld [vmem:[#allocation13 + $0x1e8] sm:$0xff] }
 0x797   :  { %6403 = vmatprep.subr.bf16.mxu1 %v7233_v42  ;;  %v2996_v42 = vld [vmem:[#allocation13 + $0x958] sm:$0xff] }
 0x798   :  { %v7456_v46 = vcombine.low %v2996_v42, %v3012_v44 }
 0x79a   :  { %6404 = vmatpush1.bf16.msra.mxu1 %v7232_v11  ;;  %v7457_v11 = vcombine.high %v2996_v42, %v3012_v44  ;;  %v2790_v42 = vld [vmem:[#allocation13 + $0x2e8] sm:$0xff] }
 0x79b   :  { %6405 = vmatprep.subr.bf16.mxu1 %v7265_v18  ;;  %v3028_v18 = vld [vmem:[#allocation13 + $0xa58] sm:$0xff] }
 0x79c   :  { %v7488_v54 = vcombine.low %v3028_v18, %v3044_v27 }
 0x79e   :  { %6406 = vmatpush1.bf16.msra.mxu1 %v7264_v47  ;;  %v7489_v47 = vcombine.high %v3028_v18, %v3044_v27  ;;  %v2822_v18 = vld [vmem:[#allocation13 + $0x3e8] sm:$0xff] }
 0x79f   :  { %6407 = vmatprep.subr.bf16.mxu1 %v7297_v63  ;;  %v3060_v63 = vld [vmem:[#allocation13 + $0xb58] sm:$0xff] }
 0x7a0   :  { %v7520_v55 = vcombine.low %v3060_v63, %v3076_v49 }
 0x7a2   :  { %6408 = vmatpush1.bf16.msra.mxu1 %v7296_v58  ;;  %v7521_v58 = vcombine.high %v3060_v63, %v3076_v49  ;;  %v2854_v63 = vld [vmem:[#allocation13 + $0x4e8] sm:$0xff] }
 0x7a3   :  { %6409 = vmatprep.subr.bf16.mxu1 %v7329_v1  ;;  %v3092_v1 = vld [vmem:[#allocation13 + $0xc58] sm:$0xff] }
 0x7a4   :  { %v6146_v3 = vpop.f32.mrb[24].mxu1 }
 0x7a5   :  { %v8833_v10 = vadd.f32 %v6146_v3, %v3252_v57  ;;  %v6556_v16 = vpop.f32.mrb[20].mxu0  ;;  %v6148_v41 = vpop.f32.mrb[25].mxu1  ;;  %v7553_v57 = vcombine.high %v3092_v1, %v3108_v13  ;;  %v3172_v3 = vld [vmem:[#allocation13 + $0xed8] sm:$0xff] }
 0x7a6   :  { %v8835_v15 = vadd.f32 %v6556_v16, %v3332_v12  ;;  %v8837_v19 = vadd.f32 %v6148_v41, %v3256_v60  ;;  %v6558_v29 = vpop.f32.mrb[21].mxu0  ;;  %v6150_v21 = vpop.f32.mrb[26].mxu1  ;;  %6410 = vmatpush1.bf16.msra.mxu1 %v7328_v5  ;;  %v3124_v12 = vld [vmem:[#allocation13 + $0xd58] sm:$0xff]  ;;  %v7552_v5 = vcombine.low %v3092_v1, %v3108_v13  ;;  %v2886_v1 = vld [vmem:[#allocation13 + $0x5e8] sm:$0xff] }
 0x7a7   :  { %v8839_v22 = vadd.f32 %v6558_v29, %v3336_v62  ;;  %v6560_v24 = vpop.f32.mrb[22].mxu0  ;;  %v6151_v35 = vpop.f32.mrb[27].mxu1  ;;  %6411 = vmatprep.subr.bf16.mxu1 %v7361_v0  ;;  %v3140_v60 = vld [vmem:[#allocation13 + $0xdd8] sm:$0xff] }
 0x7a8   :  { %v6670_v25 = vcombine.low %v8833_v10, %v8837_v19  ;;  %v6561_v28 = vpop.f32.mrb[23].mxu0  ;;  %v7585_v62 = vcombine.high %v3124_v12, %v3140_v60  ;;  %v3156_v0 = vld [vmem:[#allocation13 + $0xe58] sm:$0xff]  ;;  %v7584_v4 = vcombine.low %v3124_v12, %v3140_v60  ;;  %v2726_v24 = vld [vmem:[#allocation13 + $0xe8] sm:$0xff]  ;;  %v3260_v60 = vrot.slane %v8823_v56, %v8669_v50 }
 0x7a9   :  { %v6755_v37 = vcombine.low %v8835_v15, %v8839_v22  ;;  %v7617_v7 = vcombine.high %v3156_v0, %v3172_v3  ;;  %v3188_v16 = vld [vmem:[#allocation13 + $0xf58] sm:$0xff]  ;;  %v7616_v29 = vcombine.low %v3156_v0, %v3172_v3  ;;  %v2742_v28 = vld [vmem:[#allocation13 + $0x168] sm:$0xff] }
 0x7aa   :  { %6412 = vmatpush1.bf16.msra.mxu1 %v7360_v43  ;;  %v3204_v41 = vld [vmem:[#allocation13 + $0xfd8] sm:$0xff]  ;;  %v2710_v43 = vld [vmem:[#allocation13 + $0x68] sm:$0xff]  ;;  %v7204_v44 = vcombine.low %v2742_v28, %v2758_v30 }
 0x7ab   :  { %6413 = vmatprep.subr.bf16.mxu1 %v7393_v6  ;;  %v7649_v21 = vcombine.high %v3188_v16, %v3204_v41  ;;  %v7648_v35 = vcombine.low %v3188_v16, %v3204_v41  ;;  %v7173_v6 = vcombine.high %v2710_v43, %v2726_v24  ;;  %v7172_v36 = vcombine.low %v2710_v43, %v2726_v24  ;;  %v2918_v12 = vld [vmem:[#allocation13 + $0x6e8] sm:$0xff] }
 0x7ae   :  { %6414 = vmatpush1.bf16.msra.mxu1 %v7392_v20  ;;  %v7205_v20 = vcombine.high %v2742_v28, %v2758_v30  ;;  %v2966_v28 = vld [vmem:[#allocation13 + $0x868] sm:$0xff] }
 0x7af   :  { %6415 = vmatprep.subr.bf16.mxu1 %v7425_v39  ;;  %v2774_v39 = vld [vmem:[#allocation13 + $0x268] sm:$0xff] }
 0x7b0   :  { %v7236_v27 = vcombine.low %v2774_v39, %v2790_v42  ;;  %v2982_v30 = vld [vmem:[#allocation13 + $0x8e8] sm:$0xff] }
 0x7b1   :  { %v7428_v10 = vcombine.low %v2966_v28, %v2982_v30 }
 0x7b2   :  { %6416 = vmatpush1.bf16.msra.mxu1 %v7424_v45  ;;  %v7237_v45 = vcombine.high %v2774_v39, %v2790_v42  ;;  %v7429_v42 = vcombine.high %v2966_v28, %v2982_v30  ;;  %v2744_v28 = vld [vmem:[#allocation13 + $0x178] sm:$0xff] }
 0x7b3   :  { %6417 = vmatprep.subr.bf16.mxu1 %v7457_v11  ;;  %v2806_v11 = vld [vmem:[#allocation13 + $0x368] sm:$0xff]  ;;  %v2760_v30 = vld [vmem:[#allocation13 + $0x1f8] sm:$0xff] }
 0x7b4   :  { %v7268_v49 = vcombine.low %v2806_v11, %v2822_v18 }
 0x7b6   :  { %6418 = vmatpush1.bf16.msra.mxu1 %v7456_v46  ;;  %v7269_v46 = vcombine.high %v2806_v11, %v2822_v18  ;;  %v2998_v11 = vld [vmem:[#allocation13 + $0x968] sm:$0xff] }
 0x7b7   :  { %6419 = vmatprep.subr.bf16.mxu1 %v7489_v47  ;;  %v2838_v47 = vld [vmem:[#allocation13 + $0x468] sm:$0xff] }
 0x7b8   :  { %v7300_v13 = vcombine.low %v2838_v47, %v2854_v63  ;;  %v3014_v18 = vld [vmem:[#allocation13 + $0x9e8] sm:$0xff] }
 0x7b9   :  { %v7461_v19 = vcombine.high %v2998_v11, %v3014_v18 }
 0x7ba   :  { %6420 = vmatpush1.bf16.msra.mxu1 %v7488_v54  ;;  %v7301_v54 = vcombine.high %v2838_v47, %v2854_v63  ;;  %v3062_v63 = vld [vmem:[#allocation13 + $0xb68] sm:$0xff] }
 0x7bb   :  { %6421 = vmatprep.subr.bf16.mxu1 %v7521_v58  ;;  %v2870_v58 = vld [vmem:[#allocation13 + $0x568] sm:$0xff] }
 0x7be   :  { %6422 = vmatpush1.bf16.msra.mxu1 %v7520_v55  ;;  %v7333_v55 = vcombine.high %v2870_v58, %v2886_v1 }
 0x7bf   :  { %6423 = vmatprep.subr.bf16.mxu1 %v7553_v57  ;;  %v2902_v57 = vld [vmem:[#allocation13 + $0x668] sm:$0xff] }
 0x7c0   :  { %v7365_v0 = vcombine.high %v2902_v57, %v2918_v12  ;;  %v7364_v43 = vcombine.low %v2902_v57, %v2918_v12  ;;  %v3126_v12 = vld [vmem:[#allocation13 + $0xd68] sm:$0xff] }
 0x7c2   :  { %6424 = vmatpush1.bf16.msra.mxu1 %v7552_v5  ;;  %v3264_v5 = vrot.slane %v8823_v56, %v8672_v51 }
 0x7c3   :  { %6425 = vmatprep.subr.bf16.mxu1 %v7585_v62  ;;  %v7332_v62 = vcombine.low %v2870_v58, %v2886_v1  ;;  %v3094_v1 = vld [vmem:[#allocation13 + $0xc68] sm:$0xff] }
 0x7c6   :  { %6426 = vmatpush1.bf16.msra.mxu1 %v7584_v4  ;;  %v2934_v4 = vld [vmem:[#allocation13 + $0x768] sm:$0xff] }
 0x7c7   :  { %6427 = vmatprep.subr.bf16.mxu1 %v7617_v7  ;;  %v2950_v7 = vld [vmem:[#allocation13 + $0x7e8] sm:$0xff] }
 0x7c8   :  { %v7396_v39 = vcombine.low %v2934_v4, %v2950_v7 }
 0x7ca   :  { %6428 = vmatpush1.bf16.msra.mxu1 %v7616_v29 }
 0x7cb   :  { %6429 = vmatprep.subr.bf16.mxu1 %v7649_v21 }
 0x7ce   :  { %6430 = vmatpush1.bf16.msra.mxu1 %v7648_v35  ;;  %v7397_v35 = vcombine.high %v2934_v4, %v2950_v7 }
 0x7cf   :  { %6481 = vmatprep.subr.bf16.mxu1 %v7173_v6 }
 0x7d1   :  { %6432 = vmatmul.mubr.bf16.vlgmr.msra.gmra.mrb[40].mxu1 %v8819_v38 }
 0x7d2   :  { %6482 = vmatpush1.bf16.msra.mxu1 %v7172_v36  ;;  %6513 = vmatprep.mubr.bf16.mxu1 %v8684_v8  ;;  %v6678_v36 = vrot.slane %v6670_v25, %v8677_v61  ;;  %v3030_v25 = vld [vmem:[#allocation13 + $0xa68] sm:$0xff] }
 0x7d3   :  { %6483 = vmatprep.subr.bf16.mxu1 %v7205_v20 }
 0x7d6   :  { %6484 = vmatpush1.bf16.msra.mxu1 %v7204_v44 }
 0x7d7   :  { %6485 = vmatprep.subr.bf16.mxu1 %v7237_v45 }
 0x7da   :  { %6486 = vmatpush1.bf16.msra.mxu1 %v7236_v27  ;;  %v3046_v27 = vld [vmem:[#allocation13 + $0xae8] sm:$0xff] }
 0x7db   :  { %6487 = vmatprep.subr.bf16.mxu1 %v7269_v46  ;;  %v7460_v46 = vcombine.low %v2998_v11, %v3014_v18  ;;  %v7493_v47 = vcombine.high %v3030_v25, %v3046_v27  ;;  %v2808_v11 = vld [vmem:[#allocation13 + $0x378] sm:$0xff] }
 0x7dc   :  { %v2824_v18 = vld [vmem:[#allocation13 + $0x3f8] sm:$0xff] }
 0x7de   :  { %6488 = vmatpush1.bf16.msra.mxu1 %v7268_v49  ;;  %v3078_v49 = vld [vmem:[#allocation13 + $0xbe8] sm:$0xff] }
 0x7df   :  { %6489 = vmatprep.subr.bf16.mxu1 %v7301_v54  ;;  %v7492_v54 = vcombine.low %v3030_v25, %v3046_v27  ;;  %v7525_v58 = vcombine.high %v3062_v63, %v3078_v49  ;;  %v2840_v25 = vld [vmem:[#allocation13 + $0x478] sm:$0xff] }
 0x7e0   :  { %v2856_v27 = vld [vmem:[#allocation13 + $0x4f8] sm:$0xff] }
 0x7e2   :  { %6490 = vmatpush1.bf16.msra.mxu1 %v7300_v13  ;;  %v3110_v13 = vld [vmem:[#allocation13 + $0xce8] sm:$0xff] }
 0x7e3   :  { %6491 = vmatprep.subr.bf16.mxu1 %v7333_v55  ;;  %v7524_v55 = vcombine.low %v3062_v63, %v3078_v49  ;;  %v7557_v57 = vcombine.high %v3094_v1, %v3110_v13  ;;  %v2872_v63 = vld [vmem:[#allocation13 + $0x578] sm:$0xff] }
 0x7e4   :  { %v6187_v3 = vpop.f32.mrb[28].mxu1  ;;  %v2888_v49 = vld [vmem:[#allocation13 + $0x5f8] sm:$0xff] }
 0x7e5   :  { %v6188_v16 = vadd.f32 %v6187_v3, %v3260_v60  ;;  %v6189_v41 = vpop.f32.mrb[29].mxu1  ;;  %v3142_v60 = vld [vmem:[#allocation13 + $0xde8] sm:$0xff] }
 0x7e6   :  { %v6190_v29 = vadd.f32 %v6189_v41, %v3264_v5  ;;  %v6191_v21 = vpop.f32.mrb[30].mxu1  ;;  %6492 = vmatpush1.bf16.msra.mxu1 %v7332_v62  ;;  %v7556_v5 = vcombine.low %v3094_v1, %v3110_v13  ;;  %v7589_v62 = vcombine.high %v3126_v12, %v3142_v60  ;;  %v3174_v3 = vld [vmem:[#allocation13 + $0xee8] sm:$0xff]  ;;  %v7588_v4 = vcombine.low %v3126_v12, %v3142_v60  ;;  %v2920_v1 = vld [vmem:[#allocation13 + $0x6f8] sm:$0xff] }
 0x7e7   :  { %v6192_v24 = vpop.f32.mrb[31].mxu1  ;;  %6493 = vmatprep.subr.bf16.mxu1 %v7365_v0  ;;  %v3158_v0 = vld [vmem:[#allocation13 + $0xe68] sm:$0xff]  ;;  %v3276_v13 = vrot.slane %v8823_v56, %v8787_v48 }
 0x7e8   :  { %v6671_v6 = vcombine.low %v6188_v16, %v6190_v29  ;;  %v7621_v7 = vcombine.high %v3158_v0, %v3174_v3  ;;  %v3190_v16 = vld [vmem:[#allocation13 + $0xf68] sm:$0xff]  ;;  %v7620_v29 = vcombine.low %v3158_v0, %v3174_v3  ;;  %v2728_v24 = vld [vmem:[#allocation13 + $0xf8] sm:$0xff] }
 0x7e9   :  { %v3206_v41 = vld [vmem:[#allocation13 + $0xfe8] sm:$0xff] }
 0x7ea   :  { %v6685_v20 = vrot.slane %v6671_v6, %v8677_v61  ;;  %6494 = vmatpush1.bf16.msra.mxu1 %v7364_v43  ;;  %v7653_v21 = vcombine.high %v3190_v16, %v3206_v41  ;;  %v2712_v43 = vld [vmem:[#allocation13 + $0x78] sm:$0xff] }
 0x7eb   :  { %6495 = vmatprep.subr.bf16.mxu1 %v7397_v35  ;;  %v7652_v35 = vcombine.low %v3190_v16, %v3206_v41  ;;  %v7177_v6 = vcombine.high %v2712_v43, %v2728_v24 }
 0x7ec   :  { %v6686_v44 = vcombine.low %v6678_v36, %v6685_v20  ;;  %v6790_v45 = vcombine.high %v6678_v36, %v6685_v20  ;;  %v7176_v36 = vcombine.low %v2712_v43, %v2728_v24  ;;  %v7209_v20 = vcombine.high %v2744_v28, %v2760_v30  ;;  %v2968_v43 = vld [vmem:[#allocation13 + $0x878] sm:$0xff] }
 0x7ed   :  { %v2984_v24 = vld [vmem:[#allocation13 + $0x8f8] sm:$0xff] }
 0x7ee   :  { %6782 = vst [vmem:[%s8945_s9 + $0x10] sm:$0xff] %v6686_v44  ;;  %7660 = vst [vmem:[%s8945_s9 + $0x50] sm:$0xff] %v6790_v45  ;;  %6496 = vmatpush1.bf16.msra.mxu1 %v7396_v39  ;;  %v2776_v39 = vld [vmem:[#allocation13 + $0x278] sm:$0xff]  ;;  %v7208_v44 = vcombine.low %v2744_v28, %v2760_v30  ;;  %v7433_v28 = vcombine.high %v2968_v43, %v2984_v24  ;;  %v7432_v59 = vcombine.low %v2968_v43, %v2984_v24 }
 0x7ef   :  { %6497 = vmatprep.subr.bf16.mxu1 %v7429_v42  ;;  %v2792_v42 = vld [vmem:[#allocation13 + $0x2f8] sm:$0xff] }
 0x7f0   :  { %v7241_v45 = vcombine.high %v2776_v39, %v2792_v42 }
 0x7f2   :  { %6498 = vmatpush1.bf16.msra.mxu1 %v7428_v10  ;;  %v7240_v10 = vcombine.low %v2776_v39, %v2792_v42  ;;  %v3016_v39 = vld [vmem:[#allocation13 + $0x9f8] sm:$0xff] }
 0x7f3   :  { %6499 = vmatprep.subr.bf16.mxu1 %v7461_v19  ;;  %v7273_v19 = vcombine.high %v2808_v11, %v2824_v18  ;;  %v3048_v42 = vld [vmem:[#allocation13 + $0xaf8] sm:$0xff] }
 0x7f6   :  { %6500 = vmatpush1.bf16.msra.mxu1 %v7460_v46  ;;  %v7272_v46 = vcombine.low %v2808_v11, %v2824_v18  ;;  %v3064_v11 = vld [vmem:[#allocation13 + $0xb78] sm:$0xff] }
 0x7f7   :  { %6501 = vmatprep.subr.bf16.mxu1 %v7493_v47  ;;  %v7305_v47 = vcombine.high %v2840_v25, %v2856_v27  ;;  %v3080_v18 = vld [vmem:[#allocation13 + $0xbf8] sm:$0xff] }
 0x7fa   :  { %6502 = vmatpush1.bf16.msra.mxu1 %v7492_v54  ;;  %v7304_v54 = vcombine.low %v2840_v25, %v2856_v27  ;;  %v3096_v25 = vld [vmem:[#allocation13 + $0xc78] sm:$0xff] }
 0x7fb   :  { %6503 = vmatprep.subr.bf16.mxu1 %v7525_v58  ;;  %v2904_v58 = vld [vmem:[#allocation13 + $0x678] sm:$0xff] }
 0x7fc   :  { %v7369_v12 = vcombine.high %v2904_v58, %v2920_v1  ;;  %v7368_v16 = vcombine.low %v2904_v58, %v2920_v1  ;;  %v3112_v27 = vld [vmem:[#allocation13 + $0xcf8] sm:$0xff] }
 0x7fd   :  { %v3160_v58 = vld [vmem:[#allocation13 + $0xe78] sm:$0xff] }
 0x7fe   :  { %6504 = vmatpush1.bf16.msra.mxu1 %v7524_v55  ;;  %v3280_v55 = vrot.slane %v8823_v56, %v8790_v52  ;;  %v6695_v56 = vrot.slane %v6687_v14, %v8677_v61  ;;  %v3032_v14 = vld [vmem:[#allocation13 + $0xa78] sm:$0xff] }
 0x7ff   :  { %6505 = vmatprep.subr.bf16.mxu1 %v7557_v57  ;;  %v7336_v57 = vcombine.low %v2872_v63, %v2888_v49  ;;  %v3176_v1 = vld [vmem:[#allocation13 + $0xef8] sm:$0xff] }
 0x802   :  { %6506 = vmatpush1.bf16.msra.mxu1 %v7556_v5  ;;  %v2936_v5 = vld [vmem:[#allocation13 + $0x778] sm:$0xff] }
 0x803   :  { %6507 = vmatprep.subr.bf16.mxu1 %v7589_v62  ;;  %v2952_v62 = vld [vmem:[#allocation13 + $0x7f8] sm:$0xff] }
 0x806   :  { %6508 = vmatpush1.bf16.msra.mxu1 %v7588_v4 }
 0x807   :  { %6509 = vmatprep.subr.bf16.mxu1 %v7621_v7 }
 0x80a   :  { %6510 = vmatpush1.bf16.msra.mxu1 %v7620_v29  ;;  %v7401_v29 = vcombine.high %v2936_v5, %v2952_v62 }
 0x80b   :  { %6511 = vmatprep.subr.bf16.mxu1 %v7653_v21 }
 0x80e   :  { %6512 = vmatpush1.bf16.msra.mxu1 %v7652_v35 }
 0x80f   :  { %6563 = vmatprep.subr.bf16.mxu1 %v7177_v6  ;;  %v7400_v6 = vcombine.low %v2936_v5, %v2952_v62 }
 0x811   :  { %6514 = vmatmul.mubr.bf16.vlgmr.msra.gmra.mrb[44].mxu1 %v8819_v38 }
 0x812   :  { %6564 = vmatpush1.bf16.msra.mxu1 %v7176_v36  ;;  %6595 = vmatprep.mubr.bf16.mxu1 %v8684_v8  ;;  %v7337_v8 = vcombine.high %v2872_v63, %v2888_v49  ;;  %v3128_v63 = vld [vmem:[#allocation13 + $0xd78] sm:$0xff] }
 0x813   :  { %6565 = vmatprep.subr.bf16.mxu1 %v7209_v20  ;;  %v3000_v20 = vld [vmem:[#allocation13 + $0x978] sm:$0xff] }
 0x814   :  { %v7465_v2 = vcombine.high %v3000_v20, %v3016_v39  ;;  %v3144_v49 = vld [vmem:[#allocation13 + $0xdf8] sm:$0xff] }
 0x816   :  { %6566 = vmatpush1.bf16.msra.mxu1 %v7208_v44  ;;  %v7464_v44 = vcombine.low %v3000_v20, %v3016_v39 }
 0x817   :  { %6567 = vmatprep.subr.bf16.mxu1 %v7241_v45  ;;  %v7497_v45 = vcombine.high %v3032_v14, %v3048_v42 }
 0x81a   :  { %6568 = vmatpush1.bf16.msra.mxu1 %v7240_v10  ;;  %v7496_v10 = vcombine.low %v3032_v14, %v3048_v42 }
 0x81b   :  { %6569 = vmatprep.subr.bf16.mxu1 %v7273_v19  ;;  %v7529_v19 = vcombine.high %v3064_v11, %v3080_v18 }
 0x81e   :  { %6570 = vmatpush1.bf16.msra.mxu1 %v7272_v46  ;;  %v7528_v46 = vcombine.low %v3064_v11, %v3080_v18  ;;  %v3328_v11 = vrot.slane %v8792_v53, %v8672_v51 }
 0x81f   :  { %6571 = vmatprep.subr.bf16.mxu1 %v7305_v47  ;;  %v7561_v47 = vcombine.high %v3096_v25, %v3112_v27 }
 0x822   :  { %6572 = vmatpush1.bf16.msra.mxu1 %v7304_v54  ;;  %v7560_v54 = vcombine.low %v3096_v25, %v3112_v27  ;;  %v6746_v27 = vrot.slane %v6738_v32, %v8677_v61 }
 0x823   :  { %6573 = vmatprep.subr.bf16.mxu1 %v7337_v8  ;;  %v7593_v8 = vcombine.high %v3128_v63, %v3144_v49 }
 0x824   :  { %v6269_v60 = vpop.f32.mrb[32].mxu1 }
 0x825   :  { %v6270_v0 = vadd.f32 %v6269_v60, %v3276_v13  ;;  %v6271_v3 = vpop.f32.mrb[33].mxu1  ;;  %v7592_v13 = vcombine.low %v3128_v63, %v3144_v49  ;;  %v7624_v60 = vcombine.low %v3160_v58, %v3176_v1 }
 0x826   :  { %v6272_v4 = vadd.f32 %v6271_v3, %v3280_v55  ;;  %v6273_v7 = vpop.f32.mrb[34].mxu1  ;;  %6574 = vmatpush1.bf16.msra.mxu1 %v7336_v57  ;;  %v7625_v55 = vcombine.high %v3160_v58, %v3176_v1  ;;  %v3192_v57 = vld [vmem:[#allocation13 + $0xf78] sm:$0xff]  ;;  %v6763_v1 = vrot.slane %v6755_v37, %v8677_v61 }
 0x827   :  { %v6274_v41 = vpop.f32.mrb[35].mxu1  ;;  %6575 = vmatprep.subr.bf16.mxu1 %v7369_v12  ;;  %v3208_v12 = vld [vmem:[#allocation13 + $0xff8] sm:$0xff] }
 0x828   :  { %v6688_v21 = vcombine.low %v6270_v0, %v6272_v4  ;;  %v7657_v5 = vcombine.high %v3192_v57, %v3208_v12  ;;  %v7656_v62 = vcombine.low %v3192_v57, %v3208_v12  ;;  %v8198_v0 = vld [vmem:[#allocation14 + $0x10] sm:$0xff] }
 0x829   :  { %v3292_v3 = vrot.slane %v8198_v0, %v8669_v50  ;;  %v3296_v4 = vrot.slane %v8198_v0, %v8672_v51  ;;  %v3344_v51 = vrot.slane %v8792_v53, %v8790_v52 }
 0x82a   :  { %v6702_v35 = vrot.slane %v6688_v21, %v8677_v61  ;;  %6576 = vmatpush1.bf16.msra.mxu1 %v7368_v16 }
 0x82b   :  { %6577 = vmatprep.subr.bf16.mxu1 %v7401_v29 }
 0x82c   :  { %v6703_v30 = vcombine.low %v6695_v56, %v6702_v35  ;;  %v6791_v36 = vcombine.high %v6695_v56, %v6702_v35  ;;  %v6712_v56 = vrot.slane %v6704_v40, %v8677_v61 }
 0x82e   :  { %6783 = vst [vmem:[%s8945_s9 + $0x18] sm:$0xff] %v6703_v30  ;;  %7661 = vst [vmem:[%s8945_s9 + $0x58] sm:$0xff] %v6791_v36  ;;  %6578 = vmatpush1.bf16.msra.mxu1 %v7400_v6  ;;  %v3312_v30 = vrot.slane %v8198_v0, %v8790_v52 }
 0x82f   :  { %6579 = vmatprep.subr.bf16.mxu1 %v7433_v28  ;;  %v3308_v28 = vrot.slane %v8198_v0, %v8787_v48 }
 0x832   :  { %6580 = vmatpush1.bf16.msra.mxu1 %v7432_v59 }
 0x833   :  { %6581 = vmatprep.subr.bf16.mxu1 %v7465_v2  ;;  %v6729_v2 = vrot.slane %v6721_v34, %v8677_v61 }
 0x836   :  { %6582 = vmatpush1.bf16.msra.mxu1 %v7464_v44 }
 0x837   :  { %6583 = vmatprep.subr.bf16.mxu1 %v7497_v45  ;;  %v3324_v45 = vrot.slane %v8792_v53, %v8669_v50  ;;  %v3340_v50 = vrot.slane %v8792_v53, %v8787_v48 }
 0x83a   :  { %6584 = vmatpush1.bf16.msra.mxu1 %v7496_v10 }
 0x83b   :  { %6585 = vmatprep.subr.bf16.mxu1 %v7529_v19 }
 0x83e   :  { %6586 = vmatpush1.bf16.msra.mxu1 %v7528_v46 }
 0x83f   :  { %6587 = vmatprep.subr.bf16.mxu1 %v7561_v47 }
 0x842   :  { %6588 = vmatpush1.bf16.msra.mxu1 %v7560_v54 }
 0x843   :  { %6589 = vmatprep.subr.bf16.mxu1 %v7593_v8 }
 0x846   :  { %6590 = vmatpush1.bf16.msra.mxu1 %v7592_v13 }
 0x847   :  { %6591 = vmatprep.subr.bf16.mxu1 %v7625_v55 }
 0x84a   :  { %6592 = vmatpush1.bf16.msra.mxu1 %v7624_v60 }
 0x84b   :  { %6593 = vmatprep.subr.bf16.mxu1 %v7657_v5 }
 0x84e   :  { %6594 = vmatpush1.bf16.msra.mxu1 %v7656_v62 }
 0x851   :  { %6596 = vmatmul.mubr.bf16.vlgmr.msra.gmra.mrb[48].mxu1 %v8819_v38 }
 0x864   :  { %v6351_v7 = vpop.f32.mrb[36].mxu1 }
 0x865   :  { %v6352_v16 = vadd.f32 %v6351_v7, %v3292_v3  ;;  %v6353_v41 = vpop.f32.mrb[37].mxu1 }
 0x866   :  { %v6354_v29 = vadd.f32 %v6353_v41, %v3296_v4  ;;  %v6355_v21 = vpop.f32.mrb[38].mxu1 }
 0x867   :  { %v6356_v43 = vpop.f32.mrb[39].mxu1 }
 0x868   :  { %v6705_v24 = vcombine.low %v6352_v16, %v6354_v29 }
 0x86a   :  { %v6719_v35 = vrot.slane %v6705_v24, %v8677_v61 }
 0x86c   :  { %v6720_v38 = vcombine.low %v6712_v56, %v6719_v35  ;;  %v6792_v6 = vcombine.high %v6712_v56, %v6719_v35 }
 0x86e   :  { %6784 = vst [vmem:[%s8945_s9 + $0x20] sm:$0xff] %v6720_v38  ;;  %7662 = vst [vmem:[%s8945_s9 + $0x60] sm:$0xff] %v6792_v6 }
 0x8a4   :  { %v6433_v36 = vpop.f32.mrb[40].mxu1 }
 0x8a5   :  { %v6434_v20 = vadd.f32 %v6433_v36, %v3308_v28  ;;  %v6435_v26 = vpop.f32.mrb[41].mxu1 }
 0x8a6   :  { %v6436_v31 = vadd.f32 %v6435_v26, %v3312_v30  ;;  %v6437_v40 = vpop.f32.mrb[42].mxu1 }
 0x8a7   :  { %v6438_v39 = vpop.f32.mrb[43].mxu1 }
 0x8a8   :  { %v6722_v59 = vcombine.low %v6434_v20, %v6436_v31 }
 0x8aa   :  { %v6736_v14 = vrot.slane %v6722_v59, %v8677_v61 }
 0x8ac   :  { %v6737_v42 = vcombine.low %v6729_v2, %v6736_v14  ;;  %v6793_v44 = vcombine.high %v6729_v2, %v6736_v14 }
 0x8ae   :  { %6785 = vst [vmem:[%s8945_s9 + $0x28] sm:$0xff] %v6737_v42  ;;  %7663 = vst [vmem:[%s8945_s9 + $0x68] sm:$0xff] %v6793_v44 }
 0x8e4   :  { %v6515_v17 = vpop.f32.mrb[44].mxu1 }
 0x8e5   :  { %v6516_v23 = vadd.f32 %v6515_v17, %v3324_v45  ;;  %v6517_v34 = vpop.f32.mrb[45].mxu1 }
 0x8e6   :  { %v6518_v18 = vadd.f32 %v6517_v34, %v3328_v11  ;;  %v6519_v10 = vpop.f32.mrb[46].mxu1 }
 0x8e7   :  { %v6520_v19 = vpop.f32.mrb[47].mxu1 }
 0x8e8   :  { %v6739_v25 = vcombine.low %v6516_v23, %v6518_v18 }
 0x8ea   :  { %v6753_v46 = vrot.slane %v6739_v25, %v8677_v61 }
 0x8ec   :  { %v6754_v47 = vcombine.low %v6746_v27, %v6753_v46  ;;  %v6794_v63 = vcombine.high %v6746_v27, %v6753_v46 }
 0x8ee   :  { %6786 = vst [vmem:[%s8945_s9 + $0x30] sm:$0xff] %v6754_v47  ;;  %7664 = vst [vmem:[%s8945_s9 + $0x70] sm:$0xff] %v6794_v63 }
 0x924   :  { %v6597_v9 = vpop.f32.mrb[48].mxu1 }
 0x925   :  { %v6598_v33 = vadd.f32 %v6597_v9, %v3340_v50  ;;  %v6599_v32 = vpop.f32.mrb[49].mxu1 }
 0x926   :  { %v6600_v49 = vadd.f32 %v6599_v32, %v3344_v51  ;;  %v6601_v54 = vpop.f32.mrb[50].mxu1 }
 0x927   :  { %v6602_v8 = vpop.f32.mrb[51].mxu1 }
 0x928   :  { %v6756_v58 = vcombine.low %v6598_v33, %v6600_v49 }
 0x92a   :  { %v6770_v13 = vrot.slane %v6756_v58, %v8677_v61 }
 0x92c   :  { %v6771_v55 = vcombine.low %v6763_v1, %v6770_v13  ;;  %v6795_v57 = vcombine.high %v6763_v1, %v6770_v13 }
 0x92e   :  { %6787 = vst [vmem:[%s8945_s9 + $0x38] sm:$0xff] %v6771_v55  ;;  %7665 = vst [vmem:[%s8945_s9 + $0x78] sm:$0xff] %v6795_v57 }
 0x92f   :  { %6817 = vsyncpa [#allocation4], 1 }
 0x930   :  { %6818 = vsyncpa [#allocation6], 1 }
 0x931   :  { %6819 = vsyncpa [#allocation9], 1 }
 0x932   :  { %6820 = vsyncpa [#allocation12], 1 }
 0x933   :  { %6821 = vsyncpa [#allocation15], 1 }

</bundles_post_ra>
